<compile_context>
chip_gen: v5e
topology: v5e:2x2
jax: 0.10.0
libtpu: 0.0.40
codegen_flags: <defaults>
</compile_context>

<pallas_src>
import jax
import jax.numpy as jnp
from jax.experimental import pallas as pl
from jax.experimental.pallas import tpu as pltpu

HIDDEN = 768
MID = 512
OUT_PAD = 128  # lane-dense output width (>= 2 * num_labels)
FIELDS = ("edat", "genere", "c_alta", "periode", "servei")
EMB_LIMITS = {"edat": 100, "genere": 3, "c_alta": 3, "periode": 100, "servei": 100}
EMB_DIMS = {"edat": 32, "genere": 16, "c_alta": 16, "periode": 32, "servei": 32}
CAT_TOTAL = sum(EMB_DIMS.values())  # 128


def _round_up(x, m):
    return ((x + m - 1) // m) * m


def _fused_heads_kernel(text_ref, cat_ref,
                        w1_ref, w1c_ref, b1_ref,
                        w2_ref, b2_ref,
                        out_ref):
    """Fused two-head classifier with the categorical projection folded in.

    text_ref : [TB, 768]  bf16     cat_ref  : [TB, 128]  bf16
    w1_ref   : [768, 1024] bf16    w1c_ref  : [128, 1024] bf16 (= wp @ w1)
    b1_ref   : [1, 1024]  f32      (= bp @ w1 + [b1c | b1o])
    w2_ref   : [1024, 128] bf16    b2_ref   : [1, 128]   f32  (block-diag, padded)
    out_ref  : [TB, 128]  f32      (cols [:L] = code, [L:2L] = order)
    """
    # h = ReLU(text @ w1 + cat @ (wp@w1) + (bp@w1 + b1))      (f32 accumulate)
    h = (jnp.dot(text_ref[...], w1_ref[...], preferred_element_type=jnp.float32)
         + jnp.dot(cat_ref[...], w1c_ref[...], preferred_element_type=jnp.float32)
         + b1_ref[...])
    h = jnp.maximum(h, 0.0)

    # Fused second layers (block-diagonal weights): Linear(1024 -> 128)
    out_ref[...] = jnp.dot(h.astype(jnp.bfloat16), w2_ref[...],
                           preferred_element_type=jnp.float32) + b2_ref[...]


def init_params(key, num_labels):
    """Deterministic synthetic parameters with the shapes implied by __init__."""
    keys = jax.random.split(key, 16)
    k = iter(keys)

    def lin(kw, kb, fan_in, fan_out):
        w = jax.random.normal(kw, (fan_in, fan_out), jnp.float32) * 0.02
        b = jax.random.normal(kb, (1, fan_out), jnp.float32) * 0.02
        return w, b

    params = {"emb": {}}
    for field in FIELDS:
        params["emb"][field] = jax.random.normal(
            next(k), (EMB_LIMITS[field], EMB_DIMS[field]), jnp.float32) * 0.02
    params["wp"], params["bp"] = lin(next(k), next(k), CAT_TOTAL, HIDDEN)
    params["w1c"], params["b1c"] = lin(next(k), next(k), HIDDEN, MID)
    params["w2c"], params["b2c"] = lin(next(k), next(k), MID, num_labels)
    params["w1o"], params["b1o"] = lin(next(k), next(k), HIDDEN, MID)
    params["w2o"], params["b2o"] = lin(next(k), next(k), MID, num_labels)
    return params


def pack_params(params):
    """One-time packing: fuse heads, fold the categorical projection into w1,
    and cast matmul weights to bf16 (folds are computed in f32)."""
    num_labels = params["w2c"].shape[1]
    assert 2 * num_labels <= OUT_PAD, "increase OUT_PAD for this num_labels"

    # First layers side-by-side: combined @ [w1c | w1o] = [hc | ho]
    w1 = jnp.concatenate([params["w1c"], params["w1o"]], axis=1)          # [768,1024]
    b1 = jnp.concatenate([params["b1c"], params["b1o"]], axis=1)          # [1,1024]

    # Fold the categorical projection + residual into the first layer:
    #   (text + cat@wp + bp) @ w1 = text@w1 + cat@(wp@w1) + (bp@w1 + b1)
    w1_cat = jnp.dot(params["wp"], w1)                                    # [128,1024]
    b1_fused = jnp.dot(params["bp"], w1) + b1                             # [1,1024]

    # Second layers block-diagonal + zero-padded to 128 lane-dense columns:
    # [hc | ho] @ [[w2c, 0],[0, w2o]] = [code | order] (+ zero pad cols)
    w2 = jnp.zeros((2 * MID, OUT_PAD), jnp.float32)
    w2 = w2.at[:MID, :num_labels].set(params["w2c"])
    w2 = w2.at[MID:, num_labels:2 * num_labels].set(params["w2o"])
    b2 = jnp.zeros((1, OUT_PAD), jnp.float32)
    b2 = b2.at[0, :num_labels].set(params["b2c"][0])
    b2 = b2.at[0, num_labels:2 * num_labels].set(params["b2o"][0])

    return {
        "emb": params["emb"],
        "w1": w1.astype(jnp.bfloat16),
        "w1_cat": w1_cat.astype(jnp.bfloat16),
        "b1": b1_fused.astype(jnp.float32),
        "w2": w2.astype(jnp.bfloat16),
        "b2": b2.astype(jnp.float32),
        "num_labels": num_labels,
    }


def cie10_forward(packed, text_cls, cat_inputs, *, batch_tile=512):
    """Forward pass equivalent to CIE10Classifier.forward (post-encoder part).

    text_cls   : [B, 768] float (Longformer CLS embedding, see TODO above)
    cat_inputs : dict of int32 arrays with shape [B, 1]
    returns    : (code_logits [B, L], order_logits [B, L])
    """
    # --- glue: categorical embedding lookups (clamp + gather + concat) ---
    parts = []
    for field in FIELDS:
        idx = jnp.clip(cat_inputs[field].squeeze(-1), 0, EMB_LIMITS[field] - 1)
        parts.append(jnp.take(packed["emb"][field], idx, axis=0))
    cat_concat = jnp.concatenate(parts, axis=-1).astype(jnp.bfloat16)  # [B, 128]
    text_b = text_cls.astype(jnp.bfloat16)                             # [B, 768]

    B = text_cls.shape[0]
    L = packed["num_labels"]

    # Pad batch to a multiple of the tile (>= one bf16 sublane group of 16)
    # so every grid step works on a full, unmasked tile.
    TB = min(batch_tile, _round_up(B, 16))
    B_pad = _round_up(B, TB)
    if B_pad != B:
        text_b = jnp.pad(text_b, ((0, B_pad - B), (0, 0)))
        cat_concat = jnp.pad(cat_concat, ((0, B_pad - B), (0, 0)))
    num_blocks = B_pad // TB

    act_spec = lambda d: pl.BlockSpec((TB, d), lambda i: (i, 0))
    # Weights/biases: same block for every grid step -> stay VMEM-resident
    # (never re-fetched after the first step).
    res_spec = lambda s: pl.BlockSpec(s, lambda i: (0, 0))

    out = pl.pallas_call(
        _fused_heads_kernel,
        out_shape=jax.ShapeDtypeStruct((B_pad, OUT_PAD), jnp.float32),
        grid=(num_blocks,),
        in_specs=[
            act_spec(HIDDEN),                 # text_b      [TB, 768] bf16
            act_spec(CAT_TOTAL),              # cat_concat  [TB, 128] bf16
            res_spec((HIDDEN, 2 * MID)),      # w1 (fused heads)
            res_spec((CAT_TOTAL, 2 * MID)),   # w1_cat (folded projection)
            res_spec((1, 2 * MID)),           # b1 (fused + folded)
            res_spec((2 * MID, OUT_PAD)),     # w2 (fused, padded)
            res_spec((1, OUT_PAD)),           # b2
        ],
        out_specs=pl.BlockSpec((TB, OUT_PAD), lambda i: (i, 0)),
        compiler_params=pltpu.CompilerParams(
            dimension_semantics=("parallel",)),
    )(text_b, cat_concat,
      packed["w1"], packed["w1_cat"], packed["b1"],
      packed["w2"], packed["b2"])

    return out[:B, :L], out[:B, L:2 * L]


def _reference_forward(params, text_cls, cat_inputs):
    """Plain-JAX reference following the original (unfolded) computation order
    with bf16 matmul inputs and f32 accumulation."""
    parts = []
    for field in FIELDS:
        idx = jnp.clip(cat_inputs[field].squeeze(-1), 0, EMB_LIMITS[field] - 1)
        parts.append(jnp.take(params["emb"][field], idx, axis=0))
    cat = jnp.concatenate(parts, axis=-1)

    def bdot(a, w):
        return jnp.dot(a.astype(jnp.bfloat16), w.astype(jnp.bfloat16),
                       preferred_element_type=jnp.float32)

    combined = text_cls + (bdot(cat, params["wp"]) + params["bp"])
    hc = jnp.maximum(bdot(combined, params["w1c"]) + params["b1c"], 0.0)
    code = bdot(hc, params["w2c"]) + params["b2c"]
    ho = jnp.maximum(bdot(combined, params["w1o"]) + params["b1o"], 0.0)
    order = bdot(ho, params["w2o"]) + params["b2o"]
    return code, order


if __name__ == "__main__":
    NUM_LABELS = 16
    BATCH = 2

    key = jax.random.PRNGKey(0)
    k_params, k_text, k_cat = jax.random.split(key, 3)

    params = init_params(k_params, NUM_LABELS)
    packed = pack_params(params)

    # Synthetic "Longformer CLS" embedding and categorical inputs.
    text_cls = jax.random.normal(k_text, (BATCH, HIDDEN), jnp.float32)
    ck = jax.random.split(k_cat, 5)
    cat_inputs = {
        "edat":    jax.random.randint(ck[0], (BATCH, 1), 0, 150, jnp.int32),  # exercises clamp
        "genere":  jax.random.randint(ck[1], (BATCH, 1), 0, 3, jnp.int32),
        "c_alta":  jax.random.randint(ck[2], (BATCH, 1), 0, 3, jnp.int32),
        "periode": jax.random.randint(ck[3], (BATCH, 1), 0, 100, jnp.int32),
        "servei":  jax.random.randint(ck[4], (BATCH, 1), 0, 100, jnp.int32),
    }

    code_logits, order_logits = jax.block_until_ready(
        cie10_forward(packed, text_cls, cat_inputs))

    ref_code, ref_order = _reference_forward(params, text_cls, cat_inputs)
    assert code_logits.shape == (BATCH, NUM_LABELS)
    assert order_logits.shape == (BATCH, NUM_LABELS)
    # Tolerance absorbs bf16 rounding + the pack-time fold's rounding-order change.
    assert jnp.allclose(code_logits, ref_code, atol=2e-2, rtol=2e-2), (
        jnp.max(jnp.abs(code_logits - ref_code)))
    assert jnp.allclose(order_logits, ref_order, atol=2e-2, rtol=2e-2), (
        jnp.max(jnp.abs(order_logits - ref_order)))

    print("KERNEL_OK")
</pallas_src>

<mosaic_0001>
module attributes {stable_mosaic.version = 11 : i64} {
  func.func @_fused_heads_kernel(%arg0: i32, %arg1: memref<16x768xbf16, #tpu.memory_space<vmem>>, %arg2: memref<16x128xbf16, #tpu.memory_space<vmem>>, %arg3: memref<768x1024xbf16, #tpu.memory_space<vmem>>, %arg4: memref<128x1024xbf16, #tpu.memory_space<vmem>>, %arg5: memref<1x1024xf32, #tpu.memory_space<vmem>>, %arg6: memref<1024x128xbf16, #tpu.memory_space<vmem>>, %arg7: memref<1x128xf32, #tpu.memory_space<vmem>>, %arg8: memref<16x128xf32, #tpu.memory_space<vmem>>) attributes {dimension_semantics = [#tpu.dimension_semantics<parallel>], iteration_bounds = array<i64: 1>, scalar_prefetch = 0 : i64, scratch_operands = 0 : i64, tpu.core_type = #tpu.core_type<tc>, window_params = [{transform_indices = @transform_0, window_bounds = array<i64: 16, 768>}, {transform_indices = @transform_1, window_bounds = array<i64: 16, 128>}, {pipeline_mode = #tpu.pipeline_mode<synchronous>, transform_indices = @transform_2, window_bounds = array<i64: 768, 1024>}, {pipeline_mode = #tpu.pipeline_mode<synchronous>, transform_indices = @transform_3, window_bounds = array<i64: 128, 1024>}, {pipeline_mode = #tpu.pipeline_mode<synchronous>, transform_indices = @transform_4, window_bounds = array<i64: 1, 1024>}, {pipeline_mode = #tpu.pipeline_mode<synchronous>, transform_indices = @transform_5, window_bounds = array<i64: 1024, 128>}, {pipeline_mode = #tpu.pipeline_mode<synchronous>, transform_indices = @transform_6, window_bounds = array<i64: 1, 128>}, {transform_indices = @transform_7, window_bounds = array<i64: 16, 128>}]} {
    %c0 = arith.constant 0 : index
    %c0_0 = arith.constant 0 : index
    %0 = vector.load %arg1[%c0, %c0_0] : memref<16x768xbf16, #tpu.memory_space<vmem>>, vector<16x768xbf16>
    %c0_1 = arith.constant 0 : index
    %c0_2 = arith.constant 0 : index
    %1 = vector.load %arg3[%c0_1, %c0_2] : memref<768x1024xbf16, #tpu.memory_space<vmem>>, vector<768x1024xbf16>
    %cst = arith.constant dense<0.000000e+00> : vector<16x1024xf32>
    %2 = tpu.matmul %0, %1, %cst {dimension_numbers = #tpu.dot_dimension_numbers<[1], [0], [0], [1], [0, 0, 1, 1], [], []>} : vector<16x768xbf16>, vector<768x1024xbf16>, vector<16x1024xf32> -> vector<16x1024xf32>
    %c0_3 = arith.constant 0 : index
    %c0_4 = arith.constant 0 : index
    %3 = vector.load %arg2[%c0_3, %c0_4] : memref<16x128xbf16, #tpu.memory_space<vmem>>, vector<16x128xbf16>
    %c0_5 = arith.constant 0 : index
    %c0_6 = arith.constant 0 : index
    %4 = vector.load %arg4[%c0_5, %c0_6] : memref<128x1024xbf16, #tpu.memory_space<vmem>>, vector<128x1024xbf16>
    %cst_7 = arith.constant dense<0.000000e+00> : vector<16x1024xf32>
    %5 = tpu.matmul %3, %4, %cst_7 {dimension_numbers = #tpu.dot_dimension_numbers<[1], [0], [0], [1], [0, 0, 1, 1], [], []>} : vector<16x128xbf16>, vector<128x1024xbf16>, vector<16x1024xf32> -> vector<16x1024xf32>
    %6 = arith.addf %2, %5 : vector<16x1024xf32>
    %c0_8 = arith.constant 0 : index
    %c0_9 = arith.constant 0 : index
    %7 = vector.load %arg5[%c0_8, %c0_9] : memref<1x1024xf32, #tpu.memory_space<vmem>>, vector<1x1024xf32>
    %8 = vector.broadcast %7 : vector<1x1024xf32> to vector<16x1024xf32>
    %9 = arith.addf %6, %8 : vector<16x1024xf32>
    %cst_10 = arith.constant 0.000000e+00 : f32
    %10 = vector.broadcast %cst_10 : f32 to vector<16x1024xf32>
    %11 = arith.maximumf %9, %10 : vector<16x1024xf32>
    %12 = arith.truncf %11 : vector<16x1024xf32> to vector<16x1024xbf16>
    %c0_11 = arith.constant 0 : index
    %c0_12 = arith.constant 0 : index
    %13 = vector.load %arg6[%c0_11, %c0_12] : memref<1024x128xbf16, #tpu.memory_space<vmem>>, vector<1024x128xbf16>
    %cst_13 = arith.constant dense<0.000000e+00> : vector<16x128xf32>
    %14 = tpu.matmul %12, %13, %cst_13 {dimension_numbers = #tpu.dot_dimension_numbers<[1], [0], [0], [1], [0, 0, 1, 1], [], []>} : vector<16x1024xbf16>, vector<1024x128xbf16>, vector<16x128xf32> -> vector<16x128xf32>
    %c0_14 = arith.constant 0 : index
    %c0_15 = arith.constant 0 : index
    %15 = vector.load %arg7[%c0_14, %c0_15] : memref<1x128xf32, #tpu.memory_space<vmem>>, vector<1x128xf32>
    %16 = vector.broadcast %15 : vector<1x128xf32> to vector<16x128xf32>
    %17 = arith.addf %14, %16 : vector<16x128xf32>
    %c0_16 = arith.constant 0 : index
    %c0_17 = arith.constant 0 : index
    %18 = vector.load %arg8[%c0_16, %c0_17] : memref<16x128xf32, #tpu.memory_space<vmem>>, vector<16x128xf32>
    tpu.vector_store %arg8[%c0_16, %c0_17], %17 {strides = array<i32>} : memref<16x128xf32, #tpu.memory_space<vmem>>, vector<16x128xf32>,
    return
  }
  func.func @transform_0(%arg0: i32) -> (i32, i32) {
    %c0_i32 = arith.constant 0 : i32
    %c0_i32_0 = arith.constant 0 : i32
    return %arg0, %c0_i32 : i32, i32
  }
  func.func @transform_1(%arg0: i32) -> (i32, i32) {
    %c0_i32 = arith.constant 0 : i32
    %c0_i32_0 = arith.constant 0 : i32
    return %arg0, %c0_i32 : i32, i32
  }
  func.func @transform_2(%arg0: i32) -> (i32, i32) {
    %c0_i32 = arith.constant 0 : i32
    %c0_i32_0 = arith.constant 0 : i32
    %c0_i32_1 = arith.constant 0 : i32
    return %c0_i32, %c0_i32_0 : i32, i32
  }
  func.func @transform_3(%arg0: i32) -> (i32, i32) {
    %c0_i32 = arith.constant 0 : i32
    %c0_i32_0 = arith.constant 0 : i32
    %c0_i32_1 = arith.constant 0 : i32
    return %c0_i32, %c0_i32_0 : i32, i32
  }
  func.func @transform_4(%arg0: i32) -> (i32, i32) {
    %c0_i32 = arith.constant 0 : i32
    %c0_i32_0 = arith.constant 0 : i32
    %c0_i32_1 = arith.constant 0 : i32
    return %c0_i32, %c0_i32_0 : i32, i32
  }
  func.func @transform_5(%arg0: i32) -> (i32, i32) {
    %c0_i32 = arith.constant 0 : i32
    %c0_i32_0 = arith.constant 0 : i32
    %c0_i32_1 = arith.constant 0 : i32
    return %c0_i32, %c0_i32_0 : i32, i32
  }
  func.func @transform_6(%arg0: i32) -> (i32, i32) {
    %c0_i32 = arith.constant 0 : i32
    %c0_i32_0 = arith.constant 0 : i32
    %c0_i32_1 = arith.constant 0 : i32
    return %c0_i32, %c0_i32_0 : i32, i32
  }
  func.func @transform_7(%arg0: i32) -> (i32, i32) {
    %c0_i32 = arith.constant 0 : i32
    %c0_i32_0 = arith.constant 0 : i32
    return %arg0, %c0_i32 : i32, i32
  }
}

</mosaic_0001>

<bundles_post_ra>
// kernel: tpu_custom_call.1
= control target key start
LH: loop header
LB: loop body
LE: loop exit
PB: predicated region body
PF: predicated region fallthrough
CT: control target
= control target key end

     0   :  { %12 = vsyncpa [#allocation3], 0  ;;  %s7509_s0 = inlined_call_operand.hbm [shape: bf16[16,768], index: 0, kind: input, shape index: {}]   ;;  %s7510_s1 = inlined_call_operand.hbm [shape: bf16[16,128], index: 1, kind: input, shape index: {}]   ;;  %s7511_s2 = inlined_call_operand.hbm [shape: bf16[768,1024], index: 2, kind: input, shape index: {}]   ;;  %s7512_s3 = inlined_call_operand.hbm [shape: bf16[128,1024], index: 3, kind: input, shape index: {}]   ;;  %s7513_s4 = inlined_call_operand.hbm [shape: f32[1,1024], index: 4, kind: input, shape index: {}]   ;;  %s7514_s5 = inlined_call_operand.hbm [shape: bf16[1024,128], index: 5, kind: input, shape index: {}]   ;;  %s7515_s6 = inlined_call_operand.hbm [shape: f32[1,128], index: 6, kind: input, shape index: {}]   ;;  %s7516_s7 = inlined_call_operand.hbm [shape: f32[16,128], index: 7, kind: output, shape index: {}]  }
   0x1   :  { %13 = vsyncpa [#allocation6], 0 }
   0x2   :  { %14 = vsyncpa [#allocation9], 0 }
   0x3   :  { %15 = vsyncpa [#allocation12], 0  ;;  %s34_s26 = sshll.u32 %s7510_s1, 4  ;;  %s35_s26 = int_to_ptr.hbm [resolvable:$true] %s34_s26 }
   0x4   :  { %16 = vsyncpa [#allocation4], 0  ;;  %s7173_s27 = smov [#allocation5]   ;;  %s7174_s29 = smov 64  }
   0x5   :  { %s36_s28 = sshll.u32 %s7173_s27, 4  ;;  %s7175_s30 = smov 4   ;;  %s37_s28 = int_to_ptr.vmem [resolvable:$true] %s36_s28 }
   0x6   :  { %42 = dma.hbm_to_vmem [thread:$0]  %s35_s26, 128, %s37_s28, [#allocation6], %s7174_s29, %s7174_s29, %s7175_s30  }
   0x7   :  { %s60_s10 = sshll.u32 %s7512_s3, 4  ;;  %s7176_s11 = smov [#allocation8]   ;;  %s61_s10 = int_to_ptr.hbm [resolvable:$true] %s60_s10 }
   0x8   :  { %s62_s12 = sshll.u32 %s7176_s11, 4  ;;  %s84_s15 = sshll.u32 %s7514_s5, 4  ;;  %s63_s12 = int_to_ptr.vmem [resolvable:$true] %s62_s12  ;;  %s85_s15 = int_to_ptr.hbm [resolvable:$true] %s84_s15 }
   0x9   :  { %s7177_s1 = smov 512   ;;  %s7178_s16 = smov 32  }
   0xa   :  { %68 = dma.hbm_to_vmem [thread:$0]  %s61_s10, 8192, %s63_s12, [#allocation9], %s7177_s1, %s7177_s1, %s7178_s16  }
   0xb   :  { %s21_s19 = sshll.u32 %s7509_s0, 4  ;;  %s7179_s20 = smov [#allocation11]   ;;  %s22_s19 = int_to_ptr.hbm [resolvable:$true] %s21_s19 }
   0xc   :  { %s86_s21 = sshll.u32 %s7179_s20, 4  ;;  %s7180_s3 = smov [#allocation2]   ;;  %s87_s21 = int_to_ptr.vmem [resolvable:$true] %s86_s21 }
   0xd   :  { %92 = dma.hbm_to_vmem [thread:$0]  %s85_s15, 8192, %s87_s21, [#allocation12], %s7174_s29, %s7174_s29, %s7175_s30  }
   0xe   :  { %s23_s22 = sshll.u32 %s7180_s3, 4  ;;  %s7181_s23 = smov 384   ;;  %s24_s22 = int_to_ptr.vmem [resolvable:$true] %s23_s22 }
   0xf   :  { %s7182_s24 = smov 24   ;;  %s47_s26 = sshll.u32 %s7511_s2, 4  ;;  %s48_s26 = int_to_ptr.hbm [resolvable:$true] %s47_s26 }
  0x10   :  { %29 = dma.hbm_to_vmem [thread:$0]  %s22_s19, 768, %s24_s22, [#allocation3], %s7181_s23, %s7181_s23, %s7182_s24  }
  0x11   :  { %s7183_s27 = smov [#allocation7]   ;;  %s74_s9 = sshll.u32 %s7513_s4, 4  ;;  %s75_s9 = int_to_ptr.hbm [resolvable:$true] %s74_s9 }
  0x12   :  { %s49_s28 = sshll.u32 %s7183_s27, 4  ;;  %s7184_s29 = smov [#allocation10]   ;;  %s50_s28 = int_to_ptr.vmem [resolvable:$true] %s49_s28 }
  0x13   :  { %55 = dma.hbm_to_vmem [thread:$0]  %s48_s26, 49152, %s50_s28, [#allocation6], %s7177_s1, %s7177_s1, %s7178_s16  }
  0x14   :  { %s76_s30 = sshll.u32 %s7184_s29, 4  ;;  %s98_s12 = sshll.u32 %s7515_s6, 4  ;;  %s77_s30 = int_to_ptr.vmem [resolvable:$true] %s76_s30  ;;  %s99_s12 = int_to_ptr.hbm [resolvable:$true] %s98_s12 }
  0x15   :  { %79 = dma.hbm_to_vmem [thread:$0]  %s75_s9, 128, %s77_s30, [#allocation9]  }
  0x16   :  { %s7185_s2 = smov [#allocation13]  }
  0x17   :  { %s100_s13 = sshll.u32 %s7185_s2, 4  ;;  %s101_s13 = int_to_ptr.vmem [resolvable:$true] %s100_s13 }
  0x18   :  { %103 = dma.hbm_to_vmem [thread:$0]  %s99_s12, 16, %s101_s13, [#allocation12]  }
  0x19   :  { %7163 = dma.done.wait [#allocation3], 768  }
  0x1a   :  { %7164 = vsyncadd [#allocation3], 4294966528 }
  0x1b   :  { %7165 = dma.done.wait [#allocation6], 49280  }
  0x1c   :  { %7166 = vsyncadd [#allocation6], 4294918016 }
  0x1d   :  { %7167 = dma.done.wait [#allocation9], 8320  }
  0x1e   :  { %7168 = vsyncadd [#allocation9], 4294958976 }
  0x1f   :  { %7169 = dma.done.wait [#allocation12], 8208  }
  0x20   :  { %7170 = vsyncadd [#allocation12], 4294959088  ;;  %v4588_v0 = vld [vmem:[#allocation8 + $0x1c0] sm:$0xf]  ;;  %v6881_v2 = vld [vmem:[#allocation8 + $0x1c4] sm:$0xf] }
  0x21   :  { %v6885_v1 = vld [vmem:[#allocation8 + $0x1dc] sm:$0xf0]  ;;  %v4590_v4 = vld [vmem:[#allocation8 + $0x1e0] sm:$0xf0]  ;;  %v4596_v5 = vld [vmem:[#allocation8 + $0x1c8] sm:$0xf] }
  0x22   :  { %v4589_v3 = vor.u32 %v6885_v1, %v4588_v0  ;;  %v6886_v6 = vld [vmem:[#allocation8 + $0x1e4] sm:$0xf0]  ;;  %v4593_v7 = vor.u32 %v6881_v2, %v4590_v4  ;;  %v6882_v9 = vld [vmem:[#allocation8 + $0x1cc] sm:$0xf]  ;;  %v4556_v11 = vld [vmem:[#allocation8 + $0x180] sm:$0xf] }
  0x23   :  { %v4597_v8 = vor.u32 %v6886_v6, %v4596_v5  ;;  %v4598_v10 = vld [vmem:[#allocation8 + $0x1e8] sm:$0xf0]  ;;  %v6877_v13 = vld [vmem:[#allocation8 + $0x19c] sm:$0xf0]  ;;  %v6873_v14 = vld [vmem:[#allocation8 + $0x184] sm:$0xf] }
  0x24   :  { %914 = vmatpush.bf16.msra.mxu0 %v4589_v3  ;;  %v4601_v12 = vor.u32 %v6882_v9, %v4598_v10  ;;  %v4558_v15 = vld [vmem:[#allocation8 + $0x1a0] sm:$0xf0]  ;;  %928 = vmatpush.bf16.msra.mxu1 %v4593_v7  ;;  %v4557_v16 = vor.u32 %v6877_v13, %v4556_v11  ;;  %v4564_v18 = vld [vmem:[#allocation8 + $0x188] sm:$0xf]  ;;  %v6874_v20 = vld [vmem:[#allocation8 + $0x18c] sm:$0xf] }
  0x25   :  { %942 = vmatpush.bf16.msra.mxu2 %v4597_v8  ;;  %v4561_v17 = vor.u32 %v6873_v14, %v4558_v15  ;;  %v6878_v19 = vld [vmem:[#allocation8 + $0x1a4] sm:$0xf0]  ;;  %v4566_v22 = vld [vmem:[#allocation8 + $0x1a8] sm:$0xf0]  ;;  %v4524_v23 = vld [vmem:[#allocation8 + $0x140] sm:$0xf] }
  0x26   :  { %956 = vmatpush.bf16.msra.mxu3 %v4601_v12  ;;  %v4565_v21 = vor.u32 %v6878_v19, %v4564_v18  ;;  %v6869_v24 = vld [vmem:[#allocation8 + $0x15c] sm:$0xf0]  ;;  %v4569_v25 = vor.u32 %v6874_v20, %v4566_v22  ;;  %v6865_v26 = vld [vmem:[#allocation8 + $0x144] sm:$0xf]  ;;  %v4532_v28 = vld [vmem:[#allocation8 + $0x148] sm:$0xf] }
  0x27   :  { %v4526_v27 = vld [vmem:[#allocation8 + $0x160] sm:$0xf0]  ;;  %v4525_v29 = vor.u32 %v6869_v24, %v4524_v23  ;;  %v6870_v30 = vld [vmem:[#allocation8 + $0x164] sm:$0xf0]  ;;  %v6866_v31 = vld [vmem:[#allocation8 + $0x14c] sm:$0xf] }
  0x28   :  { %915 = vmatpush.bf16.msra.mxu0 %v4557_v16  ;;  %v4534_v32 = vld [vmem:[#allocation8 + $0x168] sm:$0xf0]  ;;  %929 = vmatpush.bf16.msra.mxu1 %v4561_v17  ;;  %v4529_v33 = vor.u32 %v6865_v26, %v4526_v27  ;;  %v4533_v34 = vor.u32 %v6870_v30, %v4532_v28  ;;  %v4492_v35 = vld [vmem:[#allocation8 + $0x100] sm:$0xf]  ;;  %v6857_v37 = vld [vmem:[#allocation8 + $0x104] sm:$0xf] }
  0x29   :  { %943 = vmatpush.bf16.msra.mxu2 %v4565_v21  ;;  %v6861_v36 = vld [vmem:[#allocation8 + $0x11c] sm:$0xf0]  ;;  %v4537_v38 = vor.u32 %v6866_v31, %v4534_v32  ;;  %v4494_v39 = vld [vmem:[#allocation8 + $0x120] sm:$0xf0]  ;;  %v4500_v40 = vld [vmem:[#allocation8 + $0x108] sm:$0xf] }
  0x2a   :  { %957 = vmatpush.bf16.msra.mxu3 %v4569_v25  ;;  %v6862_v41 = vld [vmem:[#allocation8 + $0x124] sm:$0xf0]  ;;  %v6858_v42 = vld [vmem:[#allocation8 + $0x10c] sm:$0xf]  ;;  %v4493_v44 = vor.u32 %v6861_v36, %v4492_v35  ;;  %v4497_v45 = vor.u32 %v6857_v37, %v4494_v39  ;;  %v4460_v47 = vld [vmem:[#allocation8 + $0xc0] sm:$0xf] }
  0x2b   :  { %v4502_v43 = vld [vmem:[#allocation8 + $0x128] sm:$0xf0]  ;;  %v4501_v46 = vor.u32 %v6862_v41, %v4500_v40  ;;  %v6853_v48 = vld [vmem:[#allocation8 + $0xdc] sm:$0xf0]  ;;  %v6849_v49 = vld [vmem:[#allocation8 + $0xc4] sm:$0xf] }
  0x2c   :  { %916 = vmatpush.bf16.msra.mxu0 %v4525_v29  ;;  %930 = vmatpush.bf16.msra.mxu1 %v4529_v33  ;;  %v4505_v50 = vor.u32 %v6858_v42, %v4502_v43  ;;  %v4462_v51 = vld [vmem:[#allocation8 + $0xe0] sm:$0xf0]  ;;  %v4468_v52 = vld [vmem:[#allocation8 + $0xc8] sm:$0xf]  ;;  %v6850_v54 = vld [vmem:[#allocation8 + $0xcc] sm:$0xf]  ;;  %v4461_v56 = vor.u32 %v6853_v48, %v4460_v47 }
  0x2d   :  { %944 = vmatpush.bf16.msra.mxu2 %v4533_v34  ;;  %v6854_v53 = vld [vmem:[#allocation8 + $0xe4] sm:$0xf0]  ;;  %v4470_v55 = vld [vmem:[#allocation8 + $0xe8] sm:$0xf0]  ;;  %v4465_v57 = vor.u32 %v6849_v49, %v4462_v51  ;;  %v4428_v59 = vld [vmem:[#allocation8 + $0x80] sm:$0xf] }
  0x2e   :  { %958 = vmatpush.bf16.msra.mxu3 %v4537_v38  ;;  %v4469_v58 = vor.u32 %v6854_v53, %v4468_v52  ;;  %v6845_v60 = vld [vmem:[#allocation8 + $0x9c] sm:$0xf0]  ;;  %v6841_v61 = vld [vmem:[#allocation8 + $0x84] sm:$0xf]  ;;  %v4473_v62 = vor.u32 %v6850_v54, %v4470_v55  ;;  %v4436_v0 = vld [vmem:[#allocation8 + $0x88] sm:$0xf] }
  0x2f   :  { %v4430_v63 = vld [vmem:[#allocation8 + $0xa0] sm:$0xf0]  ;;  %v6846_v1 = vld [vmem:[#allocation8 + $0xa4] sm:$0xf0]  ;;  %v6842_v2 = vld [vmem:[#allocation8 + $0x8c] sm:$0xf]  ;;  %v4429_v4 = vor.u32 %v6845_v60, %v4428_v59 }
  0x30   :  { %917 = vmatpush.bf16.msra.mxu0 %v4493_v44  ;;  %931 = vmatpush.bf16.msra.mxu1 %v4497_v45  ;;  %v4438_v3 = vld [vmem:[#allocation8 + $0xa8] sm:$0xf0]  ;;  %v4433_v5 = vor.u32 %v6841_v61, %v4430_v63  ;;  %v4437_v6 = vor.u32 %v6846_v1, %v4436_v0  ;;  %v4396_v7 = vld [vmem:[#allocation8 + $0x40] sm:$0xf]  ;;  %v6833_v9 = vld [vmem:[#allocation8 + $0x44] sm:$0xf] }
  0x31   :  { %945 = vmatpush.bf16.msra.mxu2 %v4501_v46  ;;  %v6837_v8 = vld [vmem:[#allocation8 + $0x5c] sm:$0xf0]  ;;  %v4441_v10 = vor.u32 %v6842_v2, %v4438_v3  ;;  %v4398_v11 = vld [vmem:[#allocation8 + $0x60] sm:$0xf0]  ;;  %v4404_v12 = vld [vmem:[#allocation8 + $0x48] sm:$0xf] }
  0x32   :  { %959 = vmatpush.bf16.msra.mxu3 %v4505_v50  ;;  %v6838_v13 = vld [vmem:[#allocation8 + $0x64] sm:$0xf0]  ;;  %v6834_v14 = vld [vmem:[#allocation8 + $0x4c] sm:$0xf]  ;;  %v4397_v16 = vor.u32 %v6837_v8, %v4396_v7  ;;  %v4364_v17 = vld [vmem:[#allocation8] sm:$0xf]  ;;  %v4401_v19 = vor.u32 %v6833_v9, %v4398_v11 }
  0x33   :  { %v4406_v15 = vld [vmem:[#allocation8 + $0x68] sm:$0xf0]  ;;  %v6829_v18 = vld [vmem:[#allocation8 + $0x1c] sm:$0xf0]  ;;  %v4405_v20 = vor.u32 %v6838_v13, %v4404_v12  ;;  %v6825_v21 = vld [vmem:[#allocation8 + $0x4] sm:$0xf] }
  0x34   :  { %918 = vmatpush.bf16.msra.mxu0 %v4461_v56  ;;  %932 = vmatpush.bf16.msra.mxu1 %v4465_v57  ;;  %v4366_v22 = vld [vmem:[#allocation8 + $0x20] sm:$0xf0]  ;;  %v4372_v23 = vld [vmem:[#allocation8 + $0x8] sm:$0xf]  ;;  %v4409_v24 = vor.u32 %v6834_v14, %v4406_v15  ;;  %v6826_v26 = vld [vmem:[#allocation8 + $0xc] sm:$0xf]  ;;  %v4365_v31 = vor.u32 %v6829_v18, %v4364_v17 }
  0x35   :  { %946 = vmatpush.bf16.msra.mxu2 %v4469_v58  ;;  %v6830_v25 = vld [vmem:[#allocation8 + $0x24] sm:$0xf0]  ;;  %v4374_v27 = vld [vmem:[#allocation8 + $0x28] sm:$0xf0]  ;;  %v4604_v28 = vld [vmem:[#allocation8 + $0x1d0] sm:$0xf]  ;;  %v4369_v35 = vor.u32 %v6825_v21, %v4366_v22 }
  0x36   :  { %960 = vmatpush.bf16.msra.mxu3 %v4473_v62  ;;  %v6887_v29 = vld [vmem:[#allocation8 + $0x1ec] sm:$0xf0]  ;;  %v6883_v30 = vld [vmem:[#allocation8 + $0x1d4] sm:$0xf]  ;;  %v4612_v33 = vld [vmem:[#allocation8 + $0x1d8] sm:$0xf]  ;;  %v4373_v36 = vor.u32 %v6830_v25, %v4372_v23  ;;  %v4377_v39 = vor.u32 %v6826_v26, %v4374_v27 }
  0x37   :  { %v4606_v32 = vld [vmem:[#allocation8 + $0x1f0] sm:$0xf0]  ;;  %v6888_v34 = vld [vmem:[#allocation8 + $0x1f4] sm:$0xf0]  ;;  %v6884_v37 = vld [vmem:[#allocation8 + $0x1dc] sm:$0xf]  ;;  %v4605_v40 = vor.u32 %v6887_v29, %v4604_v28 }
  0x38   :  { %919 = vmatpush.bf16.msra.mxu0 %v4429_v4  ;;  %933 = vmatpush.bf16.msra.mxu1 %v4433_v5  ;;  %v4614_v38 = vld [vmem:[#allocation8 + $0x1f8] sm:$0xf0]  ;;  %v4609_v41 = vor.u32 %v6883_v30, %v4606_v32  ;;  %v4613_v42 = vor.u32 %v6888_v34, %v4612_v33  ;;  %v4572_v43 = vld [vmem:[#allocation8 + $0x190] sm:$0xf]  ;;  %v6875_v45 = vld [vmem:[#allocation8 + $0x194] sm:$0xf] }
  0x39   :  { %947 = vmatpush.bf16.msra.mxu2 %v4437_v6  ;;  %v6879_v44 = vld [vmem:[#allocation8 + $0x1ac] sm:$0xf0]  ;;  %v4617_v46 = vor.u32 %v6884_v37, %v4614_v38  ;;  %v4574_v47 = vld [vmem:[#allocation8 + $0x1b0] sm:$0xf0]  ;;  %v4580_v48 = vld [vmem:[#allocation8 + $0x198] sm:$0xf] }
  0x3a   :  { %961 = vmatpush.bf16.msra.mxu3 %v4441_v10  ;;  %v6880_v49 = vld [vmem:[#allocation8 + $0x1b4] sm:$0xf0]  ;;  %v6876_v50 = vld [vmem:[#allocation8 + $0x19c] sm:$0xf]  ;;  %v4573_v52 = vor.u32 %v6879_v44, %v4572_v43  ;;  %v4577_v53 = vor.u32 %v6875_v45, %v4574_v47  ;;  %v4540_v55 = vld [vmem:[#allocation8 + $0x150] sm:$0xf] }
  0x3b   :  { %v4582_v51 = vld [vmem:[#allocation8 + $0x1b8] sm:$0xf0]  ;;  %v4581_v54 = vor.u32 %v6880_v49, %v4580_v48  ;;  %v6871_v56 = vld [vmem:[#allocation8 + $0x16c] sm:$0xf0]  ;;  %v6867_v57 = vld [vmem:[#allocation8 + $0x154] sm:$0xf] }
  0x3c   :  { %920 = vmatpush.bf16.msra.mxu0 %v4397_v16  ;;  %934 = vmatpush.bf16.msra.mxu1 %v4401_v19  ;;  %v4585_v58 = vor.u32 %v6876_v50, %v4582_v51  ;;  %v4542_v59 = vld [vmem:[#allocation8 + $0x170] sm:$0xf0]  ;;  %v4548_v60 = vld [vmem:[#allocation8 + $0x158] sm:$0xf]  ;;  %v6868_v62 = vld [vmem:[#allocation8 + $0x15c] sm:$0xf]  ;;  %v4541_v0 = vor.u32 %v6871_v56, %v4540_v55 }
  0x3d   :  { %948 = vmatpush.bf16.msra.mxu2 %v4405_v20  ;;  %v6872_v61 = vld [vmem:[#allocation8 + $0x174] sm:$0xf0]  ;;  %v4550_v63 = vld [vmem:[#allocation8 + $0x178] sm:$0xf0]  ;;  %v4545_v2 = vor.u32 %v6867_v57, %v4542_v59  ;;  %v4508_v4 = vld [vmem:[#allocation8 + $0x110] sm:$0xf] }
  0x3e   :  { %962 = vmatpush.bf16.msra.mxu3 %v4409_v24  ;;  %v7250_v1 = vld [vmem:[#allocation5] sm:$0xff]  ;;  %v4549_v3 = vor.u32 %v6872_v61, %v4548_v60  ;;  %v6863_v5 = vld [vmem:[#allocation8 + $0x12c] sm:$0xf0]  ;;  %v6859_v6 = vld [vmem:[#allocation8 + $0x114] sm:$0xf]  ;;  %v4553_v7 = vor.u32 %v6868_v62, %v4550_v63  ;;  %s7186_s4 = smov [#allocation14]  }
  0x3f   :  { %v4510_v8 = vld [vmem:[#allocation8 + $0x130] sm:$0xf0]  ;;  %v4516_v9 = vld [vmem:[#allocation8 + $0x118] sm:$0xf]  ;;  %v6860_v11 = vld [vmem:[#allocation8 + $0x11c] sm:$0xf]  ;;  %v4509_v13 = vor.u32 %v6863_v5, %v4508_v4 }
  0x40   :  { %921 = vmatpush.bf16.msra.mxu0 %v4365_v31  ;;  %935 = vmatpush.bf16.msra.mxu1 %v4369_v35  ;;  %v6864_v10 = vld [vmem:[#allocation8 + $0x134] sm:$0xf0]  ;;  %v4518_v12 = vld [vmem:[#allocation8 + $0x138] sm:$0xf0]  ;;  %v4513_v14 = vor.u32 %v6859_v6, %v4510_v8  ;;  %v4476_v16 = vld [vmem:[#allocation8 + $0xd0] sm:$0xf] }
  0x41   :  { %949 = vmatpush.bf16.msra.mxu2 %v4373_v36  ;;  %v4517_v15 = vor.u32 %v6864_v10, %v4516_v9  ;;  %v6855_v17 = vld [vmem:[#allocation8 + $0xec] sm:$0xf0]  ;;  %v6851_v18 = vld [vmem:[#allocation8 + $0xd4] sm:$0xf]  ;;  %v4521_v19 = vor.u32 %v6860_v11, %v4518_v12  ;;  %v4484_v21 = vld [vmem:[#allocation8 + $0xd8] sm:$0xf] }
  0x42   :  { %963 = vmatpush.bf16.msra.mxu3 %v4377_v39  ;;  %v4478_v20 = vld [vmem:[#allocation8 + $0xf0] sm:$0xf0]  ;;  %v6856_v22 = vld [vmem:[#allocation8 + $0xf4] sm:$0xf0]  ;;  %v6852_v23 = vld [vmem:[#allocation8 + $0xdc] sm:$0xf]  ;;  %v4477_v25 = vor.u32 %v6855_v17, %v4476_v16 }
  0x43   :  { %922 = vmatmul.bf16.vlgmr.msra.gmra.mxu0 %v7250_v1  ;;  %936 = vmatmul.bf16.vlgmr.msra.gmra.mxu1 %v7250_v1  ;;  %v4486_v24 = vld [vmem:[#allocation8 + $0xf8] sm:$0xf0]  ;;  %v4481_v26 = vor.u32 %v6851_v18, %v4478_v20  ;;  %v4485_v27 = vor.u32 %v6856_v22, %v4484_v21  ;;  %v4444_v28 = vld [vmem:[#allocation8 + $0x90] sm:$0xf]  ;;  %v6843_v30 = vld [vmem:[#allocation8 + $0x94] sm:$0xf] }
  0x44   :  { %970 = vmatpush.bf16.msrb.mxu0 %v4605_v40  ;;  %984 = vmatpush.bf16.msrb.mxu1 %v4609_v41  ;;  %v6847_v29 = vld [vmem:[#allocation8 + $0xac] sm:$0xf0]  ;;  %v4489_v31 = vor.u32 %v6852_v23, %v4486_v24  ;;  %v4446_v32 = vld [vmem:[#allocation8 + $0xb0] sm:$0xf0]  ;;  %v4452_v33 = vld [vmem:[#allocation8 + $0x98] sm:$0xf] }
  0x45   :  { %998 = vmatpush.bf16.msrb.mxu2 %v4613_v42  ;;  %964 = vmatmul.bf16.vlgmr.msra.gmra.mxu3 %v7250_v1  ;;  %v6848_v34 = vld [vmem:[#allocation8 + $0xb4] sm:$0xf0]  ;;  %v6844_v35 = vld [vmem:[#allocation8 + $0x9c] sm:$0xf]  ;;  %v4445_v37 = vor.u32 %v6847_v29, %v4444_v28  ;;  %v4449_v38 = vor.u32 %v6843_v30, %v4446_v32  ;;  %v4412_v40 = vld [vmem:[#allocation8 + $0x50] sm:$0xf] }
  0x46   :  { %1012 = vmatpush.bf16.msrb.mxu3 %v4617_v46  ;;  %950 = vmatmul.bf16.vlgmr.msra.gmra.mxu2 %v7250_v1  ;;  %v4454_v36 = vld [vmem:[#allocation8 + $0xb8] sm:$0xf0]  ;;  %v4453_v39 = vor.u32 %v6848_v34, %v4452_v33  ;;  %v6839_v41 = vld [vmem:[#allocation8 + $0x6c] sm:$0xf0]  ;;  %v6835_v42 = vld [vmem:[#allocation8 + $0x54] sm:$0xf] }
  0x47   :  { %v4457_v43 = vor.u32 %v6844_v35, %v4454_v36  ;;  %v4414_v44 = vld [vmem:[#allocation8 + $0x70] sm:$0xf0]  ;;  %v4420_v45 = vld [vmem:[#allocation8 + $0x58] sm:$0xf]  ;;  %v6836_v47 = vld [vmem:[#allocation8 + $0x5c] sm:$0xf]  ;;  %v4413_v49 = vor.u32 %v6839_v41, %v4412_v40 }
  0x48   :  { %971 = vmatpush.bf16.msrb.mxu0 %v4573_v52  ;;  %985 = vmatpush.bf16.msrb.mxu1 %v4577_v53  ;;  %v6840_v46 = vld [vmem:[#allocation8 + $0x74] sm:$0xf0]  ;;  %v4422_v48 = vld [vmem:[#allocation8 + $0x78] sm:$0xf0]  ;;  %v4380_v50 = vld [vmem:[#allocation8 + $0x10] sm:$0xf]  ;;  %v4417_v52 = vor.u32 %v6835_v42, %v4414_v44 }
  0x49   :  { %999 = vmatpush.bf16.msrb.mxu2 %v4581_v54  ;;  %v6831_v51 = vld [vmem:[#allocation8 + $0x2c] sm:$0xf0]  ;;  %v4421_v53 = vor.u32 %v6840_v46, %v4420_v45  ;;  %v6827_v54 = vld [vmem:[#allocation8 + $0x14] sm:$0xf]  ;;  %v4388_v56 = vld [vmem:[#allocation8 + $0x18] sm:$0xf]  ;;  %v4425_v57 = vor.u32 %v6836_v47, %v4422_v48 }
  0x4a   :  { %1013 = vmatpush.bf16.msrb.mxu3 %v4585_v58  ;;  %v4382_v55 = vld [vmem:[#allocation8 + $0x30] sm:$0xf0]  ;;  %v6832_v58 = vld [vmem:[#allocation8 + $0x34] sm:$0xf0]  ;;  %v6828_v59 = vld [vmem:[#allocation8 + $0x1c] sm:$0xf] }
  0x4b   :  { %v4390_v60 = vld [vmem:[#allocation8 + $0x38] sm:$0xf0]  ;;  %v4868_v61 = vld [vmem:[#allocation7 + $0x1c0] sm:$0xf]  ;;  %v4385_v5 = vor.u32 %v6827_v54, %v4382_v55  ;;  %v4389_v6 = vor.u32 %v6832_v58, %v4388_v56  ;;  %s4340_s6 = sshll.u32 %s7186_s4, 4  ;;  %s4342_s1 = sshll.u32 %s7516_s7, 4  ;;  %s4341_s6 = int_to_ptr.vmem [resolvable:$true] %s4340_s6  ;;  %s4343_s1 = int_to_ptr.hbm [resolvable:$true] %s4342_s1 }
  0x4c   :  { %972 = vmatpush.bf16.msrb.mxu0 %v4541_v0  ;;  %986 = vmatpush.bf16.msrb.mxu1 %v4545_v2  ;;  %v6500_v62 = vld [vmem:[#allocation7 + $0x1dc] sm:$0xf0]  ;;  %v4381_v0 = vor.u32 %v6831_v51, %v4380_v50  ;;  %v4393_v9 = vor.u32 %v6828_v59, %v4390_v60  ;;  %s7187_s16 = smov 128   ;;  %s7188_s17 = smov 8  }
  0x4d   :  { %1000 = vmatpush.bf16.msrb.mxu2 %v4549_v3  ;;  %v5124_v63 = vld [vmem:[#allocation7 + $0x3c0] sm:$0xf]  ;;  %v4869_v10 = vor.u32 %v6500_v62, %v4868_v61 }
  0x4e   :  { %1014 = vmatpush.bf16.msrb.mxu3 %v4553_v7  ;;  %v6564_v2 = vld [vmem:[#allocation7 + $0x3dc] sm:$0xf0] }
  0x4f   :  { %v5380_v3 = vld [vmem:[#allocation7 + $0x5c0] sm:$0xf]  ;;  %v5125_v11 = vor.u32 %v6564_v2, %v5124_v63 }
  0x50   :  { %973 = vmatpush.bf16.msrb.mxu0 %v4509_v13  ;;  %987 = vmatpush.bf16.msrb.mxu1 %v4513_v14  ;;  %v6628_v4 = vld [vmem:[#allocation7 + $0x5dc] sm:$0xf0] }
  0x51   :  { %1001 = vmatpush.bf16.msrb.mxu2 %v4517_v15  ;;  %v5636_v7 = vld [vmem:[#allocation7 + $0x7c0] sm:$0xf]  ;;  %v5381_v12 = vor.u32 %v6628_v4, %v5380_v3 }
  0x52   :  { %1015 = vmatpush.bf16.msrb.mxu3 %v4521_v19  ;;  %v6692_v8 = vld [vmem:[#allocation7 + $0x7dc] sm:$0xf0] }
  0x53   :  { %v4836_v13 = vld [vmem:[#allocation7 + $0x180] sm:$0xf]  ;;  %v5637_v16 = vor.u32 %v6692_v8, %v5636_v7 }
  0x54   :  { %974 = vmatpush.bf16.msrb.mxu0 %v4477_v25  ;;  %988 = vmatpush.bf16.msrb.mxu1 %v4481_v26  ;;  %v6492_v14 = vld [vmem:[#allocation7 + $0x19c] sm:$0xf0] }
  0x55   :  { %1002 = vmatpush.bf16.msrb.mxu2 %v4485_v27  ;;  %v5092_v15 = vld [vmem:[#allocation7 + $0x380] sm:$0xf]  ;;  %v4837_v22 = vor.u32 %v6492_v14, %v4836_v13 }
  0x56   :  { %1016 = vmatpush.bf16.msrb.mxu3 %v4489_v31  ;;  %v6556_v17 = vld [vmem:[#allocation7 + $0x39c] sm:$0xf0] }
  0x57   :  { %v5348_v18 = vld [vmem:[#allocation7 + $0x580] sm:$0xf]  ;;  %v5093_v23 = vor.u32 %v6556_v17, %v5092_v15 }
  0x58   :  { %975 = vmatpush.bf16.msrb.mxu0 %v4445_v37  ;;  %989 = vmatpush.bf16.msrb.mxu1 %v4449_v38  ;;  %v6620_v19 = vld [vmem:[#allocation7 + $0x59c] sm:$0xf0] }
  0x59   :  { %1003 = vmatpush.bf16.msrb.mxu2 %v4453_v39  ;;  %v5604_v20 = vld [vmem:[#allocation7 + $0x780] sm:$0xf]  ;;  %v5349_v24 = vor.u32 %v6620_v19, %v5348_v18 }
  0x5a   :  { %1017 = vmatpush.bf16.msrb.mxu3 %v4457_v43  ;;  %v6684_v21 = vld [vmem:[#allocation7 + $0x79c] sm:$0xf0] }
  0x5b   :  { %v4804_v25 = vld [vmem:[#allocation7 + $0x140] sm:$0xf]  ;;  %v5605_v28 = vor.u32 %v6684_v21, %v5604_v20 }
  0x5c   :  { %976 = vmatpush.bf16.msrb.mxu0 %v4413_v49  ;;  %990 = vmatpush.bf16.msrb.mxu1 %v4417_v52  ;;  %v6484_v26 = vld [vmem:[#allocation7 + $0x15c] sm:$0xf0] }
  0x5d   :  { %1004 = vmatpush.bf16.msrb.mxu2 %v4421_v53  ;;  %v5060_v27 = vld [vmem:[#allocation7 + $0x340] sm:$0xf]  ;;  %v4805_v34 = vor.u32 %v6484_v26, %v4804_v25 }
  0x5e   :  { %1018 = vmatpush.bf16.msrb.mxu3 %v4425_v57  ;;  %v6548_v29 = vld [vmem:[#allocation7 + $0x35c] sm:$0xf0] }
  0x5f   :  { %v5316_v30 = vld [vmem:[#allocation7 + $0x540] sm:$0xf]  ;;  %v5061_v35 = vor.u32 %v6548_v29, %v5060_v27 }
  0x60   :  { %977 = vmatpush.bf16.msrb.mxu0 %v4381_v0  ;;  %991 = vmatpush.bf16.msrb.mxu1 %v4385_v5  ;;  %v6612_v31 = vld [vmem:[#allocation7 + $0x55c] sm:$0xf0] }
  0x61   :  { %1005 = vmatpush.bf16.msrb.mxu2 %v4389_v6  ;;  %v5572_v32 = vld [vmem:[#allocation7 + $0x740] sm:$0xf]  ;;  %v5317_v36 = vor.u32 %v6612_v31, %v5316_v30 }
  0x62   :  { %1019 = vmatpush.bf16.msrb.mxu3 %v4393_v9  ;;  %v6676_v33 = vld [vmem:[#allocation7 + $0x75c] sm:$0xf0] }
  0x63   :  { %978 = vmatmul.bf16.vlgmr.msrb.gmra.mxu0 %v7250_v1  ;;  %992 = vmatmul.bf16.vlgmr.msrb.gmra.mxu1 %v7250_v1  ;;  %v4772_v37 = vld [vmem:[#allocation7 + $0x100] sm:$0xf]  ;;  %v5573_v40 = vor.u32 %v6676_v33, %v5572_v32 }
  0x64   :  { %2976 = vmatpush.bf16.msra.mxu0 %v4869_v10  ;;  %2990 = vmatpush.bf16.msra.mxu1 %v5125_v11  ;;  %v6476_v38 = vld [vmem:[#allocation7 + $0x11c] sm:$0xf0] }
  0x65   :  { %3004 = vmatpush.bf16.msra.mxu2 %v5381_v12  ;;  %1020 = vmatmul.bf16.vlgmr.msrb.gmra.mxu3 %v7250_v1  ;;  %v5028_v39 = vld [vmem:[#allocation7 + $0x300] sm:$0xf]  ;;  %v4773_v46 = vor.u32 %v6476_v38, %v4772_v37  ;;  %v5126_v38 = vld [vmem:[#allocation7 + $0x3e0] sm:$0xf0] }
  0x66   :  { %3018 = vmatpush.bf16.msra.mxu3 %v5637_v16  ;;  %1006 = vmatmul.bf16.vlgmr.msrb.gmra.mxu2 %v7250_v1  ;;  %v6540_v41 = vld [vmem:[#allocation7 + $0x31c] sm:$0xf0] }
  0x67   :  { %v5284_v42 = vld [vmem:[#allocation7 + $0x500] sm:$0xf]  ;;  %v5029_v47 = vor.u32 %v6540_v41, %v5028_v39  ;;  %v4620_v39 = vld [vmem:[#allocation2] sm:$0xf] }
  0x68   :  { %2977 = vmatpush.bf16.msra.mxu0 %v4837_v22  ;;  %2991 = vmatpush.bf16.msra.mxu1 %v5093_v23  ;;  %v6604_v43 = vld [vmem:[#allocation7 + $0x51c] sm:$0xf0] }
  0x69   :  { %3005 = vmatpush.bf16.msra.mxu2 %v5349_v24  ;;  %v5540_v44 = vld [vmem:[#allocation7 + $0x700] sm:$0xf]  ;;  %v5285_v1 = vor.u32 %v6604_v43, %v5284_v42  ;;  %v4628_v43 = vld [vmem:[#allocation2 + $0x8] sm:$0xf] }
  0x6a   :  { %3019 = vmatpush.bf16.msra.mxu3 %v5605_v28  ;;  %v6668_v45 = vld [vmem:[#allocation7 + $0x71c] sm:$0xf0] }
  0x6b   :  { %v4740_v48 = vld [vmem:[#allocation7 + $0xc0] sm:$0xf]  ;;  %v5541_v51 = vor.u32 %v6668_v45, %v5540_v44  ;;  %v6438_v44 = vld [vmem:[#allocation2 + $0x1c] sm:$0xf0]  ;;  %v6434_v45 = vld [vmem:[#allocation2 + $0x4] sm:$0xf] }
  0x6c   :  { %2978 = vmatpush.bf16.msra.mxu0 %v4805_v34  ;;  %2992 = vmatpush.bf16.msra.mxu1 %v5061_v35  ;;  %v6468_v49 = vld [vmem:[#allocation7 + $0xdc] sm:$0xf0]  ;;  %v6496_v34 = vld [vmem:[#allocation7 + $0x1c4] sm:$0xf] }
  0x6d   :  { %3006 = vmatpush.bf16.msra.mxu2 %v5317_v36  ;;  %v4996_v50 = vld [vmem:[#allocation7 + $0x2c0] sm:$0xf]  ;;  %v4741_v57 = vor.u32 %v6468_v49, %v4740_v48  ;;  %v4870_v35 = vld [vmem:[#allocation7 + $0x1e0] sm:$0xf0]  ;;  %v6435_v48 = vld [vmem:[#allocation2 + $0xc] sm:$0xf] }
  0x6e   :  { %3020 = vmatpush.bf16.msra.mxu3 %v5573_v40  ;;  %v6532_v52 = vld [vmem:[#allocation7 + $0x2dc] sm:$0xf0]  ;;  %v6560_v36 = vld [vmem:[#allocation7 + $0x3c4] sm:$0xf]  ;;  %v4630_v49 = vld [vmem:[#allocation2 + $0x20] sm:$0xf0] }
  0x6f   :  { %v5252_v53 = vld [vmem:[#allocation7 + $0x4c0] sm:$0xf]  ;;  %v4997_v58 = vor.u32 %v6532_v52, %v4996_v50 }
  0x70   :  { %v6596_v54 = vld [vmem:[#allocation7 + $0x4dc] sm:$0xf0]  ;;  %2979 = vmatpush.bf16.msra.mxu0 %v4773_v46  ;;  %2993 = vmatpush.bf16.msra.mxu1 %v5029_v47 }
  0x71   :  { %v5508_v55 = vld [vmem:[#allocation7 + $0x6c0] sm:$0xf]  ;;  %3007 = vmatpush.bf16.msra.mxu2 %v5285_v1  ;;  %v5253_v59 = vor.u32 %v6596_v54, %v5252_v53  ;;  %v4622_v1 = vld [vmem:[#allocation2 + $0x18] sm:$0xf0] }
  0x72   :  { %v6660_v56 = vld [vmem:[#allocation7 + $0x6dc] sm:$0xf0]  ;;  %3021 = vmatpush.bf16.msra.mxu3 %v5541_v51  ;;  %v4873_v51 = vor.u32 %v6496_v34, %v4870_v35  ;;  %v6464_v34 = vld [vmem:[#allocation7 + $0xc4] sm:$0xf] }
  0x73   :  { %v4708_v60 = vld [vmem:[#allocation7 + $0x80] sm:$0xf]  ;;  %v5509_v63 = vor.u32 %v6660_v56, %v5508_v55  ;;  %v5129_v55 = vor.u32 %v6560_v36, %v5126_v38  ;;  %v4742_v35 = vld [vmem:[#allocation7 + $0xe0] sm:$0xf0] }
  0x74   :  { %v6460_v61 = vld [vmem:[#allocation7 + $0x9c] sm:$0xf0]  ;;  %2980 = vmatpush.bf16.msra.mxu0 %v4741_v57  ;;  %2994 = vmatpush.bf16.msra.mxu1 %v4997_v58  ;;  %v6488_v58 = vld [vmem:[#allocation7 + $0x184] sm:$0xf] }
  0x75   :  { %v4964_v62 = vld [vmem:[#allocation7 + $0x280] sm:$0xf]  ;;  %v4709_v6 = vor.u32 %v6460_v61, %v4708_v60  ;;  %3008 = vmatpush.bf16.msra.mxu2 %v5253_v59  ;;  %v4838_v59 = vld [vmem:[#allocation7 + $0x1a0] sm:$0xf0]  ;;  %v7262_v60 = vor.u32 %v6438_v44, %v4628_v43  ;;  %v7264_v61 = vor.u32 %v6434_v45, %v4622_v1 }
  0x76   :  { %v6524_v0 = vld [vmem:[#allocation7 + $0x29c] sm:$0xf0]  ;;  %3022 = vmatpush.bf16.msra.mxu3 %v5509_v63  ;;  %v5094_v63 = vld [vmem:[#allocation7 + $0x3a0] sm:$0xf0] }
  0x77   :  { %v5220_v2 = vld [vmem:[#allocation7 + $0x480] sm:$0xf]  ;;  %v4965_v8 = vor.u32 %v6524_v0, %v4964_v62  ;;  %v6552_v62 = vld [vmem:[#allocation7 + $0x384] sm:$0xf]  ;;  %v7266_v0 = vor.u32 %v6435_v48, %v4630_v49 }
  0x78   :  { %v6588_v3 = vld [vmem:[#allocation7 + $0x49c] sm:$0xf0]  ;;  %2981 = vmatpush.bf16.msra.mxu0 %v4709_v6  ;;  %v6528_v36 = vld [vmem:[#allocation7 + $0x2c4] sm:$0xf] }
  0x79   :  { %v5476_v4 = vld [vmem:[#allocation7 + $0x680] sm:$0xf]  ;;  %v5221_v9 = vor.u32 %v6588_v3, %v5220_v2  ;;  %2995 = vmatpush.bf16.msra.mxu1 %v4965_v8  ;;  %v5097_v8 = vor.u32 %v6552_v62, %v5094_v63  ;;  %v6520_v1 = vld [vmem:[#allocation7 + $0x284] sm:$0xf] }
  0x7a   :  { %v6652_v5 = vld [vmem:[#allocation7 + $0x69c] sm:$0xf0]  ;;  %v4966_v48 = vld [vmem:[#allocation7 + $0x2a0] sm:$0xf0] }
  0x7b   :  { %v4676_v7 = vld [vmem:[#allocation7 + $0x40] sm:$0xf]  ;;  %v5477_v13 = vor.u32 %v6652_v5, %v5476_v4  ;;  %3009 = vmatpush.bf16.msra.mxu2 %v5221_v9  ;;  %v4841_v4 = vor.u32 %v6488_v58, %v4838_v59  ;;  %v6448_v58 = vld [vmem:[#allocation7 + $0x44] sm:$0xf] }
  0x7c   :  { %v6452_v10 = vld [vmem:[#allocation7 + $0x5c] sm:$0xf0]  ;;  %v4678_v59 = vld [vmem:[#allocation7 + $0x60] sm:$0xf0] }
  0x7d   :  { %v4932_v11 = vld [vmem:[#allocation7 + $0x240] sm:$0xf]  ;;  %v4677_v20 = vor.u32 %v6452_v10, %v4676_v7  ;;  %3023 = vmatpush.bf16.msra.mxu3 %v5477_v13  ;;  %v6480_v10 = vld [vmem:[#allocation7 + $0x144] sm:$0xf] }
  0x7e   :  { %v6516_v12 = vld [vmem:[#allocation7 + $0x25c] sm:$0xf0]  ;;  %v5062_v13 = vld [vmem:[#allocation7 + $0x360] sm:$0xf0] }
  0x7f   :  { %v5188_v14 = vld [vmem:[#allocation7 + $0x440] sm:$0xf]  ;;  %v4933_v25 = vor.u32 %v6516_v12, %v4932_v11  ;;  %2982 = vmatpush.bf16.msra.mxu0 %v4677_v20  ;;  %v4806_v11 = vld [vmem:[#allocation7 + $0x160] sm:$0xf0] }
  0x80   :  { %v6580_v15 = vld [vmem:[#allocation7 + $0x45c] sm:$0xf0]  ;;  %v6544_v12 = vld [vmem:[#allocation7 + $0x344] sm:$0xf] }
  0x81   :  { %v5444_v16 = vld [vmem:[#allocation7 + $0x640] sm:$0xf]  ;;  %v5189_v26 = vor.u32 %v6580_v15, %v5188_v14  ;;  %2996 = vmatpush.bf16.msra.mxu1 %v4933_v25  ;;  %v5065_v20 = vor.u32 %v6544_v12, %v5062_v13  ;;  %v5030_v25 = vld [vmem:[#allocation7 + $0x320] sm:$0xf0] }
  0x82   :  { %v6644_v17 = vld [vmem:[#allocation7 + $0x65c] sm:$0xf0]  ;;  %v6512_v62 = vld [vmem:[#allocation7 + $0x244] sm:$0xf] }
  0x83   :  { %v4644_v18 = vld [vmem:[#allocation7] sm:$0xf]  ;;  %v5445_v30 = vor.u32 %v6644_v17, %v5444_v16  ;;  %3010 = vmatpush.bf16.msra.mxu2 %v5189_v26  ;;  %v4809_v16 = vor.u32 %v6480_v10, %v4806_v11  ;;  %v4934_v63 = vld [vmem:[#allocation7 + $0x260] sm:$0xf0] }
  0x84   :  { %v6444_v19 = vld [vmem:[#allocation7 + $0x1c] sm:$0xf0]  ;;  %v4646_v10 = vld [vmem:[#allocation7 + $0x20] sm:$0xf0]  ;;  %v4937_v11 = vor.u32 %v6512_v62, %v4934_v63 }
  0x85   :  { %v4900_v21 = vld [vmem:[#allocation7 + $0x200] sm:$0xf]  ;;  %v4645_v37 = vor.u32 %v6444_v19, %v4644_v18  ;;  %3024 = vmatpush.bf16.msra.mxu3 %v5445_v30  ;;  %v6504_v12 = vld [vmem:[#allocation7 + $0x204] sm:$0xf] }
  0x86   :  { %v6508_v22 = vld [vmem:[#allocation7 + $0x21c] sm:$0xf0]  ;;  %v4902_v13 = vld [vmem:[#allocation7 + $0x220] sm:$0xf0] }
  0x87   :  { %v5156_v23 = vld [vmem:[#allocation7 + $0x400] sm:$0xf]  ;;  %v4901_v41 = vor.u32 %v6508_v22, %v4900_v21  ;;  %2983 = vmatpush.bf16.msra.mxu0 %v4645_v37  ;;  %v6472_v22 = vld [vmem:[#allocation7 + $0x104] sm:$0xf] }
  0x88   :  { %v6572_v24 = vld [vmem:[#allocation7 + $0x41c] sm:$0xf0]  ;;  %v4998_v37 = vld [vmem:[#allocation7 + $0x2e0] sm:$0xf0] }
  0x89   :  { %v5412_v27 = vld [vmem:[#allocation7 + $0x600] sm:$0xf]  ;;  %v5157_v42 = vor.u32 %v6572_v24, %v5156_v23  ;;  %2997 = vmatpush.bf16.msra.mxu1 %v4901_v41  ;;  %v4774_v23 = vld [vmem:[#allocation7 + $0x120] sm:$0xf0]  ;;  %v5001_v44 = vor.u32 %v6528_v36, %v4998_v37 }
  0x8a   :  { %v6636_v28 = vld [vmem:[#allocation7 + $0x61c] sm:$0xf0]  ;;  %v6536_v24 = vld [vmem:[#allocation7 + $0x304] sm:$0xf] }
  0x8b   :  { %v5892_v29 = vld [vmem:[#allocation7 + $0x9c0] sm:$0xf]  ;;  %v5413_v46 = vor.u32 %v6636_v28, %v5412_v27  ;;  %3011 = vmatpush.bf16.msra.mxu2 %v5157_v42  ;;  %v4777_v28 = vor.u32 %v6472_v22, %v4774_v23  ;;  %v5286_v62 = vld [vmem:[#allocation7 + $0x520] sm:$0xf0] }
  0x8c   :  { %v6756_v31 = vld [vmem:[#allocation7 + $0x9dc] sm:$0xf0]  ;;  %2998 = vmatmul.bf16.vlgmr.msra.gmra.mxu1 %v7264_v61  ;;  %v6664_v63 = vld [vmem:[#allocation7 + $0x704] sm:$0xf] }
  0x8d   :  { %v6148_v32 = vld [vmem:[#allocation7 + $0xbc0] sm:$0xf]  ;;  %v5893_v47 = vor.u32 %v6756_v31, %v5892_v29  ;;  %3025 = vmatpush.bf16.msra.mxu3 %v5413_v46  ;;  %v6456_v46 = vld [vmem:[#allocation7 + $0x84] sm:$0xf] }
  0x8e   :  { %v6820_v33 = vld [vmem:[#allocation7 + $0xbdc] sm:$0xf0]  ;;  %3012 = vmatmul.bf16.vlgmr.msra.gmra.mxu2 %v7262_v60 }
  0x8f   :  { %v6437_v40 = vld [vmem:[#allocation2 + $0x14] sm:$0xf0]  ;;  %v6149_v50 = vor.u32 %v6820_v33, %v6148_v32  ;;  %3032 = vmatpush.bf16.msrb.mxu0 %v5893_v47  ;;  %3060 = vmatpush.bf16.msrb.mxu2 %v4873_v51  ;;  %v5033_v32 = vor.u32 %v6536_v24, %v5030_v25  ;;  %v4710_v47 = vld [vmem:[#allocation7 + $0xa0] sm:$0xf0]  ;;  %v4636_v25 = vld [vmem:[#allocation2 + $0x10] sm:$0xf] }
  0x90   :  { %v5860_v52 = vld [vmem:[#allocation7 + $0x980] sm:$0xf]  ;;  %v7260_v56 = vor.u32 %v6437_v40, %v4620_v39  ;;  %3026 = vmatmul.bf16.vlgmr.msra.gmra.mxu3 %v7266_v0  ;;  %v4745_v40 = vor.u32 %v6464_v34, %v4742_v35  ;;  %v4713_v51 = vor.u32 %v6456_v46, %v4710_v47  ;;  %v6150_v24 = vld [vmem:[#allocation7 + $0xbe0] sm:$0xf0] }
  0x91   :  { %v6748_v53 = vld [vmem:[#allocation7 + $0x99c] sm:$0xf0]  ;;  %3046 = vmatpush.bf16.msrb.mxu1 %v6149_v50  ;;  %3074 = vmatpush.bf16.msrb.mxu3 %v5129_v55  ;;  %v4969_v55 = vor.u32 %v6520_v1, %v4966_v48  ;;  %v5350_v34 = vld [vmem:[#allocation7 + $0x5a0] sm:$0xf0] }
  0x92   :  { %v6116_v54 = vld [vmem:[#allocation7 + $0xb80] sm:$0xf]  ;;  %v5861_v2 = vor.u32 %v6748_v53, %v5860_v52  ;;  %2984 = vmatmul.bf16.vlgmr.msra.gmra.mxu0 %v7260_v56  ;;  %v6680_v35 = vld [vmem:[#allocation7 + $0x784] sm:$0xf] }
  0x93   :  { %v6812_v57 = vld [vmem:[#allocation7 + $0xb9c] sm:$0xf0]  ;;  %3061 = vmatpush.bf16.msrb.mxu2 %v4841_v4  ;;  %v6608_v47 = vld [vmem:[#allocation7 + $0x544] sm:$0xf] }
  0x94   :  { %v6117_v3 = vor.u32 %v6812_v57, %v6116_v54  ;;  %v5828_v5 = vld [vmem:[#allocation7 + $0x940] sm:$0xf]  ;;  %3033 = vmatpush.bf16.msrb.mxu0 %v5861_v2  ;;  %v5318_v1 = vld [vmem:[#allocation7 + $0x560] sm:$0xf0] }
  0x95   :  { %v6740_v6 = vld [vmem:[#allocation7 + $0x95c] sm:$0xf0]  ;;  %3075 = vmatpush.bf16.msrb.mxu3 %v5097_v8  ;;  %v6672_v48 = vld [vmem:[#allocation7 + $0x744] sm:$0xf] }
  0x96   :  { %v6084_v7 = vld [vmem:[#allocation7 + $0xb40] sm:$0xf]  ;;  %v5829_v14 = vor.u32 %v6740_v6, %v5828_v5  ;;  %3047 = vmatpush.bf16.msrb.mxu1 %v6117_v3 }
  0x97   :  { %v6804_v9 = vld [vmem:[#allocation7 + $0xb5c] sm:$0xf0]  ;;  %3062 = vmatpush.bf16.msrb.mxu2 %v4809_v16  ;;  %v6688_v16 = vld [vmem:[#allocation7 + $0x7c4] sm:$0xf] }
  0x98   :  { %v6085_v15 = vor.u32 %v6804_v9, %v6084_v7  ;;  %v5796_v17 = vld [vmem:[#allocation7 + $0x900] sm:$0xf]  ;;  %3034 = vmatpush.bf16.msrb.mxu0 %v5829_v14  ;;  %v4681_v7 = vor.u32 %v6448_v58, %v4678_v59  ;;  %v6440_v9 = vld [vmem:[#allocation7 + $0x4] sm:$0xf] }
  0x99   :  { %v6732_v18 = vld [vmem:[#allocation7 + $0x91c] sm:$0xf0]  ;;  %3076 = vmatpush.bf16.msrb.mxu3 %v5065_v20  ;;  %v6624_v14 = vld [vmem:[#allocation7 + $0x5c4] sm:$0xf]  ;;  %v4649_v23 = vor.u32 %v6440_v9, %v4646_v10 }
  0x9a   :  { %v6052_v19 = vld [vmem:[#allocation7 + $0xb00] sm:$0xf]  ;;  %v5797_v26 = vor.u32 %v6732_v18, %v5796_v17  ;;  %3048 = vmatpush.bf16.msrb.mxu1 %v6085_v15  ;;  %v5382_v15 = vld [vmem:[#allocation7 + $0x5e0] sm:$0xf0] }
  0x9b   :  { %v6796_v21 = vld [vmem:[#allocation7 + $0xb1c] sm:$0xf0]  ;;  %3063 = vmatpush.bf16.msrb.mxu2 %v4777_v28  ;;  %v5638_v17 = vld [vmem:[#allocation7 + $0x7e0] sm:$0xf0]  ;;  %v5385_v28 = vor.u32 %v6624_v14, %v5382_v15 }
  0x9c   :  { %v6053_v27 = vor.u32 %v6796_v21, %v6052_v19  ;;  %v5764_v29 = vld [vmem:[#allocation7 + $0x8c0] sm:$0xf]  ;;  %3035 = vmatpush.bf16.msrb.mxu0 %v5797_v26  ;;  %v6752_v19 = vld [vmem:[#allocation7 + $0x9c4] sm:$0xf]  ;;  %v6439_v26 = vld [vmem:[#allocation2 + $0x24] sm:$0xf0] }
  0x9d   :  { %v6724_v30 = vld [vmem:[#allocation7 + $0x8dc] sm:$0xf0]  ;;  %3077 = vmatpush.bf16.msrb.mxu3 %v5033_v32  ;;  %v5894_v20 = vld [vmem:[#allocation7 + $0x9e0] sm:$0xf0]  ;;  %v7272_v37 = vor.u32 %v6439_v26, %v4636_v25 }
  0x9e   :  { %v6020_v31 = vld [vmem:[#allocation7 + $0xac0] sm:$0xf]  ;;  %v5765_v38 = vor.u32 %v6724_v30, %v5764_v29  ;;  %3049 = vmatpush.bf16.msrb.mxu1 %v6053_v27  ;;  %v6816_v21 = vld [vmem:[#allocation7 + $0xbc4] sm:$0xf]  ;;  %v4905_v27 = vor.u32 %v6504_v12, %v4902_v13  ;;  %v6436_v29 = vld [vmem:[#allocation2 + $0x14] sm:$0xf]  ;;  %v5897_v32 = vor.u32 %v6752_v19, %v5894_v20 }
  0x9f   :  { %v6788_v33 = vld [vmem:[#allocation7 + $0xadc] sm:$0xf0]  ;;  %3064 = vmatpush.bf16.msrb.mxu2 %v4745_v40  ;;  %v4638_v30 = vld [vmem:[#allocation2 + $0x28] sm:$0xf0]  ;;  %v6153_v36 = vor.u32 %v6816_v21, %v6150_v24  ;;  %v5862_v40 = vld [vmem:[#allocation7 + $0x9a0] sm:$0xf0] }
  0xa0   :  { %v6021_v39 = vor.u32 %v6788_v33, %v6020_v31  ;;  %v5732_v41 = vld [vmem:[#allocation7 + $0x880] sm:$0xf]  ;;  %3036 = vmatpush.bf16.msrb.mxu0 %v5765_v38  ;;  %v5641_v31 = vor.u32 %v6688_v16, %v5638_v17  ;;  %v6616_v33 = vld [vmem:[#allocation7 + $0x584] sm:$0xf] }
  0xa1   :  { %v6716_v42 = vld [vmem:[#allocation7 + $0x89c] sm:$0xf0]  ;;  %3078 = vmatpush.bf16.msrb.mxu3 %v5001_v44  ;;  %v5606_v38 = vld [vmem:[#allocation7 + $0x7a0] sm:$0xf0]  ;;  %v5353_v44 = vor.u32 %v6616_v33, %v5350_v34 }
  0xa2   :  { %v5988_v43 = vld [vmem:[#allocation7 + $0xa80] sm:$0xf]  ;;  %v5733_v49 = vor.u32 %v6716_v42, %v5732_v41  ;;  %3050 = vmatpush.bf16.msrb.mxu1 %v6021_v39  ;;  %v6744_v39 = vld [vmem:[#allocation7 + $0x984] sm:$0xf]  ;;  %v7274_v41 = vor.u32 %v6436_v29, %v4638_v30 }
  0xa3   :  { %v6780_v45 = vld [vmem:[#allocation7 + $0xa9c] sm:$0xf0]  ;;  %3065 = vmatpush.bf16.msrb.mxu2 %v4713_v51  ;;  %v6808_v42 = vld [vmem:[#allocation7 + $0xb84] sm:$0xf]  ;;  %v5865_v46 = vor.u32 %v6744_v39, %v5862_v40 }
  0xa4   :  { %v5989_v50 = vor.u32 %v6780_v45, %v5988_v43  ;;  %v5700_v52 = vld [vmem:[#allocation7 + $0x840] sm:$0xf]  ;;  %3037 = vmatpush.bf16.msrb.mxu0 %v5733_v49  ;;  %v6118_v43 = vld [vmem:[#allocation7 + $0xba0] sm:$0xf0]  ;;  %v5609_v45 = vor.u32 %v6680_v35, %v5606_v38 }
  0xa5   :  { %v6708_v53 = vld [vmem:[#allocation7 + $0x85c] sm:$0xf0]  ;;  %3079 = vmatpush.bf16.msrb.mxu3 %v4969_v55  ;;  %v6121_v49 = vor.u32 %v6808_v42, %v6118_v43  ;;  %v6736_v51 = vld [vmem:[#allocation7 + $0x944] sm:$0xf]  ;;  %v5321_v55 = vor.u32 %v6608_v47, %v5318_v1 }
  0xa6   :  { %v5956_v54 = vld [vmem:[#allocation7 + $0xa40] sm:$0xf]  ;;  %v5701_v2 = vor.u32 %v6708_v53, %v5700_v52  ;;  %3051 = vmatpush.bf16.msrb.mxu1 %v5989_v50  ;;  %v5574_v50 = vld [vmem:[#allocation7 + $0x760] sm:$0xf0] }
  0xa7   :  { %v6772_v57 = vld [vmem:[#allocation7 + $0xa5c] sm:$0xf0]  ;;  %3066 = vmatpush.bf16.msrb.mxu2 %v4681_v7  ;;  %v5830_v52 = vld [vmem:[#allocation7 + $0x960] sm:$0xf0] }
  0xa8   :  { %v5668_v3 = vld [vmem:[#allocation7 + $0x800] sm:$0xf]  ;;  %v5957_v6 = vor.u32 %v6772_v57, %v5956_v54  ;;  %3038 = vmatpush.bf16.msrb.mxu0 %v5701_v2  ;;  %v6800_v53 = vld [vmem:[#allocation7 + $0xb44] sm:$0xf]  ;;  %v5577_v57 = vor.u32 %v6672_v48, %v5574_v50  ;;  %v5833_v58 = vor.u32 %v6736_v51, %v5830_v52 }
  0xa9   :  { %v6700_v4 = vld [vmem:[#allocation7 + $0x81c] sm:$0xf0]  ;;  %3080 = vmatpush.bf16.msrb.mxu3 %v4937_v11  ;;  %v6086_v54 = vld [vmem:[#allocation7 + $0xb60] sm:$0xf0] }
  0xaa   :  { %v5924_v5 = vld [vmem:[#allocation7 + $0xa00] sm:$0xf]  ;;  %v5669_v18 = vor.u32 %v6700_v4, %v5668_v3  ;;  %3052 = vmatpush.bf16.msrb.mxu1 %v5957_v6  ;;  %v6600_v59 = vld [vmem:[#allocation7 + $0x504] sm:$0xf]  ;;  %v6089_v2 = vor.u32 %v6800_v53, %v6086_v54 }
  0xab   :  { %v6764_v8 = vld [vmem:[#allocation7 + $0xa1c] sm:$0xf0]  ;;  %3067 = vmatpush.bf16.msrb.mxu2 %v4649_v23  ;;  %v5542_v3 = vld [vmem:[#allocation7 + $0x720] sm:$0xf0] }
  0xac   :  { %v5925_v22 = vor.u32 %v6764_v8, %v5924_v5  ;;  %3039 = vmatpush.bf16.msrb.mxu0 %v5669_v18  ;;  %v6728_v4 = vld [vmem:[#allocation7 + $0x904] sm:$0xf]  ;;  %v5289_v8 = vor.u32 %v6600_v59, %v5286_v62  ;;  %v5545_v9 = vor.u32 %v6664_v63, %v5542_v3  ;;  %v6501_v59 = vld [vmem:[#allocation7 + $0x1e4] sm:$0xf0] }
  0xad   :  { %3081 = vmatpush.bf16.msrb.mxu3 %v4905_v27  ;;  %v5798_v5 = vld [vmem:[#allocation7 + $0x920] sm:$0xf0]  ;;  %v5132_v62 = vld [vmem:[#allocation7 + $0x3c8] sm:$0xf] }
  0xae   :  { %3053 = vmatpush.bf16.msrb.mxu1 %v5925_v22  ;;  %3068 = vmatmul.bf16.vlgmr.msrb.gmra.mxu2 %v7260_v56  ;;  %v6792_v6 = vld [vmem:[#allocation7 + $0xb04] sm:$0xf]  ;;  %v5801_v10 = vor.u32 %v6728_v4, %v5798_v5  ;;  %v5388_v3 = vld [vmem:[#allocation7 + $0x5c8] sm:$0xf] }
  0xaf   :  { %3116 = vmatpush.bf16.msra.mxu2 %v5897_v32  ;;  %3040 = vmatmul.bf16.vlgmr.msrb.gmra.mxu0 %v7272_v37  ;;  %v6054_v7 = vld [vmem:[#allocation7 + $0xb20] sm:$0xf0]  ;;  %v6629_v4 = vld [vmem:[#allocation7 + $0x5e4] sm:$0xf0] }
  0xb0   :  { %3088 = vmatpush.bf16.msra.mxu0 %v5385_v28  ;;  %3082 = vmatmul.bf16.vlgmr.msrb.gmra.mxu3 %v7264_v61  ;;  %v6592_v11 = vld [vmem:[#allocation7 + $0x4c4] sm:$0xf]  ;;  %v6057_v14 = vor.u32 %v6792_v6, %v6054_v7  ;;  %v5644_v7 = vld [vmem:[#allocation7 + $0x7c8] sm:$0xf] }
  0xb1   :  { %3130 = vmatpush.bf16.msra.mxu3 %v6153_v36  ;;  %3054 = vmatmul.bf16.vlgmr.msrb.gmra.mxu1 %v7274_v41  ;;  %v5254_v12 = vld [vmem:[#allocation7 + $0x4e0] sm:$0xf0] }
  0xb2   :  { %3102 = vmatpush.bf16.msra.mxu1 %v5641_v31  ;;  %v6656_v13 = vld [vmem:[#allocation7 + $0x6c4] sm:$0xf]  ;;  %v5257_v20 = vor.u32 %v6592_v11, %v5254_v12  ;;  %v5389_v12 = vor.u32 %v6629_v4, %v5388_v3  ;;  %v4716_v3 = vld [vmem:[#allocation7 + $0x88] sm:$0xf] }
  0xb3   :  { %3117 = vmatpush.bf16.msra.mxu2 %v5865_v46  ;;  %v5510_v15 = vld [vmem:[#allocation7 + $0x6e0] sm:$0xf0]  ;;  %v6461_v4 = vld [vmem:[#allocation7 + $0xa4] sm:$0xf0] }
  0xb4   :  { %3089 = vmatpush.bf16.msra.mxu0 %v5353_v44  ;;  %v6720_v16 = vld [vmem:[#allocation7 + $0x8c4] sm:$0xf]  ;;  %v5513_v21 = vor.u32 %v6656_v13, %v5510_v15  ;;  %v4844_v13 = vld [vmem:[#allocation7 + $0x188] sm:$0xf] }
  0xb5   :  { %3131 = vmatpush.bf16.msra.mxu3 %v6121_v49  ;;  %v5766_v17 = vld [vmem:[#allocation7 + $0x8e0] sm:$0xf0]  ;;  %v5100_v15 = vld [vmem:[#allocation7 + $0x388] sm:$0xf] }
  0xb6   :  { %3103 = vmatpush.bf16.msra.mxu1 %v5609_v45  ;;  %v6784_v18 = vld [vmem:[#allocation7 + $0xac4] sm:$0xf]  ;;  %v5769_v22 = vor.u32 %v6720_v16, %v5766_v17  ;;  %v6557_v17 = vld [vmem:[#allocation7 + $0x3a4] sm:$0xf0] }
  0xb7   :  { %3118 = vmatpush.bf16.msra.mxu2 %v5833_v58  ;;  %v6022_v19 = vld [vmem:[#allocation7 + $0xae0] sm:$0xf0]  ;;  %v4876_v58 = vld [vmem:[#allocation7 + $0x1c8] sm:$0xf] }
  0xb8   :  { %3090 = vmatpush.bf16.msra.mxu0 %v5321_v55  ;;  %v6584_v23 = vld [vmem:[#allocation7 + $0x484] sm:$0xf]  ;;  %v6025_v26 = vor.u32 %v6784_v18, %v6022_v19  ;;  %v5356_v18 = vld [vmem:[#allocation7 + $0x588] sm:$0xf] }
  0xb9   :  { %3132 = vmatpush.bf16.msra.mxu3 %v6089_v2  ;;  %v5222_v24 = vld [vmem:[#allocation7 + $0x4a0] sm:$0xf0]  ;;  %v6565_v2 = vld [vmem:[#allocation7 + $0x3e4] sm:$0xf0] }
  0xba   :  { %3104 = vmatpush.bf16.msra.mxu1 %v5577_v57  ;;  %v6648_v25 = vld [vmem:[#allocation7 + $0x684] sm:$0xf]  ;;  %v5225_v32 = vor.u32 %v6584_v23, %v5222_v24  ;;  %v5133_v11 = vor.u32 %v6565_v2, %v5132_v62  ;;  %v6621_v19 = vld [vmem:[#allocation7 + $0x5a4] sm:$0xf0]  ;;  %v5101_v23 = vor.u32 %v6557_v17, %v5100_v15 }
  0xbb   :  { %3119 = vmatpush.bf16.msra.mxu2 %v5801_v10  ;;  %v5478_v27 = vld [vmem:[#allocation7 + $0x6a0] sm:$0xf0]  ;;  %v4877_v10 = vor.u32 %v6501_v59, %v4876_v58  ;;  %v5357_v24 = vor.u32 %v6621_v19, %v5356_v18  ;;  %v5516_v58 = vld [vmem:[#allocation7 + $0x6c8] sm:$0xf] }
  0xbc   :  { %3091 = vmatpush.bf16.msra.mxu0 %v5289_v8  ;;  %v6712_v28 = vld [vmem:[#allocation7 + $0x884] sm:$0xf]  ;;  %v5481_v33 = vor.u32 %v6648_v25, %v5478_v27  ;;  %v6693_v8 = vld [vmem:[#allocation7 + $0x7e4] sm:$0xf0] }
  0xbd   :  { %3133 = vmatpush.bf16.msra.mxu3 %v6057_v14  ;;  %v5734_v29 = vld [vmem:[#allocation7 + $0x8a0] sm:$0xf0]  ;;  %v6493_v14 = vld [vmem:[#allocation7 + $0x1a4] sm:$0xf0]  ;;  %v5645_v16 = vor.u32 %v6693_v8, %v5644_v7 }
  0xbe   :  { %3105 = vmatpush.bf16.msra.mxu1 %v5545_v9  ;;  %v6776_v30 = vld [vmem:[#allocation7 + $0xa84] sm:$0xf]  ;;  %v5737_v34 = vor.u32 %v6712_v28, %v5734_v29  ;;  %v4812_v25 = vld [vmem:[#allocation7 + $0x148] sm:$0xf] }
  0xbf   :  { %v5990_v31 = vld [vmem:[#allocation7 + $0xaa0] sm:$0xf0]  ;;  %3120 = vmatpush.bf16.msra.mxu2 %v5769_v22  ;;  %v4845_v22 = vor.u32 %v6493_v14, %v4844_v13  ;;  %v5068_v27 = vld [vmem:[#allocation7 + $0x348] sm:$0xf] }
  0xc0   :  { %3092 = vmatpush.bf16.msra.mxu0 %v5257_v20  ;;  %v6576_v35 = vld [vmem:[#allocation7 + $0x444] sm:$0xf]  ;;  %v5993_v39 = vor.u32 %v6776_v30, %v5990_v31  ;;  %v5612_v20 = vld [vmem:[#allocation7 + $0x788] sm:$0xf] }
  0xc1   :  { %v5190_v36 = vld [vmem:[#allocation7 + $0x460] sm:$0xf0]  ;;  %3134 = vmatpush.bf16.msra.mxu3 %v6025_v26  ;;  %v6485_v26 = vld [vmem:[#allocation7 + $0x164] sm:$0xf0] }
  0xc2   :  { %3106 = vmatpush.bf16.msra.mxu1 %v5513_v21  ;;  %v6640_v38 = vld [vmem:[#allocation7 + $0x644] sm:$0xf]  ;;  %v5193_v46 = vor.u32 %v6576_v35, %v5190_v36  ;;  %v6685_v21 = vld [vmem:[#allocation7 + $0x7a4] sm:$0xf0] }
  0xc3   :  { %v5446_v40 = vld [vmem:[#allocation7 + $0x660] sm:$0xf0]  ;;  %3121 = vmatpush.bf16.msra.mxu2 %v5737_v34  ;;  %v5613_v28 = vor.u32 %v6685_v21, %v5612_v20  ;;  %v6549_v29 = vld [vmem:[#allocation7 + $0x364] sm:$0xf0]  ;;  %v4813_v34 = vor.u32 %v6485_v26, %v4812_v25 }
  0xc4   :  { %v6704_v42 = vld [vmem:[#allocation7 + $0x844] sm:$0xf]  ;;  %3093 = vmatpush.bf16.msra.mxu0 %v5225_v32  ;;  %v5449_v48 = vor.u32 %v6640_v38, %v5446_v40  ;;  %v5324_v30 = vld [vmem:[#allocation7 + $0x548] sm:$0xf]  ;;  %v5069_v35 = vor.u32 %v6549_v29, %v5068_v27 }
  0xc5   :  { %v5702_v43 = vld [vmem:[#allocation7 + $0x860] sm:$0xf0]  ;;  %3135 = vmatpush.bf16.msra.mxu3 %v5993_v39  ;;  %v6613_v31 = vld [vmem:[#allocation7 + $0x564] sm:$0xf0] }
  0xc6   :  { %v6768_v44 = vld [vmem:[#allocation7 + $0xa44] sm:$0xf]  ;;  %3107 = vmatpush.bf16.msra.mxu1 %v5481_v33  ;;  %v5705_v49 = vor.u32 %v6704_v42, %v5702_v43  ;;  %v5580_v32 = vld [vmem:[#allocation7 + $0x748] sm:$0xf]  ;;  %v5325_v36 = vor.u32 %v6613_v31, %v5324_v30 }
  0xc7   :  { %v5958_v45 = vld [vmem:[#allocation7 + $0xa60] sm:$0xf0]  ;;  %v6677_v33 = vld [vmem:[#allocation7 + $0x764] sm:$0xf0] }
  0xc8   :  { %v6568_v47 = vld [vmem:[#allocation7 + $0x404] sm:$0xf]  ;;  %v5961_v53 = vor.u32 %v6768_v44, %v5958_v45  ;;  %3094 = vmatpush.bf16.msra.mxu0 %v5193_v46  ;;  %3122 = vmatpush.bf16.msra.mxu2 %v5705_v49  ;;  %v4780_v38 = vld [vmem:[#allocation7 + $0x108] sm:$0xf]  ;;  %v5581_v42 = vor.u32 %v6677_v33, %v5580_v32 }
  0xc9   :  { %v5158_v1 = vld [vmem:[#allocation7 + $0x420] sm:$0xf0]  ;;  %v6477_v39 = vld [vmem:[#allocation7 + $0x124] sm:$0xf0] }
  0xca   :  { %v6632_v50 = vld [vmem:[#allocation7 + $0x604] sm:$0xf]  ;;  %v5161_v63 = vor.u32 %v6568_v47, %v5158_v1  ;;  %3108 = vmatpush.bf16.msra.mxu1 %v5449_v48  ;;  %3136 = vmatpush.bf16.msra.mxu3 %v5961_v53  ;;  %v5036_v40 = vld [vmem:[#allocation7 + $0x308] sm:$0xf]  ;;  %v4781_v1 = vor.u32 %v6477_v39, %v4780_v38 }
  0xcb   :  { %v5414_v51 = vld [vmem:[#allocation7 + $0x620] sm:$0xf0]  ;;  %v6541_v43 = vld [vmem:[#allocation7 + $0x324] sm:$0xf0] }
  0xcc   :  { %v6696_v52 = vld [vmem:[#allocation7 + $0x804] sm:$0xf]  ;;  %v5417_v5 = vor.u32 %v6632_v50, %v5414_v51  ;;  %3095 = vmatpush.bf16.msra.mxu0 %v5161_v63  ;;  %v5292_v44 = vld [vmem:[#allocation7 + $0x508] sm:$0xf]  ;;  %v5037_v48 = vor.u32 %v6541_v43, %v5036_v40  ;;  %v6497_v43 = vld [vmem:[#allocation7 + $0x1cc] sm:$0xf] }
  0xcd   :  { %v5670_v54 = vld [vmem:[#allocation7 + $0x820] sm:$0xf0]  ;;  %v6605_v45 = vld [vmem:[#allocation7 + $0x524] sm:$0xf0] }
  0xce   :  { %v6760_v55 = vld [vmem:[#allocation7 + $0xa04] sm:$0xf]  ;;  %v5673_v6 = vor.u32 %v6696_v52, %v5670_v54  ;;  %3109 = vmatpush.bf16.msra.mxu1 %v5417_v5  ;;  %v5548_v46 = vld [vmem:[#allocation7 + $0x708] sm:$0xf]  ;;  %v5293_v49 = vor.u32 %v6605_v45, %v5292_v44  ;;  %v4878_v44 = vld [vmem:[#allocation7 + $0x1e8] sm:$0xf0] }
  0xcf   :  { %v5926_v57 = vld [vmem:[#allocation7 + $0xa20] sm:$0xf0]  ;;  %3096 = vmatmul.bf16.vlgmr.msra.gmra.mxu0 %v7262_v60  ;;  %v6669_v47 = vld [vmem:[#allocation7 + $0x724] sm:$0xf0] }
  0xd0   :  { %v5929_v9 = vor.u32 %v6760_v55, %v5926_v57  ;;  %3123 = vmatpush.bf16.msra.mxu2 %v5673_v6  ;;  %3144 = vmatpush.bf16.msrb.mxu0 %v4877_v10  ;;  %v4748_v50 = vld [vmem:[#allocation7 + $0xc8] sm:$0xf]  ;;  %v5549_v53 = vor.u32 %v6669_v47, %v5548_v46  ;;  %v6561_v47 = vld [vmem:[#allocation7 + $0x3cc] sm:$0xf] }
  0xd1   :  { %3110 = vmatmul.bf16.vlgmr.msra.gmra.mxu1 %v7266_v0  ;;  %v6469_v51 = vld [vmem:[#allocation7 + $0xe4] sm:$0xf0] }
  0xd2   :  { %3137 = vmatpush.bf16.msra.mxu3 %v5929_v9  ;;  %3158 = vmatpush.bf16.msrb.mxu1 %v5133_v11  ;;  %v5004_v52 = vld [vmem:[#allocation7 + $0x2c8] sm:$0xf]  ;;  %v4749_v62 = vor.u32 %v6469_v51, %v4748_v50  ;;  %v4881_v51 = vor.u32 %v6497_v43, %v4878_v44  ;;  %v4750_v43 = vld [vmem:[#allocation7 + $0xe8] sm:$0xf0] }
  0xd3   :  { %3124 = vmatmul.bf16.vlgmr.msra.gmra.mxu2 %v7272_v37  ;;  %v6533_v54 = vld [vmem:[#allocation7 + $0x2e4] sm:$0xf0]  ;;  %v6529_v44 = vld [vmem:[#allocation7 + $0x2cc] sm:$0xf] }
  0xd4   :  { %3172 = vmatpush.bf16.msrb.mxu2 %v5389_v12  ;;  %3145 = vmatpush.bf16.msrb.mxu0 %v4845_v22  ;;  %v5260_v55 = vld [vmem:[#allocation7 + $0x4c8] sm:$0xf]  ;;  %v5005_v63 = vor.u32 %v6533_v54, %v5004_v52  ;;  %v4717_v12 = vor.u32 %v6461_v4, %v4716_v3  ;;  %v7286_v4 = vpop.f32.mrf.mxu1 }
  0xd5   :  { %3138 = vmatmul.bf16.vlgmr.msra.gmra.mxu3 %v7274_v41  ;;  %v6597_v57 = vld [vmem:[#allocation7 + $0x4e4] sm:$0xf0] }
  0xd6   :  { %3186 = vmatpush.bf16.msrb.mxu3 %v5645_v16  ;;  %3159 = vmatpush.bf16.msrb.mxu1 %v5101_v23  ;;  %v6661_v59 = vld [vmem:[#allocation7 + $0x6e4] sm:$0xf0]  ;;  %v5261_v2 = vor.u32 %v6597_v57, %v5260_v55 }
  0xd7   :  { %v4972_v5 = vld [vmem:[#allocation7 + $0x288] sm:$0xf]  ;;  %v5517_v6 = vor.u32 %v6661_v59, %v5516_v58  ;;  %v6489_v58 = vld [vmem:[#allocation7 + $0x18c] sm:$0xf] }
  0xd8   :  { %3173 = vmatpush.bf16.msrb.mxu2 %v5357_v24  ;;  %3146 = vmatpush.bf16.msrb.mxu0 %v4813_v34  ;;  %v6525_v7 = vld [vmem:[#allocation7 + $0x2a4] sm:$0xf0]  ;;  %v4846_v59 = vld [vmem:[#allocation7 + $0x1a8] sm:$0xf0] }
  0xd9   :  { %v5228_v8 = vld [vmem:[#allocation7 + $0x488] sm:$0xf]  ;;  %v4973_v13 = vor.u32 %v6525_v7, %v4972_v5 }
  0xda   :  { %3187 = vmatpush.bf16.msrb.mxu3 %v5613_v28  ;;  %3160 = vmatpush.bf16.msrb.mxu1 %v5069_v35  ;;  %v6589_v9 = vld [vmem:[#allocation7 + $0x4a4] sm:$0xf0] }
  0xdb   :  { %v5484_v10 = vld [vmem:[#allocation7 + $0x688] sm:$0xf]  ;;  %v5229_v14 = vor.u32 %v6589_v9, %v5228_v8 }
  0xdc   :  { %3174 = vmatpush.bf16.msrb.mxu2 %v5325_v36  ;;  %3147 = vmatpush.bf16.msrb.mxu0 %v4781_v1  ;;  %v6653_v11 = vld [vmem:[#allocation7 + $0x6a4] sm:$0xf0]  ;;  %v5134_v1 = vld [vmem:[#allocation7 + $0x3e8] sm:$0xf0] }
  0xdd   :  { %v4684_v15 = vld [vmem:[#allocation7 + $0x48] sm:$0xf]  ;;  %v5485_v18 = vor.u32 %v6653_v11, %v5484_v10  ;;  %v5137_v55 = vor.u32 %v6561_v47, %v5134_v1 }
  0xde   :  { %3188 = vmatpush.bf16.msrb.mxu3 %v5581_v42  ;;  %3161 = vmatpush.bf16.msrb.mxu1 %v5037_v48  ;;  %v6453_v16 = vld [vmem:[#allocation7 + $0x64] sm:$0xf0] }
  0xdf   :  { %v4940_v17 = vld [vmem:[#allocation7 + $0x248] sm:$0xf]  ;;  %v4685_v24 = vor.u32 %v6453_v16, %v4684_v15  ;;  %v5070_v15 = vld [vmem:[#allocation7 + $0x368] sm:$0xf0] }
  0xe0   :  { %3175 = vmatpush.bf16.msrb.mxu2 %v5293_v49  ;;  %3148 = vmatpush.bf16.msrb.mxu0 %v4749_v62  ;;  %v6517_v19 = vld [vmem:[#allocation7 + $0x264] sm:$0xf0]  ;;  %v7284_v62 = vpop.f32.mrf.mxu0 }
  0xe1   :  { %v5196_v20 = vld [vmem:[#allocation7 + $0x448] sm:$0xf]  ;;  %v4941_v27 = vor.u32 %v6517_v19, %v4940_v17 }
  0xe2   :  { %3189 = vmatpush.bf16.msrb.mxu3 %v5549_v53  ;;  %3162 = vmatpush.bf16.msrb.mxu1 %v5005_v63  ;;  %v6581_v21 = vld [vmem:[#allocation7 + $0x464] sm:$0xf0]  ;;  %v6553_v63 = vld [vmem:[#allocation7 + $0x38c] sm:$0xf] }
  0xe3   :  { %v5452_v22 = vld [vmem:[#allocation7 + $0x648] sm:$0xf]  ;;  %v5197_v28 = vor.u32 %v6581_v21, %v5196_v20 }
  0xe4   :  { %3176 = vmatpush.bf16.msrb.mxu2 %v5261_v2  ;;  %v6645_v23 = vld [vmem:[#allocation7 + $0x664] sm:$0xf0]  ;;  %3149 = vmatpush.bf16.msrb.mxu0 %v4717_v12  ;;  %v5102_v2 = vld [vmem:[#allocation7 + $0x3a8] sm:$0xf0] }
  0xe5   :  { %v4652_v25 = vld [vmem:[#allocation7 + $0x8] sm:$0xf]  ;;  %v5453_v32 = vor.u32 %v6645_v23, %v5452_v22  ;;  %v5105_v10 = vor.u32 %v6553_v63, %v5102_v2  ;;  %v6481_v12 = vld [vmem:[#allocation7 + $0x14c] sm:$0xf]  ;;  %v7292_v22 = vpop.f32.mrf.mxu2 }
  0xe6   :  { %3190 = vmatpush.bf16.msrb.mxu3 %v5517_v6  ;;  %v6445_v26 = vld [vmem:[#allocation7 + $0x24] sm:$0xf0]  ;;  %3163 = vmatpush.bf16.msrb.mxu1 %v4973_v13  ;;  %v4849_v6 = vor.u32 %v6489_v58, %v4846_v59  ;;  %v4814_v13 = vld [vmem:[#allocation7 + $0x168] sm:$0xf0] }
  0xe7   :  { %v4908_v29 = vld [vmem:[#allocation7 + $0x208] sm:$0xf]  ;;  %v4653_v40 = vor.u32 %v6445_v26, %v4652_v25  ;;  %v6473_v25 = vld [vmem:[#allocation7 + $0x10c] sm:$0xf] }
  0xe8   :  { %3177 = vmatpush.bf16.msrb.mxu2 %v5229_v14  ;;  %v6509_v30 = vld [vmem:[#allocation7 + $0x224] sm:$0xf0]  ;;  %3150 = vmatpush.bf16.msrb.mxu0 %v4685_v24  ;;  %v6545_v14 = vld [vmem:[#allocation7 + $0x34c] sm:$0xf] }
  0xe9   :  { %v5164_v31 = vld [vmem:[#allocation7 + $0x408] sm:$0xf]  ;;  %v4909_v45 = vor.u32 %v6509_v30, %v4908_v29  ;;  %v5073_v23 = vor.u32 %v6545_v14, %v5070_v15  ;;  %v4782_v26 = vld [vmem:[#allocation7 + $0x128] sm:$0xf0] }
  0xea   :  { %3191 = vmatpush.bf16.msrb.mxu3 %v5485_v18  ;;  %v6573_v33 = vld [vmem:[#allocation7 + $0x424] sm:$0xf0]  ;;  %3164 = vmatpush.bf16.msrb.mxu1 %v4941_v27  ;;  %v4817_v18 = vor.u32 %v6481_v12, %v4814_v13  ;;  %v7294_v27 = vpop.f32.mrf.mxu3  ;;  %v5038_v29 = vld [vmem:[#allocation7 + $0x328] sm:$0xf0] }
  0xeb   :  { %v5420_v34 = vld [vmem:[#allocation7 + $0x608] sm:$0xf]  ;;  %v5165_v46 = vor.u32 %v6573_v33, %v5164_v31  ;;  %v7296_v31 = vpop.f32.mrf.mxu0  ;;  %v4785_v33 = vor.u32 %v6473_v25, %v4782_v26  ;;  %v4686_v12 = vld [vmem:[#allocation7 + $0x68] sm:$0xf0] }
  0xec   :  { %v6637_v35 = vld [vmem:[#allocation7 + $0x624] sm:$0xf0]  ;;  %3178 = vmatpush.bf16.msrb.mxu2 %v5197_v28  ;;  %3151 = vmatpush.bf16.msrb.mxu0 %v4653_v40  ;;  %v6537_v28 = vld [vmem:[#allocation7 + $0x30c] sm:$0xf] }
  0xed   :  { %v5900_v36 = vld [vmem:[#allocation7 + $0x9c8] sm:$0xf]  ;;  %v5421_v48 = vor.u32 %v6637_v35, %v5420_v34  ;;  %v7300_v58 = vpop.f32.mrf.mxu2  ;;  %v6513_v14 = vld [vmem:[#allocation7 + $0x24c] sm:$0xf] }
  0xee   :  { %v6757_v38 = vld [vmem:[#allocation7 + $0x9e4] sm:$0xf0]  ;;  %3192 = vmatpush.bf16.msrb.mxu3 %v5453_v32  ;;  %3165 = vmatpush.bf16.msrb.mxu1 %v4909_v45  ;;  %v5006_v45 = vld [vmem:[#allocation7 + $0x2e8] sm:$0xf0] }
  0xef   :  { %v6156_v39 = vld [vmem:[#allocation7 + $0xbc8] sm:$0xf]  ;;  %v5901_v49 = vor.u32 %v6757_v38, %v5900_v36  ;;  %3152 = vmatmul.bf16.vlgmr.msrb.gmra.mxu0 %v7260_v56  ;;  %v5041_v38 = vor.u32 %v6537_v28, %v5038_v29  ;;  %v4942_v15 = vld [vmem:[#allocation7 + $0x268] sm:$0xf0] }
  0xf0   :  { %v6821_v42 = vld [vmem:[#allocation7 + $0xbe4] sm:$0xf0]  ;;  %3179 = vmatpush.bf16.msrb.mxu2 %v5165_v46  ;;  %v4945_v25 = vor.u32 %v6513_v14, %v4942_v15  ;;  %v4654_v26 = vld [vmem:[#allocation7 + $0x28] sm:$0xf0] }
  0xf1   :  { %v6157_v50 = vor.u32 %v6821_v42, %v6156_v39  ;;  %v5868_v52 = vld [vmem:[#allocation7 + $0x988] sm:$0xf]  ;;  %3200 = vmatpush.bf16.msra.mxu0 %v5901_v49  ;;  %3166 = vmatmul.bf16.vlgmr.msrb.gmra.mxu1 %v7264_v61  ;;  %v7298_v39 = vpop.f32.mrf.mxu1  ;;  %v6465_v42 = vld [vmem:[#allocation7 + $0xcc] sm:$0xf] }
  0xf2   :  { %v6749_v53 = vld [vmem:[#allocation7 + $0x9a4] sm:$0xf0]  ;;  %3193 = vmatpush.bf16.msrb.mxu3 %v5421_v48  ;;  %v4753_v1 = vor.u32 %v6465_v42, %v4750_v43  ;;  %v7302_v63 = vpop.f32.mrf.mxu3  ;;  %v6505_v28 = vld [vmem:[#allocation7 + $0x20c] sm:$0xf] }
  0xf3   :  { %v6124_v54 = vld [vmem:[#allocation7 + $0xb88] sm:$0xf]  ;;  %v5869_v3 = vor.u32 %v6749_v53, %v5868_v52  ;;  %3214 = vmatpush.bf16.msra.mxu1 %v6157_v50  ;;  %3180 = vmatmul.bf16.vlgmr.msrb.gmra.mxu2 %v7262_v60  ;;  %v6457_v53 = vld [vmem:[#allocation7 + $0x8c] sm:$0xf] }
  0xf4   :  { %v6813_v57 = vld [vmem:[#allocation7 + $0xba4] sm:$0xf0]  ;;  %3228 = vmatpush.bf16.msra.mxu2 %v4881_v51  ;;  %v5009_v51 = vor.u32 %v6529_v44, %v5006_v45  ;;  %v4910_v29 = vld [vmem:[#allocation7 + $0x228] sm:$0xf0] }
  0xf5   :  { %v6125_v5 = vor.u32 %v6813_v57, %v6124_v54  ;;  %v5836_v7 = vld [vmem:[#allocation7 + $0x948] sm:$0xf]  ;;  %3194 = vmatmul.bf16.vlgmr.msrb.gmra.mxu3 %v7266_v0  ;;  %3201 = vmatpush.bf16.msra.mxu0 %v5869_v3  ;;  %v4718_v54 = vld [vmem:[#allocation7 + $0xa8] sm:$0xf0] }
  0xf6   :  { %v6741_v8 = vld [vmem:[#allocation7 + $0x964] sm:$0xf0]  ;;  %3242 = vmatpush.bf16.msra.mxu3 %v5137_v55  ;;  %v6521_v55 = vld [vmem:[#allocation7 + $0x28c] sm:$0xf]  ;;  %v4721_v3 = vor.u32 %v6457_v53, %v4718_v54 }
  0xf7   :  { %v6092_v9 = vld [vmem:[#allocation7 + $0xb48] sm:$0xf]  ;;  %v5837_v16 = vor.u32 %v6741_v8, %v5836_v7  ;;  %3215 = vmatpush.bf16.msra.mxu1 %v6125_v5  ;;  %v4974_v57 = vld [vmem:[#allocation7 + $0x2a8] sm:$0xf0]  ;;  %v7304_v5 = vpop.f32.mrf.mxu0 }
  0xf8   :  { %v6805_v11 = vld [vmem:[#allocation7 + $0xb64] sm:$0xf0]  ;;  %3229 = vmatpush.bf16.msra.mxu2 %v4849_v6  ;;  %7517 = vst [vmem:[#allocation20_spill] sm:$0xff] %v7304_v5  ;;  %v6817_v44 = vld [vmem:[#allocation7 + $0xbcc] sm:$0xf] }
  0xf9   :  { %v6093_v17 = vor.u32 %v6805_v11, %v6092_v9  ;;  %v5804_v19 = vld [vmem:[#allocation7 + $0x908] sm:$0xf]  ;;  %3202 = vmatpush.bf16.msra.mxu0 %v5837_v16  ;;  %v4977_v9 = vor.u32 %v6521_v55, %v4974_v57  ;;  %v6449_v11 = vld [vmem:[#allocation7 + $0x4c] sm:$0xf]  ;;  %v7306_v13 = vpop.f32.mrf.mxu1 }
  0xfa   :  { %v6733_v20 = vld [vmem:[#allocation7 + $0x924] sm:$0xf0]  ;;  %3243 = vmatpush.bf16.msra.mxu3 %v5105_v10  ;;  %7518 = vst [vmem:[#allocation21_spill] sm:$0xff] %v7306_v13  ;;  %v6158_v45 = vld [vmem:[#allocation7 + $0xbe8] sm:$0xf0] }
  0xfb   :  { %v6060_v21 = vld [vmem:[#allocation7 + $0xb08] sm:$0xf]  ;;  %v5805_v30 = vor.u32 %v6733_v20, %v5804_v19  ;;  %3216 = vmatpush.bf16.msra.mxu1 %v6093_v17  ;;  %v4689_v20 = vor.u32 %v6449_v11, %v4686_v12  ;;  %v6681_v53 = vld [vmem:[#allocation7 + $0x78c] sm:$0xf]  ;;  %v6161_v54 = vor.u32 %v6817_v44, %v6158_v45  ;;  %v5950_v13 = vld [vmem:[#allocation7 + $0xa38] sm:$0xf0] }
  0xfc   :  { %v6797_v24 = vld [vmem:[#allocation7 + $0xb24] sm:$0xf0]  ;;  %3230 = vmatpush.bf16.msra.mxu2 %v4817_v18  ;;  %v5614_v55 = vld [vmem:[#allocation7 + $0x7a8] sm:$0xf0] }
  0xfd   :  { %v6061_v32 = vor.u32 %v6797_v24, %v6060_v21  ;;  %v5772_v34 = vld [vmem:[#allocation7 + $0x8c8] sm:$0xf]  ;;  %3203 = vmatpush.bf16.msra.mxu0 %v5805_v30  ;;  %v6441_v24 = vld [vmem:[#allocation7 + $0xc] sm:$0xf] }
  0xfe   :  { %v6725_v35 = vld [vmem:[#allocation7 + $0x8e4] sm:$0xf0]  ;;  %3244 = vmatpush.bf16.msra.mxu3 %v5073_v23  ;;  %v6625_v30 = vld [vmem:[#allocation7 + $0x5cc] sm:$0xf]  ;;  %v4657_v43 = vor.u32 %v6441_v24, %v4654_v26 }
  0xff   :  { %v6028_v36 = vld [vmem:[#allocation7 + $0xac8] sm:$0xf]  ;;  %v5773_v46 = vor.u32 %v6725_v35, %v5772_v34  ;;  %3217 = vmatpush.bf16.msra.mxu1 %v6061_v32  ;;  %v5390_v32 = vld [vmem:[#allocation7 + $0x5e8] sm:$0xf0] }
 0x100   :  { %v6789_v40 = vld [vmem:[#allocation7 + $0xae4] sm:$0xf0]  ;;  %3231 = vmatpush.bf16.msra.mxu2 %v4785_v33  ;;  %v6689_v33 = vld [vmem:[#allocation7 + $0x7cc] sm:$0xf] }
 0x101   :  { %v6029_v47 = vor.u32 %v6789_v40, %v6028_v36  ;;  %v5740_v48 = vld [vmem:[#allocation7 + $0x888] sm:$0xf]  ;;  %3204 = vmatpush.bf16.msra.mxu0 %v5773_v46  ;;  %v5646_v35 = vld [vmem:[#allocation7 + $0x7e8] sm:$0xf0]  ;;  %v7308_v40 = vpop.f32.mrf.mxu2  ;;  %v7310_v46 = vpop.f32.mrf.mxu3 }
 0x102   :  { %v6717_v49 = vld [vmem:[#allocation7 + $0x8a4] sm:$0xf0]  ;;  %3245 = vmatpush.bf16.msra.mxu3 %v5041_v38  ;;  %v6753_v36 = vld [vmem:[#allocation7 + $0x9cc] sm:$0xf]  ;;  %7519 = vst [vmem:[#allocation22_spill] sm:$0xff] %v7308_v40 }
 0x103   :  { %v5996_v50 = vld [vmem:[#allocation7 + $0xa88] sm:$0xf]  ;;  %v5741_v59 = vor.u32 %v6717_v49, %v5740_v48  ;;  %3218 = vmatpush.bf16.msra.mxu1 %v6029_v47  ;;  %v5902_v38 = vld [vmem:[#allocation7 + $0x9e8] sm:$0xf0]  ;;  %7520 = vst [vmem:[#allocation23_spill] sm:$0xff] %v7310_v46  ;;  %v4913_v47 = vor.u32 %v6505_v28, %v4910_v29  ;;  %v5649_v48 = vor.u32 %v6689_v33, %v5646_v35 }
 0x104   :  { %v6781_v52 = vld [vmem:[#allocation7 + $0xaa4] sm:$0xf0]  ;;  %3232 = vmatpush.bf16.msra.mxu2 %v4753_v1  ;;  %v5393_v1 = vor.u32 %v6625_v30, %v5390_v32  ;;  %v5905_v49 = vor.u32 %v6753_v36, %v5902_v38  ;;  %v6745_v57 = vld [vmem:[#allocation7 + $0x98c] sm:$0xf]  ;;  %v5630_v46 = vld [vmem:[#allocation7 + $0x7b8] sm:$0xf0] }
 0x105   :  { %v5997_v2 = vor.u32 %v6781_v52, %v5996_v50  ;;  %v5708_v6 = vld [vmem:[#allocation7 + $0x848] sm:$0xf]  ;;  %3205 = vmatpush.bf16.msra.mxu0 %v5741_v59  ;;  %v7312_v50 = vpop.f32.mrf.mxu0  ;;  %v5358_v52 = vld [vmem:[#allocation7 + $0x5a8] sm:$0xf0] }
 0x106   :  { %v6709_v7 = vld [vmem:[#allocation7 + $0x864] sm:$0xf0]  ;;  %3246 = vmatpush.bf16.msra.mxu3 %v5009_v51  ;;  %v6617_v51 = vld [vmem:[#allocation7 + $0x58c] sm:$0xf] }
 0x107   :  { %v5964_v8 = vld [vmem:[#allocation7 + $0xa48] sm:$0xf]  ;;  %v5709_v16 = vor.u32 %v6709_v7, %v5708_v6  ;;  %3219 = vmatpush.bf16.msra.mxu1 %v5997_v2  ;;  %v5870_v59 = vld [vmem:[#allocation7 + $0x9a8] sm:$0xf0]  ;;  %v7314_v2 = vpop.f32.mrf.mxu1  ;;  %v5361_v7 = vor.u32 %v6617_v51, %v5358_v52 }
 0x108   :  { %v6773_v10 = vld [vmem:[#allocation7 + $0xa64] sm:$0xf0]  ;;  %3233 = vmatpush.bf16.msra.mxu2 %v4721_v3  ;;  %7521 = vst [vmem:[#allocation24_spill] sm:$0xff] %v7314_v2  ;;  %v6809_v3 = vld [vmem:[#allocation7 + $0xb8c] sm:$0xf] }
 0x109   :  { %v5676_v17 = vld [vmem:[#allocation7 + $0x808] sm:$0xf]  ;;  %v5965_v19 = vor.u32 %v6773_v10, %v5964_v8  ;;  %3206 = vmatpush.bf16.msra.mxu0 %v5709_v16  ;;  %v6126_v6 = vld [vmem:[#allocation7 + $0xba8] sm:$0xf0]  ;;  %v5617_v8 = vor.u32 %v6681_v53, %v5614_v55 }
 0x10a   :  { %v6701_v18 = vld [vmem:[#allocation7 + $0x824] sm:$0xf0]  ;;  %3247 = vmatpush.bf16.msra.mxu3 %v4977_v9  ;;  %v5873_v9 = vor.u32 %v6745_v57, %v5870_v59  ;;  %v6609_v10 = vld [vmem:[#allocation7 + $0x54c] sm:$0xf]  ;;  %v6129_v14 = vor.u32 %v6809_v3, %v6126_v6 }
 0x10b   :  { %v5932_v21 = vld [vmem:[#allocation7 + $0xa08] sm:$0xf]  ;;  %v5677_v34 = vor.u32 %v6701_v18, %v5676_v17  ;;  %3220 = vmatpush.bf16.msra.mxu1 %v5965_v19  ;;  %v5326_v11 = vld [vmem:[#allocation7 + $0x568] sm:$0xf0] }
 0x10c   :  { %v6765_v23 = vld [vmem:[#allocation7 + $0xa24] sm:$0xf0]  ;;  %3234 = vmatpush.bf16.msra.mxu2 %v4689_v20  ;;  %v6673_v12 = vld [vmem:[#allocation7 + $0x74c] sm:$0xf]  ;;  %v5329_v20 = vor.u32 %v6609_v10, %v5326_v11 }
 0x10d   :  { %v5933_v42 = vor.u32 %v6765_v23, %v5932_v21  ;;  %3207 = vmatpush.bf16.msra.mxu0 %v5677_v34  ;;  %v5582_v15 = vld [vmem:[#allocation7 + $0x768] sm:$0xf0]  ;;  %v7320_v21 = vpop.f32.mrf.mxu2 }
 0x10e   :  { %3248 = vmatpush.bf16.msra.mxu3 %v4945_v25  ;;  %v6737_v16 = vld [vmem:[#allocation7 + $0x94c] sm:$0xf]  ;;  %7522 = vst [vmem:[#allocation25_spill] sm:$0xff] %v7320_v21  ;;  %v5585_v23 = vor.u32 %v6673_v12, %v5582_v15  ;;  %v7322_v25 = vpop.f32.mrf.mxu3  ;;  %v6747_v21 = vld [vmem:[#allocation7 + $0x99c] sm:$0xf] }
 0x10f   :  { %3221 = vmatpush.bf16.msra.mxu1 %v5933_v42  ;;  %v5838_v17 = vld [vmem:[#allocation7 + $0x968] sm:$0xf0]  ;;  %7523 = vst [vmem:[#allocation26_spill] sm:$0xff] %v7322_v25  ;;  %v2985_v35 = vpop.f32.mrf.mxu0  ;;  %v2999_v44 = vpop.f32.mrf.mxu1 }
 0x110   :  { %3235 = vmatpush.bf16.msra.mxu2 %v4657_v43  ;;  %3208 = vmatmul.bf16.vlgmr.msra.gmra.mxu0 %v7272_v37  ;;  %v6801_v18 = vld [vmem:[#allocation7 + $0xb4c] sm:$0xf]  ;;  %v5841_v24 = vor.u32 %v6737_v16, %v5838_v17  ;;  %v2986_v42 = vadd.f32 %v2985_v35, %v7284_v62 }
 0x111   :  { %3256 = vmatpush.bf16.msrb.mxu0 %v5393_v1  ;;  %v6094_v19 = vld [vmem:[#allocation7 + $0xb68] sm:$0xf0] }
 0x112   :  { %3249 = vmatpush.bf16.msra.mxu3 %v4913_v47  ;;  %3222 = vmatmul.bf16.vlgmr.msra.gmra.mxu1 %v7274_v41  ;;  %v6601_v26 = vld [vmem:[#allocation7 + $0x50c] sm:$0xf]  ;;  %v6097_v30 = vor.u32 %v6801_v18, %v6094_v19  ;;  %v3000_v52 = vadd.f32 %v2999_v44, %v2986_v42 }
 0x113   :  { %3270 = vmatpush.bf16.msrb.mxu1 %v5649_v48  ;;  %3236 = vmatmul.bf16.vlgmr.msra.gmra.mxu2 %v7260_v56  ;;  %v5294_v28 = vld [vmem:[#allocation7 + $0x528] sm:$0xf0] }
 0x114   :  { %3284 = vmatpush.bf16.msrb.mxu2 %v5905_v49  ;;  %v6665_v29 = vld [vmem:[#allocation7 + $0x70c] sm:$0xf]  ;;  %v5297_v43 = vor.u32 %v6601_v26, %v5294_v28 }
 0x115   :  { %3250 = vmatmul.bf16.vlgmr.msra.gmra.mxu3 %v7264_v61  ;;  %3257 = vmatpush.bf16.msrb.mxu0 %v5361_v7  ;;  %v5550_v32 = vld [vmem:[#allocation7 + $0x728] sm:$0xf0]  ;;  %v3013_v11 = vpop.f32.mrf.mxu2 }
 0x116   :  { %3298 = vmatpush.bf16.msrb.mxu3 %v6161_v54  ;;  %v6729_v33 = vld [vmem:[#allocation7 + $0x90c] sm:$0xf]  ;;  %v5553_v45 = vor.u32 %v6665_v29, %v5550_v32  ;;  %v3014_v16 = vadd.f32 %v3013_v11, %v3000_v52  ;;  %v3027_v17 = vpop.f32.mrf.mxu3  ;;  %v6694_v11 = vld [vmem:[#allocation7 + $0x7ec] sm:$0xf0] }
 0x117   :  { %3271 = vmatpush.bf16.msrb.mxu1 %v5617_v8  ;;  %v5806_v34 = vld [vmem:[#allocation7 + $0x928] sm:$0xf0] }
 0x118   :  { %3285 = vmatpush.bf16.msrb.mxu2 %v5873_v9  ;;  %v6793_v36 = vld [vmem:[#allocation7 + $0xb0c] sm:$0xf]  ;;  %v5809_v47 = vor.u32 %v6729_v33, %v5806_v34 }
 0x119   :  { %v6062_v38 = vld [vmem:[#allocation7 + $0xb28] sm:$0xf0]  ;;  %3258 = vmatpush.bf16.msrb.mxu0 %v5329_v20 }
 0x11a   :  { %3299 = vmatpush.bf16.msrb.mxu3 %v6129_v14  ;;  %v6593_v1 = vld [vmem:[#allocation7 + $0x4cc] sm:$0xf]  ;;  %v6065_v51 = vor.u32 %v6793_v36, %v6062_v38 }
 0x11b   :  { %3272 = vmatpush.bf16.msrb.mxu1 %v5585_v23  ;;  %v5262_v48 = vld [vmem:[#allocation7 + $0x4e8] sm:$0xf0]  ;;  %v7325_v23 = vadd.f32 %v3027_v17, %v3014_v16  ;;  %v4852_v17 = vld [vmem:[#allocation7 + $0x190] sm:$0xf] }
 0x11c   :  { %3286 = vmatpush.bf16.msrb.mxu2 %v5841_v24  ;;  %v6657_v49 = vld [vmem:[#allocation7 + $0x6cc] sm:$0xf]  ;;  %v5265_v3 = vor.u32 %v6593_v1, %v5262_v48 }
 0x11d   :  { %v5518_v53 = vld [vmem:[#allocation7 + $0x6e8] sm:$0xf0]  ;;  %3259 = vmatpush.bf16.msrb.mxu0 %v5297_v43 }
 0x11e   :  { %3300 = vmatpush.bf16.msrb.mxu3 %v6097_v30  ;;  %v6721_v54 = vld [vmem:[#allocation7 + $0x8cc] sm:$0xf]  ;;  %v5521_v62 = vor.u32 %v6657_v49, %v5518_v53 }
 0x11f   :  { %v5774_v55 = vld [vmem:[#allocation7 + $0x8e8] sm:$0xf0]  ;;  %3273 = vmatpush.bf16.msrb.mxu1 %v5553_v45 }
 0x120   :  { %v6785_v57 = vld [vmem:[#allocation7 + $0xacc] sm:$0xf]  ;;  %3287 = vmatpush.bf16.msrb.mxu2 %v5809_v47  ;;  %v5777_v6 = vor.u32 %v6721_v54, %v5774_v55  ;;  %v4884_v55 = vld [vmem:[#allocation7 + $0x1d0] sm:$0xf] }
 0x121   :  { %v6030_v59 = vld [vmem:[#allocation7 + $0xae8] sm:$0xf0]  ;;  %3260 = vmatpush.bf16.msrb.mxu0 %v5265_v3 }
 0x122   :  { %v6585_v7 = vld [vmem:[#allocation7 + $0x48c] sm:$0xf]  ;;  %3301 = vmatpush.bf16.msrb.mxu3 %v6065_v51  ;;  %v6033_v10 = vor.u32 %v6785_v57, %v6030_v59  ;;  %v6502_v57 = vld [vmem:[#allocation7 + $0x1ec] sm:$0xf0] }
 0x123   :  { %v5230_v8 = vld [vmem:[#allocation7 + $0x4a8] sm:$0xf0]  ;;  %3274 = vmatpush.bf16.msrb.mxu1 %v5521_v62  ;;  %v5140_v59 = vld [vmem:[#allocation7 + $0x3d0] sm:$0xf] }
 0x124   :  { %v6649_v9 = vld [vmem:[#allocation7 + $0x68c] sm:$0xf]  ;;  %v5233_v20 = vor.u32 %v6585_v7, %v5230_v8  ;;  %3288 = vmatpush.bf16.msrb.mxu2 %v5777_v6  ;;  %v6566_v62 = vld [vmem:[#allocation7 + $0x3ec] sm:$0xf0] }
 0x125   :  { %v5486_v12 = vld [vmem:[#allocation7 + $0x6a8] sm:$0xf0]  ;;  %v5396_v6 = vld [vmem:[#allocation7 + $0x5d0] sm:$0xf] }
 0x126   :  { %v6713_v14 = vld [vmem:[#allocation7 + $0x88c] sm:$0xf]  ;;  %v5489_v24 = vor.u32 %v6649_v9, %v5486_v12  ;;  %3302 = vmatpush.bf16.msrb.mxu3 %v6033_v10  ;;  %3261 = vmatpush.bf16.msrb.mxu0 %v5233_v20  ;;  %v6630_v7 = vld [vmem:[#allocation7 + $0x5ec] sm:$0xf0] }
 0x127   :  { %v5742_v15 = vld [vmem:[#allocation7 + $0x8a8] sm:$0xf0]  ;;  %v5652_v10 = vld [vmem:[#allocation7 + $0x7d0] sm:$0xf]  ;;  %v5397_v16 = vor.u32 %v6630_v7, %v5396_v6 }
 0x128   :  { %v6777_v18 = vld [vmem:[#allocation7 + $0xa8c] sm:$0xf]  ;;  %v5745_v26 = vor.u32 %v6713_v14, %v5742_v15  ;;  %3275 = vmatpush.bf16.msrb.mxu1 %v5489_v24  ;;  %v4885_v14 = vor.u32 %v6502_v57, %v4884_v55  ;;  %v5141_v15 = vor.u32 %v6566_v62, %v5140_v59  ;;  %v5653_v20 = vor.u32 %v6694_v11, %v5652_v10  ;;  %v6558_v24 = vld [vmem:[#allocation7 + $0x3ac] sm:$0xf0]  ;;  %v7335_v59 = vpop.f32.mrf.mxu2 }
 0x129   :  { %v5998_v19 = vld [vmem:[#allocation7 + $0xaa8] sm:$0xf0]  ;;  %v6478_v55 = vld [vmem:[#allocation7 + $0x12c] sm:$0xf0] }
 0x12a   :  { %v6577_v28 = vld [vmem:[#allocation7 + $0x44c] sm:$0xf]  ;;  %v6001_v32 = vor.u32 %v6777_v18, %v5998_v19  ;;  %3289 = vmatpush.bf16.msrb.mxu2 %v5745_v26  ;;  %v6494_v18 = vld [vmem:[#allocation7 + $0x1ac] sm:$0xf0] }
 0x12b   :  { %v5198_v29 = vld [vmem:[#allocation7 + $0x468] sm:$0xf0]  ;;  %v5108_v19 = vld [vmem:[#allocation7 + $0x390] sm:$0xf] }
 0x12c   :  { %v6641_v30 = vld [vmem:[#allocation7 + $0x64c] sm:$0xf]  ;;  %v5201_v42 = vor.u32 %v6577_v28, %v5198_v29  ;;  %3303 = vmatpush.bf16.msrb.mxu3 %v6001_v32  ;;  %v5364_v26 = vld [vmem:[#allocation7 + $0x590] sm:$0xf]  ;;  %v7327_v29 = vpop.f32.mrf.mxu0 }
 0x12d   :  { %v5454_v33 = vld [vmem:[#allocation7 + $0x668] sm:$0xf0]  ;;  %v6622_v28 = vld [vmem:[#allocation7 + $0x5ac] sm:$0xf0] }
 0x12e   :  { %v6705_v34 = vld [vmem:[#allocation7 + $0x84c] sm:$0xf]  ;;  %v5457_v45 = vor.u32 %v6641_v30, %v5454_v33  ;;  %3262 = vmatpush.bf16.msrb.mxu0 %v5201_v42  ;;  %v5620_v30 = vld [vmem:[#allocation7 + $0x790] sm:$0xf]  ;;  %v7329_v33 = vpop.f32.mrf.mxu1 }
 0x12f   :  { %v5710_v35 = vld [vmem:[#allocation7 + $0x868] sm:$0xf0]  ;;  %v6686_v32 = vld [vmem:[#allocation7 + $0x7ac] sm:$0xf0] }
 0x130   :  { %v6769_v36 = vld [vmem:[#allocation7 + $0xa4c] sm:$0xf]  ;;  %v5713_v47 = vor.u32 %v6705_v34, %v5710_v35  ;;  %3276 = vmatpush.bf16.msrb.mxu1 %v5457_v45  ;;  %v4853_v34 = vor.u32 %v6494_v18, %v4852_v17  ;;  %v5109_v35 = vor.u32 %v6558_v24, %v5108_v19  ;;  %v6486_v42 = vld [vmem:[#allocation7 + $0x16c] sm:$0xf0] }
 0x131   :  { %v5966_v38 = vld [vmem:[#allocation7 + $0xa68] sm:$0xf0]  ;;  %v6550_v45 = vld [vmem:[#allocation7 + $0x36c] sm:$0xf0] }
 0x132   :  { %v6569_v43 = vld [vmem:[#allocation7 + $0x40c] sm:$0xf]  ;;  %v5969_v51 = vor.u32 %v6769_v36, %v5966_v38  ;;  %3290 = vmatpush.bf16.msrb.mxu2 %v5713_v47  ;;  %v5365_v36 = vor.u32 %v6622_v28, %v5364_v26  ;;  %v4820_v38 = vld [vmem:[#allocation7 + $0x150] sm:$0xf] }
 0x133   :  { %v5166_v44 = vld [vmem:[#allocation7 + $0x428] sm:$0xf0]  ;;  %v5332_v47 = vld [vmem:[#allocation7 + $0x550] sm:$0xf] }
 0x134   :  { %v6633_v1 = vld [vmem:[#allocation7 + $0x60c] sm:$0xf]  ;;  %v5169_v3 = vor.u32 %v6569_v43, %v5166_v44  ;;  %3304 = vmatpush.bf16.msrb.mxu3 %v5969_v51  ;;  %v5076_v43 = vld [vmem:[#allocation7 + $0x350] sm:$0xf]  ;;  %v5621_v44 = vor.u32 %v6686_v32, %v5620_v30  ;;  %v4821_v51 = vor.u32 %v6486_v42, %v4820_v38 }
 0x135   :  { %v5422_v48 = vld [vmem:[#allocation7 + $0x628] sm:$0xf0]  ;;  %v5044_v57 = vld [vmem:[#allocation7 + $0x310] sm:$0xf] }
 0x136   :  { %v6697_v49 = vld [vmem:[#allocation7 + $0x80c] sm:$0xf]  ;;  %v5425_v8 = vor.u32 %v6633_v1, %v5422_v48  ;;  %3263 = vmatpush.bf16.msrb.mxu0 %v5169_v3  ;;  %v6614_v1 = vld [vmem:[#allocation7 + $0x56c] sm:$0xf0] }
 0x137   :  { %v5678_v52 = vld [vmem:[#allocation7 + $0x828] sm:$0xf0]  ;;  %v5588_v48 = vld [vmem:[#allocation7 + $0x750] sm:$0xf] }
 0x138   :  { %v6761_v53 = vld [vmem:[#allocation7 + $0xa0c] sm:$0xf]  ;;  %v5681_v9 = vor.u32 %v6697_v49, %v5678_v52  ;;  %3277 = vmatpush.bf16.msrb.mxu1 %v5425_v8  ;;  %v6678_v49 = vld [vmem:[#allocation7 + $0x76c] sm:$0xf0]  ;;  %v5077_v52 = vor.u32 %v6550_v45, %v5076_v43  ;;  %v7337_v8 = vpop.f32.mrf.mxu3 }
 0x139   :  { %v5934_v54 = vld [vmem:[#allocation7 + $0xa28] sm:$0xf0]  ;;  %3264 = vmatmul.bf16.vlgmr.msrb.gmra.mxu0 %v7262_v60  ;;  %v5589_v3 = vor.u32 %v6678_v49, %v5588_v48  ;;  %v6542_v62 = vld [vmem:[#allocation7 + $0x32c] sm:$0xf0] }
 0x13a   :  { %v5937_v12 = vor.u32 %v6761_v53, %v5934_v54  ;;  %3291 = vmatpush.bf16.msrb.mxu2 %v5681_v9  ;;  %3312 = vmatpush.bf16.msra.mxu0 %v4885_v14  ;;  %v5333_v53 = vor.u32 %v6614_v1, %v5332_v47  ;;  %v4788_v54 = vld [vmem:[#allocation7 + $0x110] sm:$0xf]  ;;  %v3041_v9 = vpop.f32.mrf.mxu0  ;;  %v3069_v47 = vpop.f32.mrf.mxu2 }
 0x13b   :  { %3278 = vmatmul.bf16.vlgmr.msrb.gmra.mxu1 %v7266_v0  ;;  %v5300_v6 = vld [vmem:[#allocation7 + $0x510] sm:$0xf]  ;;  %v4789_v14 = vor.u32 %v6478_v55, %v4788_v54 }
 0x13c   :  { %3305 = vmatpush.bf16.msrb.mxu3 %v5937_v12  ;;  %3326 = vmatpush.bf16.msra.mxu1 %v5141_v15  ;;  %v6606_v7 = vld [vmem:[#allocation7 + $0x52c] sm:$0xf0]  ;;  %v3042_v12 = vadd.f32 %v3041_v9, %v7325_v23  ;;  %v3055_v15 = vpop.f32.mrf.mxu1 }
 0x13d   :  { %3292 = vmatmul.bf16.vlgmr.msrb.gmra.mxu2 %v7272_v37  ;;  %v5556_v10 = vld [vmem:[#allocation7 + $0x710] sm:$0xf]  ;;  %v5301_v17 = vor.u32 %v6606_v7, %v5300_v6 }
 0x13e   :  { %3340 = vmatpush.bf16.msra.mxu2 %v5397_v16  ;;  %3313 = vmatpush.bf16.msra.mxu0 %v4853_v34  ;;  %v6670_v11 = vld [vmem:[#allocation7 + $0x72c] sm:$0xf0]  ;;  %v5045_v16 = vor.u32 %v6542_v62, %v5044_v57  ;;  %v7340_v26 = vadd.f32 %v3055_v15, %v3042_v12 }
 0x13f   :  { %3306 = vmatmul.bf16.vlgmr.msrb.gmra.mxu3 %v7274_v41  ;;  %v4756_v18 = vld [vmem:[#allocation7 + $0xd0] sm:$0xf]  ;;  %v5557_v24 = vor.u32 %v6670_v11, %v5556_v10 }
 0x140   :  { %3354 = vmatpush.bf16.msra.mxu3 %v5653_v20  ;;  %3327 = vmatpush.bf16.msra.mxu1 %v5109_v35  ;;  %v6470_v19 = vld [vmem:[#allocation7 + $0xec] sm:$0xf0] }
 0x141   :  { %v5012_v20 = vld [vmem:[#allocation7 + $0x2d0] sm:$0xf]  ;;  %v4757_v23 = vor.u32 %v6470_v19, %v4756_v18 }
 0x142   :  { %3341 = vmatpush.bf16.msra.mxu2 %v5365_v36  ;;  %3314 = vmatpush.bf16.msra.mxu0 %v4821_v51  ;;  %v6534_v28 = vld [vmem:[#allocation7 + $0x2ec] sm:$0xf0]  ;;  %v3070_v51 = vadd.f32 %v3069_v47, %v7286_v4  ;;  %v4886_v47 = vld [vmem:[#allocation7 + $0x1f0] sm:$0xf0] }
 0x143   :  { %v5268_v30 = vld [vmem:[#allocation7 + $0x4d0] sm:$0xf]  ;;  %v5013_v36 = vor.u32 %v6534_v28, %v5012_v20 }
 0x144   :  { %3355 = vmatpush.bf16.msra.mxu3 %v5621_v44  ;;  %3328 = vmatpush.bf16.msra.mxu1 %v5077_v52  ;;  %v6598_v32 = vld [vmem:[#allocation7 + $0x4ec] sm:$0xf0]  ;;  %v3083_v52 = vpop.f32.mrf.mxu3 }
 0x145   :  { %v5524_v34 = vld [vmem:[#allocation7 + $0x6d0] sm:$0xf]  ;;  %v5269_v38 = vor.u32 %v6598_v32, %v5268_v30  ;;  %v7343_v57 = vadd.f32 %v3083_v52, %v3070_v51  ;;  %v5142_v51 = vld [vmem:[#allocation7 + $0x3f0] sm:$0xf0] }
 0x146   :  { %3342 = vmatpush.bf16.msra.mxu2 %v5333_v53  ;;  %v6662_v35 = vld [vmem:[#allocation7 + $0x6ec] sm:$0xf0]  ;;  %3315 = vmatpush.bf16.msra.mxu0 %v4789_v14 }
 0x147   :  { %v4724_v42 = vld [vmem:[#allocation7 + $0x90] sm:$0xf]  ;;  %v5525_v45 = vor.u32 %v6662_v35, %v5524_v34 }
 0x148   :  { %3356 = vmatpush.bf16.msra.mxu3 %v5589_v3  ;;  %3329 = vmatpush.bf16.msra.mxu1 %v5045_v16  ;;  %v6462_v43 = vld [vmem:[#allocation7 + $0xac] sm:$0xf0] }
 0x149   :  { %v4980_v44 = vld [vmem:[#allocation7 + $0x290] sm:$0xf]  ;;  %v4725_v55 = vor.u32 %v6462_v43, %v4724_v42 }
 0x14a   :  { %3343 = vmatpush.bf16.msra.mxu2 %v5301_v17  ;;  %v6526_v1 = vld [vmem:[#allocation7 + $0x2ac] sm:$0xf0]  ;;  %3316 = vmatpush.bf16.msra.mxu0 %v4757_v23 }
 0x14b   :  { %v5236_v48 = vld [vmem:[#allocation7 + $0x490] sm:$0xf]  ;;  %v4981_v3 = vor.u32 %v6526_v1, %v4980_v44 }
 0x14c   :  { %3357 = vmatpush.bf16.msra.mxu3 %v5557_v24  ;;  %v6590_v49 = vld [vmem:[#allocation7 + $0x4ac] sm:$0xf0]  ;;  %3330 = vmatpush.bf16.msra.mxu1 %v5013_v36 }
 0x14d   :  { %v5492_v53 = vld [vmem:[#allocation7 + $0x690] sm:$0xf]  ;;  %v5237_v62 = vor.u32 %v6590_v49, %v5236_v48  ;;  %v6562_v49 = vld [vmem:[#allocation7 + $0x3d4] sm:$0xf] }
 0x14e   :  { %v6654_v54 = vld [vmem:[#allocation7 + $0x6ac] sm:$0xf0]  ;;  %3344 = vmatpush.bf16.msra.mxu2 %v5269_v38  ;;  %3317 = vmatpush.bf16.msra.mxu0 %v4725_v55 }
 0x14f   :  { %v4692_v6 = vld [vmem:[#allocation7 + $0x50] sm:$0xf]  ;;  %v5493_v10 = vor.u32 %v6654_v54, %v5492_v53 }
 0x150   :  { %v6454_v7 = vld [vmem:[#allocation7 + $0x6c] sm:$0xf0]  ;;  %3358 = vmatpush.bf16.msra.mxu3 %v5525_v45  ;;  %3331 = vmatpush.bf16.msra.mxu1 %v4981_v3  ;;  %v6498_v45 = vld [vmem:[#allocation7 + $0x1d4] sm:$0xf] }
 0x151   :  { %v4948_v9 = vld [vmem:[#allocation7 + $0x250] sm:$0xf]  ;;  %v4693_v16 = vor.u32 %v6454_v7, %v4692_v6  ;;  %v4889_v55 = vor.u32 %v6498_v45, %v4886_v47  ;;  %v5145_v7 = vor.u32 %v6562_v49, %v5142_v51  ;;  %v3071_v47 = vpop.f32.mrf.mxu2  ;;  %v6474_v49 = vld [vmem:[#allocation7 + $0x114] sm:$0xf] }
 0x152   :  { %v6518_v11 = vld [vmem:[#allocation7 + $0x26c] sm:$0xf0]  ;;  %3345 = vmatpush.bf16.msra.mxu2 %v5237_v62  ;;  %v4790_v51 = vld [vmem:[#allocation7 + $0x130] sm:$0xf0] }
 0x153   :  { %v5204_v12 = vld [vmem:[#allocation7 + $0x450] sm:$0xf]  ;;  %v4949_v19 = vor.u32 %v6518_v11, %v4948_v9  ;;  %3318 = vmatpush.bf16.msra.mxu0 %v4693_v16  ;;  %v4854_v11 = vld [vmem:[#allocation7 + $0x1b0] sm:$0xf0] }
 0x154   :  { %v6582_v14 = vld [vmem:[#allocation7 + $0x46c] sm:$0xf0]  ;;  %3359 = vmatpush.bf16.msra.mxu3 %v5493_v10  ;;  %v6490_v10 = vld [vmem:[#allocation7 + $0x194] sm:$0xf] }
 0x155   :  { %v5460_v4 = vld [vmem:[#allocation7 + $0x650] sm:$0xf]  ;;  %v5205_v20 = vor.u32 %v6582_v14, %v5204_v12  ;;  %3332 = vmatpush.bf16.msra.mxu1 %v4949_v19  ;;  %v7345_v12 = vpop.f32.mrf.mxu0  ;;  %v6554_v14 = vld [vmem:[#allocation7 + $0x394] sm:$0xf] }
 0x156   :  { %v6646_v15 = vld [vmem:[#allocation7 + $0x66c] sm:$0xf0] }
 0x157   :  { %v4660_v17 = vld [vmem:[#allocation7 + $0x10] sm:$0xf]  ;;  %v5461_v32 = vor.u32 %v6646_v15, %v5460_v4  ;;  %3346 = vmatpush.bf16.msra.mxu2 %v5205_v20  ;;  %v5110_v4 = vld [vmem:[#allocation7 + $0x3b0] sm:$0xf0]  ;;  %v7347_v15 = vpop.f32.mrf.mxu1 }
 0x158   :  { %v6446_v18 = vld [vmem:[#allocation7 + $0x2c] sm:$0xf0] }
 0x159   :  { %v4916_v24 = vld [vmem:[#allocation7 + $0x210] sm:$0xf]  ;;  %v4661_v43 = vor.u32 %v6446_v18, %v4660_v17  ;;  %3360 = vmatpush.bf16.msra.mxu3 %v5461_v32  ;;  %v4857_v18 = vor.u32 %v6490_v10, %v4854_v11  ;;  %v6482_v32 = vld [vmem:[#allocation7 + $0x154] sm:$0xf] }
 0x15a   :  { %v6510_v28 = vld [vmem:[#allocation7 + $0x22c] sm:$0xf0] }
 0x15b   :  { %v5172_v30 = vld [vmem:[#allocation7 + $0x410] sm:$0xf]  ;;  %v4917_v1 = vor.u32 %v6510_v28, %v4916_v24  ;;  %3319 = vmatpush.bf16.msra.mxu0 %v4661_v43  ;;  %v5113_v28 = vor.u32 %v6554_v14, %v5110_v4  ;;  %v3072_v4 = vadd.f32 %v3071_v47, %v7298_v39 }
 0x15c   :  { %v6574_v34 = vld [vmem:[#allocation7 + $0x42c] sm:$0xf0] }
 0x15d   :  { %v5428_v35 = vld [vmem:[#allocation7 + $0x610] sm:$0xf]  ;;  %v5173_v48 = vor.u32 %v6574_v34, %v5172_v30  ;;  %3333 = vmatpush.bf16.msra.mxu1 %v4917_v1  ;;  %v4822_v34 = vld [vmem:[#allocation7 + $0x170] sm:$0xf0] }
 0x15e   :  { %v6638_v23 = vld [vmem:[#allocation7 + $0x62c] sm:$0xf0]  ;;  %3320 = vmatmul.bf16.vlgmr.msra.gmra.mxu0 %v7260_v56 }
 0x15f   :  { %v5908_v36 = vld [vmem:[#allocation7 + $0x9d0] sm:$0xf]  ;;  %v5429_v52 = vor.u32 %v6638_v23, %v5428_v35  ;;  %3347 = vmatpush.bf16.msra.mxu2 %v5173_v48  ;;  %v6546_v35 = vld [vmem:[#allocation7 + $0x354] sm:$0xf] }
 0x160   :  { %v6758_v38 = vld [vmem:[#allocation7 + $0x9ec] sm:$0xf0]  ;;  %3334 = vmatmul.bf16.vlgmr.msra.gmra.mxu1 %v7264_v61  ;;  %v5078_v23 = vld [vmem:[#allocation7 + $0x370] sm:$0xf0] }
 0x161   :  { %v6164_v42 = vld [vmem:[#allocation7 + $0xbd0] sm:$0xf]  ;;  %v5909_v53 = vor.u32 %v6758_v38, %v5908_v36  ;;  %3361 = vmatpush.bf16.msra.mxu3 %v5429_v52  ;;  %v5081_v1 = vor.u32 %v6546_v35, %v5078_v23  ;;  %v3085_v52 = vpop.f32.mrf.mxu3 }
 0x162   :  { %v6822_v44 = vld [vmem:[#allocation7 + $0xbec] sm:$0xf0]  ;;  %3348 = vmatmul.bf16.vlgmr.msra.gmra.mxu2 %v7262_v60 }
 0x163   :  { %v6165_v54 = vor.u32 %v6822_v44, %v6164_v42  ;;  %v5876_v3 = vld [vmem:[#allocation7 + $0x990] sm:$0xf]  ;;  %3368 = vmatpush.bf16.msrb.mxu0 %v5909_v53  ;;  %3396 = vmatpush.bf16.msrb.mxu2 %v4889_v55  ;;  %v4825_v42 = vor.u32 %v6482_v32, %v4822_v34  ;;  %v3097_v53 = vpop.f32.mrf.mxu0  ;;  %v5046_v55 = vld [vmem:[#allocation7 + $0x330] sm:$0xf0] }
 0x164   :  { %v6750_v62 = vld [vmem:[#allocation7 + $0x9ac] sm:$0xf0]  ;;  %3362 = vmatmul.bf16.vlgmr.msra.gmra.mxu3 %v7266_v0 }
 0x165   :  { %v6132_v6 = vld [vmem:[#allocation7 + $0xb90] sm:$0xf]  ;;  %v5877_v16 = vor.u32 %v6750_v62, %v5876_v3  ;;  %3382 = vmatpush.bf16.msrb.mxu1 %v6165_v54  ;;  %3410 = vmatpush.bf16.msrb.mxu3 %v5145_v7  ;;  %v6538_v54 = vld [vmem:[#allocation7 + $0x314] sm:$0xf]  ;;  %v3098_v3 = vadd.f32 %v3097_v53, %v7343_v57 }
 0x166   :  { %v6814_v9 = vld [vmem:[#allocation7 + $0xbac] sm:$0xf0] }
 0x167   :  { %v6133_v17 = vor.u32 %v6814_v9, %v6132_v6  ;;  %v5844_v19 = vld [vmem:[#allocation7 + $0x950] sm:$0xf]  ;;  %3369 = vmatpush.bf16.msrb.mxu0 %v5877_v16  ;;  %3397 = vmatpush.bf16.msrb.mxu2 %v4857_v18  ;;  %v3111_v6 = vpop.f32.mrf.mxu1  ;;  %v4793_v9 = vor.u32 %v6474_v49, %v4790_v51  ;;  %v5049_v16 = vor.u32 %v6538_v54, %v5046_v55  ;;  %v4982_v49 = vld [vmem:[#allocation7 + $0x2b0] sm:$0xf0] }
 0x168   :  { %v6742_v20 = vld [vmem:[#allocation7 + $0x96c] sm:$0xf0] }
 0x169   :  { %v6100_v24 = vld [vmem:[#allocation7 + $0xb50] sm:$0xf]  ;;  %v5845_v36 = vor.u32 %v6742_v20, %v5844_v19  ;;  %3383 = vmatpush.bf16.msrb.mxu1 %v6133_v17  ;;  %3411 = vmatpush.bf16.msrb.mxu3 %v5113_v28  ;;  %v3112_v17 = vadd.f32 %v3111_v6, %v3098_v3  ;;  %v6466_v19 = vld [vmem:[#allocation7 + $0xd4] sm:$0xf] }
 0x16a   :  { %v6806_v30 = vld [vmem:[#allocation7 + $0xb6c] sm:$0xf0]  ;;  %v4758_v20 = vld [vmem:[#allocation7 + $0xf0] sm:$0xf0] }
 0x16b   :  { %v6101_v38 = vor.u32 %v6806_v30, %v6100_v24  ;;  %v5812_v43 = vld [vmem:[#allocation7 + $0x910] sm:$0xf]  ;;  %3370 = vmatpush.bf16.msrb.mxu0 %v5845_v36  ;;  %3398 = vmatpush.bf16.msrb.mxu2 %v4825_v42  ;;  %v6530_v24 = vld [vmem:[#allocation7 + $0x2d4] sm:$0xf]  ;;  %v4761_v32 = vor.u32 %v6466_v19, %v4758_v20  ;;  %v3086_v36 = vadd.f32 %v3085_v52, %v3072_v4  ;;  %v3099_v47 = vpop.f32.mrf.mxu0 }
 0x16c   :  { %v6734_v44 = vld [vmem:[#allocation7 + $0x92c] sm:$0xf0]  ;;  %v5014_v28 = vld [vmem:[#allocation7 + $0x2f0] sm:$0xf0] }
 0x16d   :  { %v6068_v45 = vld [vmem:[#allocation7 + $0xb10] sm:$0xf]  ;;  %v5813_v62 = vor.u32 %v6734_v44, %v5812_v43  ;;  %3384 = vmatpush.bf16.msrb.mxu1 %v6101_v38  ;;  %3412 = vmatpush.bf16.msrb.mxu3 %v5081_v1  ;;  %v5017_v39 = vor.u32 %v6530_v24, %v5014_v28  ;;  %v3125_v38 = vpop.f32.mrf.mxu2  ;;  %v6458_v43 = vld [vmem:[#allocation7 + $0x94] sm:$0xf]  ;;  %v3139_v1 = vpop.f32.mrf.mxu3  ;;  %v3100_v51 = vadd.f32 %v3099_v47, %v3086_v36 }
 0x16e   :  { %v6798_v48 = vld [vmem:[#allocation7 + $0xb2c] sm:$0xf0]  ;;  %v4726_v44 = vld [vmem:[#allocation7 + $0xb0] sm:$0xf0] }
 0x16f   :  { %v6069_v7 = vor.u32 %v6798_v48, %v6068_v45  ;;  %v5780_v10 = vld [vmem:[#allocation7 + $0x8d0] sm:$0xf]  ;;  %3371 = vmatpush.bf16.msrb.mxu0 %v5813_v62  ;;  %3399 = vmatpush.bf16.msrb.mxu2 %v4793_v9  ;;  %v3126_v45 = vadd.f32 %v3125_v38, %v3112_v17  ;;  %v6522_v48 = vld [vmem:[#allocation7 + $0x294] sm:$0xf]  ;;  %v3113_v54 = vpop.f32.mrf.mxu1  ;;  %v4729_v52 = vor.u32 %v6458_v43, %v4726_v44 }
 0x170   :  { %v6726_v11 = vld [vmem:[#allocation7 + $0x8ec] sm:$0xf0]  ;;  %v4985_v9 = vor.u32 %v6522_v48, %v4982_v49  ;;  %v4694_v4 = vld [vmem:[#allocation7 + $0x70] sm:$0xf0] }
 0x171   :  { %v6036_v14 = vld [vmem:[#allocation7 + $0xad0] sm:$0xf]  ;;  %v5781_v57 = vor.u32 %v6726_v11, %v5780_v10  ;;  %3385 = vmatpush.bf16.msrb.mxu1 %v6069_v7  ;;  %3413 = vmatpush.bf16.msrb.mxu3 %v5049_v16  ;;  %v3140_v55 = vadd.f32 %v3139_v1, %v3126_v45  ;;  %v3114_v10 = vadd.f32 %v3113_v54, %v3100_v51  ;;  %v3648_v16 = vld [vmem:[#allocation10] sm:$0xff]  ;;  %v6514_v17 = vld [vmem:[#allocation7 + $0x254] sm:$0xf] }
 0x172   :  { %v6790_v18 = vld [vmem:[#allocation7 + $0xaec] sm:$0xf0]  ;;  %v3651_v19 = vperm.slane %v3648_v16, 1  ;;  %v6506_v38 = vld [vmem:[#allocation7 + $0x214] sm:$0xf] }
 0x173   :  { %v6037_v30 = vor.u32 %v6790_v18, %v6036_v14  ;;  %v5748_v34 = vld [vmem:[#allocation7 + $0x890] sm:$0xf]  ;;  %3372 = vmatpush.bf16.msrb.mxu0 %v5781_v57  ;;  %3400 = vmatpush.bf16.msrb.mxu2 %v4761_v32  ;;  %v6450_v14 = vld [vmem:[#allocation7 + $0x54] sm:$0xf] }
 0x174   :  { %v6718_v35 = vld [vmem:[#allocation7 + $0x8ac] sm:$0xf0]  ;;  %v4950_v18 = vld [vmem:[#allocation7 + $0x270] sm:$0xf0] }
 0x175   :  { %v6004_v23 = vld [vmem:[#allocation7 + $0xa90] sm:$0xf]  ;;  %v5749_v53 = vor.u32 %v6718_v35, %v5748_v34  ;;  %3386 = vmatpush.bf16.msrb.mxu1 %v6037_v30  ;;  %3414 = vmatpush.bf16.msrb.mxu3 %v5017_v39  ;;  %v4697_v30 = vor.u32 %v6450_v14, %v4694_v4  ;;  %v6442_v35 = vld [vmem:[#allocation7 + $0x14] sm:$0xf]  ;;  %v3127_v36 = vpop.f32.mrf.mxu2  ;;  %v3141_v44 = vpop.f32.mrf.mxu3 }
 0x176   :  { %v6782_v42 = vld [vmem:[#allocation7 + $0xaac] sm:$0xf0]  ;;  %v4662_v39 = vld [vmem:[#allocation7 + $0x30] sm:$0xf0]  ;;  %v3128_v43 = vadd.f32 %v3127_v36, %v3114_v10 }
 0x177   :  { %v6005_v3 = vor.u32 %v6782_v42, %v6004_v23  ;;  %v5716_v62 = vld [vmem:[#allocation7 + $0x850] sm:$0xf]  ;;  %3373 = vmatpush.bf16.msrb.mxu0 %v5749_v53  ;;  %3401 = vmatpush.bf16.msrb.mxu2 %v4729_v52  ;;  %v4953_v23 = vor.u32 %v6514_v17, %v4950_v18  ;;  %v4918_v42 = vld [vmem:[#allocation7 + $0x230] sm:$0xf0] }
 0x178   :  { %v6710_v6 = vld [vmem:[#allocation7 + $0x86c] sm:$0xf0]  ;;  %v6626_v45 = vld [vmem:[#allocation7 + $0x5d4] sm:$0xf]  ;;  %v3142_v52 = vadd.f32 %v3141_v44, %v3128_v43 }
 0x179   :  { %v5972_v7 = vld [vmem:[#allocation7 + $0xa50] sm:$0xf]  ;;  %v5717_v20 = vor.u32 %v6710_v6, %v5716_v62  ;;  %3387 = vmatpush.bf16.msrb.mxu1 %v6005_v3  ;;  %3415 = vmatpush.bf16.msrb.mxu3 %v4985_v9  ;;  %v5398_v47 = vld [vmem:[#allocation7 + $0x5f0] sm:$0xf0]  ;;  %v3667_v3 = vadd.f32 %v3651_v19, %v3140_v55  ;;  %v4665_v62 = vor.u32 %v6442_v35, %v4662_v39 }
 0x17a   :  { %v6774_v11 = vld [vmem:[#allocation7 + $0xa6c] sm:$0xf0]  ;;  %v6690_v1 = vld [vmem:[#allocation7 + $0x7d4] sm:$0xf]  ;;  %v4921_v9 = vor.u32 %v6506_v38, %v4918_v42  ;;  %v5401_v10 = vor.u32 %v6626_v45, %v5398_v47 }
 0x17b   :  { %v5684_v24 = vld [vmem:[#allocation7 + $0x810] sm:$0xf]  ;;  %v5973_v57 = vor.u32 %v6774_v11, %v5972_v7  ;;  %3374 = vmatpush.bf16.msrb.mxu0 %v5717_v20  ;;  %v5654_v51 = vld [vmem:[#allocation7 + $0x7f0] sm:$0xf0]  ;;  %3402 = vmatpush.bf16.msrb.mxu2 %v4697_v30  ;;  %v3675_v11 = vadd.f32 %v3651_v19, %v3142_v52 }
 0x17c   :  { %v6702_v28 = vld [vmem:[#allocation7 + $0x82c] sm:$0xf0]  ;;  %v6754_v53 = vld [vmem:[#allocation7 + $0x9d4] sm:$0xf]  ;;  %v5657_v14 = vor.u32 %v6690_v1, %v5654_v51 }
 0x17d   :  { %v5940_v32 = vld [vmem:[#allocation7 + $0xa10] sm:$0xf]  ;;  %v5685_v48 = vor.u32 %v6702_v28, %v5684_v24  ;;  %v5910_v54 = vld [vmem:[#allocation7 + $0x9f0] sm:$0xf0]  ;;  %3388 = vmatpush.bf16.msrb.mxu1 %v5973_v57  ;;  %3416 = vmatpush.bf16.msrb.mxu3 %v4953_v23  ;;  %v3683_v57 = vmax.f32 %v3667_v3, 0.0  ;;  %v3691_v30 = vmax.f32 %v3675_v11, 0.0 }
 0x17e   :  { %v6766_v34 = vld [vmem:[#allocation7 + $0xa2c] sm:$0xf0]  ;;  %v6818_v6 = vld [vmem:[#allocation7 + $0xbd4] sm:$0xf]  ;;  %v5913_v4 = vor.u32 %v6754_v53, %v5910_v54 }
 0x17f   :  { %v5941_v49 = vor.u32 %v6766_v34, %v5940_v32  ;;  %v6166_v7 = vld [vmem:[#allocation7 + $0xbf0] sm:$0xf0]  ;;  %3375 = vmatpush.bf16.msrb.mxu0 %v5685_v48  ;;  %3403 = vmatpush.bf16.msrb.mxu2 %v4665_v62  ;;  %v7355_v19 = vpack.c.bf16 %v3691_v30, %v3683_v57 }
 0x180   :  { %v6618_v16 = vld [vmem:[#allocation7 + $0x594] sm:$0xf]  ;;  %v6169_v20 = vor.u32 %v6818_v6, %v6166_v7 }
 0x181   :  { %v5366_v17 = vld [vmem:[#allocation7 + $0x5b0] sm:$0xf0]  ;;  %3389 = vmatpush.bf16.msrb.mxu1 %v5941_v49  ;;  %3417 = vmatpush.bf16.msrb.mxu3 %v4921_v9 }
 0x182   :  { %v6682_v18 = vld [vmem:[#allocation7 + $0x794] sm:$0xf]  ;;  %v5369_v35 = vor.u32 %v6618_v16, %v5366_v17  ;;  %3376 = vmatmul.bf16.vlgmr.msrb.gmra.mxu0 %v7272_v37  ;;  %3404 = vmatmul.bf16.vlgmr.msrb.gmra.mxu2 %v7260_v56 }
 0x183   :  { %v5622_v24 = vld [vmem:[#allocation7 + $0x7b0] sm:$0xf0]  ;;  %3424 = vmatpush.bf16.msra.mxu0 %v5401_v10  ;;  %3452 = vmatpush.bf16.msra.mxu2 %v5913_v4 }
 0x184   :  { %v6746_v28 = vld [vmem:[#allocation7 + $0x994] sm:$0xf]  ;;  %v5625_v23 = vor.u32 %v6682_v18, %v5622_v24  ;;  %3390 = vmatmul.bf16.vlgmr.msrb.gmra.mxu1 %v7274_v41  ;;  %3418 = vmatmul.bf16.vlgmr.msrb.gmra.mxu3 %v7264_v61 }
 0x185   :  { %v5878_v55 = vld [vmem:[#allocation7 + $0x9b0] sm:$0xf0]  ;;  %3438 = vmatpush.bf16.msra.mxu1 %v5657_v14  ;;  %3466 = vmatpush.bf16.msra.mxu3 %v6169_v20 }
 0x186   :  { %v6810_v32 = vld [vmem:[#allocation7 + $0xb94] sm:$0xf]  ;;  %v5881_v36 = vor.u32 %v6746_v28, %v5878_v55 }
 0x187   :  { %v6134_v34 = vld [vmem:[#allocation7 + $0xbb0] sm:$0xf0]  ;;  %3425 = vmatpush.bf16.msra.mxu0 %v5369_v35 }
 0x188   :  { %v6610_v39 = vld [vmem:[#allocation7 + $0x554] sm:$0xf]  ;;  %v6137_v43 = vor.u32 %v6810_v32, %v6134_v34  ;;  %3453 = vmatpush.bf16.msra.mxu2 %v5881_v36 }
 0x189   :  { %v5334_v38 = vld [vmem:[#allocation7 + $0x570] sm:$0xf0]  ;;  %3439 = vmatpush.bf16.msra.mxu1 %v5625_v23 }
 0x18a   :  { %v6674_v42 = vld [vmem:[#allocation7 + $0x754] sm:$0xf]  ;;  %v5337_v49 = vor.u32 %v6610_v39, %v5334_v38  ;;  %3467 = vmatpush.bf16.msra.mxu3 %v6137_v43 }
 0x18b   :  { %v5590_v44 = vld [vmem:[#allocation7 + $0x770] sm:$0xf0] }
 0x18c   :  { %v6738_v45 = vld [vmem:[#allocation7 + $0x954] sm:$0xf]  ;;  %v5593_v51 = vor.u32 %v6674_v42, %v5590_v44  ;;  %3426 = vmatpush.bf16.msra.mxu0 %v5337_v49 }
 0x18d   :  { %v5846_v47 = vld [vmem:[#allocation7 + $0x970] sm:$0xf0] }
 0x18e   :  { %v6802_v1 = vld [vmem:[#allocation7 + $0xb54] sm:$0xf]  ;;  %v5849_v53 = vor.u32 %v6738_v45, %v5846_v47  ;;  %3440 = vmatpush.bf16.msra.mxu1 %v5593_v51 }
 0x18f   :  { %v6102_v48 = vld [vmem:[#allocation7 + $0xb70] sm:$0xf0] }
 0x190   :  { %v6602_v54 = vld [vmem:[#allocation7 + $0x514] sm:$0xf]  ;;  %v6105_v62 = vor.u32 %v6802_v1, %v6102_v48  ;;  %3454 = vmatpush.bf16.msra.mxu2 %v5849_v53 }
 0x191   :  { %v5302_v3 = vld [vmem:[#allocation7 + $0x530] sm:$0xf0] }
 0x192   :  { %v6666_v52 = vld [vmem:[#allocation7 + $0x714] sm:$0xf]  ;;  %v5305_v14 = vor.u32 %v6602_v54, %v5302_v3  ;;  %3468 = vmatpush.bf16.msra.mxu3 %v6105_v62 }
 0x193   :  { %v5558_v6 = vld [vmem:[#allocation7 + $0x730] sm:$0xf0] }
 0x194   :  { %v6730_v7 = vld [vmem:[#allocation7 + $0x914] sm:$0xf]  ;;  %v5561_v4 = vor.u32 %v6666_v52, %v5558_v6  ;;  %3427 = vmatpush.bf16.msra.mxu0 %v5305_v14 }
 0x195   :  { %v5814_v9 = vld [vmem:[#allocation7 + $0x930] sm:$0xf0] }
 0x196   :  { %v6794_v10 = vld [vmem:[#allocation7 + $0xb14] sm:$0xf]  ;;  %v5817_v16 = vor.u32 %v6730_v7, %v5814_v9  ;;  %3441 = vmatpush.bf16.msra.mxu1 %v5561_v4 }
 0x197   :  { %v6070_v11 = vld [vmem:[#allocation7 + $0xb30] sm:$0xf0] }
 0x198   :  { %v6594_v17 = vld [vmem:[#allocation7 + $0x4d4] sm:$0xf]  ;;  %v6073_v24 = vor.u32 %v6794_v10, %v6070_v11  ;;  %3455 = vmatpush.bf16.msra.mxu2 %v5817_v16 }
 0x199   :  { %v5270_v18 = vld [vmem:[#allocation7 + $0x4f0] sm:$0xf0] }
 0x19a   :  { %v6658_v20 = vld [vmem:[#allocation7 + $0x6d4] sm:$0xf]  ;;  %v5273_v34 = vor.u32 %v6594_v17, %v5270_v18  ;;  %3469 = vmatpush.bf16.msra.mxu3 %v6073_v24 }
 0x19b   :  { %v5526_v28 = vld [vmem:[#allocation7 + $0x6f0] sm:$0xf0] }
 0x19c   :  { %v6722_v55 = vld [vmem:[#allocation7 + $0x8d4] sm:$0xf]  ;;  %v5529_v35 = vor.u32 %v6658_v20, %v5526_v28  ;;  %3428 = vmatpush.bf16.msra.mxu0 %v5273_v34  ;;  %v6503_v34 = vld [vmem:[#allocation7 + $0x1f4] sm:$0xf0] }
 0x19d   :  { %v5782_v57 = vld [vmem:[#allocation7 + $0x8f0] sm:$0xf0] }
 0x19e   :  { %v6786_v30 = vld [vmem:[#allocation7 + $0xad4] sm:$0xf]  ;;  %v5785_v23 = vor.u32 %v6722_v55, %v5782_v57  ;;  %3442 = vmatpush.bf16.msra.mxu1 %v5529_v35  ;;  %v5148_v35 = vld [vmem:[#allocation7 + $0x3d8] sm:$0xf] }
 0x19f   :  { %v6038_v32 = vld [vmem:[#allocation7 + $0xaf0] sm:$0xf0] }
 0x1a0   :  { %v6586_v36 = vld [vmem:[#allocation7 + $0x494] sm:$0xf]  ;;  %v6041_v42 = vor.u32 %v6786_v30, %v6038_v32  ;;  %3456 = vmatpush.bf16.msra.mxu2 %v5785_v23  ;;  %v4892_v32 = vld [vmem:[#allocation7 + $0x1d8] sm:$0xf] }
 0x1a1   :  { %v5238_v39 = vld [vmem:[#allocation7 + $0x4b0] sm:$0xf0] }
 0x1a2   :  { %v6650_v38 = vld [vmem:[#allocation7 + $0x694] sm:$0xf]  ;;  %v5241_v48 = vor.u32 %v6586_v36, %v5238_v39  ;;  %3470 = vmatpush.bf16.msra.mxu3 %v6041_v42  ;;  %v6567_v36 = vld [vmem:[#allocation7 + $0x3f4] sm:$0xf0] }
 0x1a3   :  { %v5494_v43 = vld [vmem:[#allocation7 + $0x6b0] sm:$0xf0]  ;;  %v5404_v39 = vld [vmem:[#allocation7 + $0x5d8] sm:$0xf] }
 0x1a4   :  { %v6714_v44 = vld [vmem:[#allocation7 + $0x894] sm:$0xf]  ;;  %v5497_v49 = vor.u32 %v6650_v38, %v5494_v43  ;;  %3429 = vmatpush.bf16.msra.mxu0 %v5241_v48  ;;  %v6631_v38 = vld [vmem:[#allocation7 + $0x5f4] sm:$0xf0]  ;;  %v5149_v48 = vor.u32 %v6567_v36, %v5148_v35 }
 0x1a5   :  { %v5750_v45 = vld [vmem:[#allocation7 + $0x8b0] sm:$0xf0]  ;;  %v4796_v35 = vld [vmem:[#allocation7 + $0x118] sm:$0xf] }
 0x1a6   :  { %v6778_v47 = vld [vmem:[#allocation7 + $0xa94] sm:$0xf]  ;;  %v5753_v51 = vor.u32 %v6714_v44, %v5750_v45  ;;  %3443 = vmatpush.bf16.msra.mxu1 %v5497_v49  ;;  %v5660_v44 = vld [vmem:[#allocation7 + $0x7d8] sm:$0xf]  ;;  %v5405_v49 = vor.u32 %v6631_v38, %v5404_v39 }
 0x1a7   :  { %v6006_v1 = vld [vmem:[#allocation7 + $0xab0] sm:$0xf0]  ;;  %v6695_v45 = vld [vmem:[#allocation7 + $0x7f4] sm:$0xf0] }
 0x1a8   :  { %v6578_v53 = vld [vmem:[#allocation7 + $0x454] sm:$0xf]  ;;  %v6009_v52 = vor.u32 %v6778_v47, %v6006_v1  ;;  %3457 = vmatpush.bf16.msra.mxu2 %v5753_v51  ;;  %v4893_v1 = vor.u32 %v6503_v34, %v4892_v32  ;;  %v4860_v51 = vld [vmem:[#allocation7 + $0x198] sm:$0xf] }
 0x1a9   :  { %v5206_v54 = vld [vmem:[#allocation7 + $0x470] sm:$0xf0]  ;;  %v5052_v36 = vld [vmem:[#allocation7 + $0x318] sm:$0xf] }
 0x1aa   :  { %v6642_v3 = vld [vmem:[#allocation7 + $0x654] sm:$0xf]  ;;  %v5209_v11 = vor.u32 %v6578_v53, %v5206_v54  ;;  %3471 = vmatpush.bf16.msra.mxu3 %v6009_v52  ;;  %v6495_v53 = vld [vmem:[#allocation7 + $0x1b4] sm:$0xf0] }
 0x1ab   :  { %v5462_v62 = vld [vmem:[#allocation7 + $0x670] sm:$0xf0]  ;;  %v5116_v54 = vld [vmem:[#allocation7 + $0x398] sm:$0xf] }
 0x1ac   :  { %v6706_v6 = vld [vmem:[#allocation7 + $0x854] sm:$0xf]  ;;  %v5465_v16 = vor.u32 %v6642_v3, %v5462_v62  ;;  %3430 = vmatpush.bf16.msra.mxu0 %v5209_v11  ;;  %v5661_v3 = vor.u32 %v6695_v45, %v5660_v44  ;;  %v6559_v52 = vld [vmem:[#allocation7 + $0x3b4] sm:$0xf0] }
 0x1ad   :  { %v5718_v7 = vld [vmem:[#allocation7 + $0x870] sm:$0xf0]  ;;  %v5372_v62 = vld [vmem:[#allocation7 + $0x598] sm:$0xf]  ;;  %v5117_v11 = vor.u32 %v6559_v52, %v5116_v54 }
 0x1ae   :  { %v6770_v9 = vld [vmem:[#allocation7 + $0xa54] sm:$0xf]  ;;  %v5721_v17 = vor.u32 %v6706_v6, %v5718_v7  ;;  %3444 = vmatpush.bf16.msra.mxu1 %v5465_v16  ;;  %v6623_v6 = vld [vmem:[#allocation7 + $0x5b4] sm:$0xf0] }
 0x1af   :  { %v5974_v10 = vld [vmem:[#allocation7 + $0xa70] sm:$0xf0]  ;;  %v5628_v7 = vld [vmem:[#allocation7 + $0x798] sm:$0xf] }
 0x1b0   :  { %v6570_v14 = vld [vmem:[#allocation7 + $0x414] sm:$0xf]  ;;  %v5977_v28 = vor.u32 %v6770_v9, %v5974_v10  ;;  %3458 = vmatpush.bf16.msra.mxu2 %v5721_v17  ;;  %v6687_v9 = vld [vmem:[#allocation7 + $0x7b4] sm:$0xf0]  ;;  %v4861_v10 = vor.u32 %v6495_v53, %v4860_v51 }
 0x1b1   :  { %v5174_v4 = vld [vmem:[#allocation7 + $0x430] sm:$0xf0]  ;;  %v6487_v16 = vld [vmem:[#allocation7 + $0x174] sm:$0xf0] }
 0x1b2   :  { %v6634_v18 = vld [vmem:[#allocation7 + $0x614] sm:$0xf]  ;;  %v5177_v23 = vor.u32 %v6570_v14, %v5174_v4  ;;  %3472 = vmatpush.bf16.msra.mxu3 %v5977_v28  ;;  %v5373_v14 = vor.u32 %v6623_v6, %v5372_v62  ;;  %v4828_v4 = vld [vmem:[#allocation7 + $0x158] sm:$0xf] }
 0x1b3   :  { %v5430_v20 = vld [vmem:[#allocation7 + $0x630] sm:$0xf0]  ;;  %v5084_v17 = vld [vmem:[#allocation7 + $0x358] sm:$0xf] }
 0x1b4   :  { %v6698_v24 = vld [vmem:[#allocation7 + $0x814] sm:$0xf]  ;;  %v5433_v42 = vor.u32 %v6634_v18, %v5430_v20  ;;  %3431 = vmatpush.bf16.msra.mxu0 %v5177_v23  ;;  %v5629_v18 = vor.u32 %v6687_v9, %v5628_v7  ;;  %v6551_v20 = vld [vmem:[#allocation7 + $0x374] sm:$0xf0] }
 0x1b5   :  { %v5686_v55 = vld [vmem:[#allocation7 + $0x830] sm:$0xf0]  ;;  %v6615_v28 = vld [vmem:[#allocation7 + $0x574] sm:$0xf0]  ;;  %v5085_v32 = vor.u32 %v6551_v20, %v5084_v17 }
 0x1b6   :  { %v6762_v57 = vld [vmem:[#allocation7 + $0xa14] sm:$0xf]  ;;  %v5689_v43 = vor.u32 %v6698_v24, %v5686_v55  ;;  %3445 = vmatpush.bf16.msra.mxu1 %v5433_v42  ;;  %v5340_v24 = vld [vmem:[#allocation7 + $0x558] sm:$0xf] }
 0x1b7   :  { %v5942_v30 = vld [vmem:[#allocation7 + $0xa30] sm:$0xf0]  ;;  %3432 = vmatmul.bf16.vlgmr.msra.gmra.mxu0 %v7262_v60  ;;  %v5596_v55 = vld [vmem:[#allocation7 + $0x758] sm:$0xf]  ;;  %v5341_v34 = vor.u32 %v6615_v28, %v5340_v24 }
 0x1b8   :  { %v5945_v47 = vor.u32 %v6762_v57, %v5942_v30  ;;  %3459 = vmatpush.bf16.msra.mxu2 %v5689_v43  ;;  %3480 = vmatpush.bf16.msrb.mxu0 %v4893_v1  ;;  %v6679_v57 = vld [vmem:[#allocation7 + $0x774] sm:$0xf0]  ;;  %v4829_v30 = vor.u32 %v6487_v16, %v4828_v4 }
 0x1b9   :  { %3446 = vmatmul.bf16.vlgmr.msra.gmra.mxu1 %v7266_v0  ;;  %v6479_v23 = vld [vmem:[#allocation7 + $0x134] sm:$0xf0]  ;;  %v5597_v39 = vor.u32 %v6679_v57, %v5596_v55 }
 0x1ba   :  { %3473 = vmatpush.bf16.msra.mxu3 %v5945_v47  ;;  %3494 = vmatpush.bf16.msrb.mxu1 %v5149_v48  ;;  %v6543_v38 = vld [vmem:[#allocation7 + $0x334] sm:$0xf0]  ;;  %v4797_v47 = vor.u32 %v6479_v23, %v4796_v35 }
 0x1bb   :  { %3460 = vmatmul.bf16.vlgmr.msra.gmra.mxu2 %v7272_v37  ;;  %v5308_v42 = vld [vmem:[#allocation7 + $0x518] sm:$0xf]  ;;  %v5053_v1 = vor.u32 %v6543_v38, %v5052_v36 }
 0x1bc   :  { %3508 = vmatpush.bf16.msrb.mxu2 %v5405_v49  ;;  %3481 = vmatpush.bf16.msrb.mxu0 %v4861_v10  ;;  %v6607_v43 = vld [vmem:[#allocation7 + $0x534] sm:$0xf0] }
 0x1bd   :  { %3474 = vmatmul.bf16.vlgmr.msra.gmra.mxu3 %v7274_v41  ;;  %v5564_v44 = vld [vmem:[#allocation7 + $0x718] sm:$0xf]  ;;  %v5309_v48 = vor.u32 %v6607_v43, %v5308_v42 }
 0x1be   :  { %3522 = vmatpush.bf16.msrb.mxu3 %v5661_v3  ;;  %3495 = vmatpush.bf16.msrb.mxu1 %v5117_v11  ;;  %v6671_v45 = vld [vmem:[#allocation7 + $0x734] sm:$0xf0] }
 0x1bf   :  { %v4764_v49 = vld [vmem:[#allocation7 + $0xd8] sm:$0xf]  ;;  %v5565_v54 = vor.u32 %v6671_v45, %v5564_v44 }
 0x1c0   :  { %3509 = vmatpush.bf16.msrb.mxu2 %v5373_v14  ;;  %3482 = vmatpush.bf16.msrb.mxu0 %v4829_v30  ;;  %v6471_v51 = vld [vmem:[#allocation7 + $0xf4] sm:$0xf0] }
 0x1c1   :  { %v5020_v53 = vld [vmem:[#allocation7 + $0x2d8] sm:$0xf]  ;;  %v4765_v9 = vor.u32 %v6471_v51, %v4764_v49 }
 0x1c2   :  { %3523 = vmatpush.bf16.msrb.mxu3 %v5629_v18  ;;  %3496 = vmatpush.bf16.msrb.mxu1 %v5085_v32  ;;  %v6535_v3 = vld [vmem:[#allocation7 + $0x2f4] sm:$0xf0] }
 0x1c3   :  { %v5276_v52 = vld [vmem:[#allocation7 + $0x4d8] sm:$0xf]  ;;  %v5021_v10 = vor.u32 %v6535_v3, %v5020_v53 }
 0x1c4   :  { %3510 = vmatpush.bf16.msrb.mxu2 %v5341_v34  ;;  %v6599_v62 = vld [vmem:[#allocation7 + $0x4f4] sm:$0xf0]  ;;  %3483 = vmatpush.bf16.msrb.mxu0 %v4797_v47 }
 0x1c5   :  { %v5532_v6 = vld [vmem:[#allocation7 + $0x6d8] sm:$0xf]  ;;  %v5277_v11 = vor.u32 %v6599_v62, %v5276_v52 }
 0x1c6   :  { %3524 = vmatpush.bf16.msrb.mxu3 %v5597_v39  ;;  %v6663_v7 = vld [vmem:[#allocation7 + $0x6f4] sm:$0xf0]  ;;  %3497 = vmatpush.bf16.msrb.mxu1 %v5053_v1 }
 0x1c7   :  { %v4732_v14 = vld [vmem:[#allocation7 + $0x98] sm:$0xf]  ;;  %v5533_v17 = vor.u32 %v6663_v7, %v5532_v6 }
 0x1c8   :  { %3511 = vmatpush.bf16.msrb.mxu2 %v5309_v48  ;;  %v6463_v4 = vld [vmem:[#allocation7 + $0xb4] sm:$0xf0]  ;;  %3484 = vmatpush.bf16.msrb.mxu0 %v4765_v9 }
 0x1c9   :  { %v4988_v16 = vld [vmem:[#allocation7 + $0x298] sm:$0xf]  ;;  %v4733_v57 = vor.u32 %v6463_v4, %v4732_v14  ;;  %v6499_v4 = vld [vmem:[#allocation7 + $0x1dc] sm:$0xf] }
 0x1ca   :  { %3525 = vmatpush.bf16.msrb.mxu3 %v5565_v54  ;;  %v6527_v18 = vld [vmem:[#allocation7 + $0x2b4] sm:$0xf0]  ;;  %3498 = vmatpush.bf16.msrb.mxu1 %v5021_v10 }
 0x1cb   :  { %v5244_v20 = vld [vmem:[#allocation7 + $0x498] sm:$0xf]  ;;  %v4989_v30 = vor.u32 %v6527_v18, %v4988_v16  ;;  %v4894_v16 = vld [vmem:[#allocation7 + $0x1f8] sm:$0xf0] }
 0x1cc   :  { %v6591_v24 = vld [vmem:[#allocation7 + $0x4b4] sm:$0xf0]  ;;  %3512 = vmatpush.bf16.msrb.mxu2 %v5277_v11  ;;  %3485 = vmatpush.bf16.msrb.mxu0 %v4733_v57 }
 0x1cd   :  { %v5500_v28 = vld [vmem:[#allocation7 + $0x698] sm:$0xf]  ;;  %v5245_v32 = vor.u32 %v6591_v24, %v5244_v20  ;;  %v6563_v20 = vld [vmem:[#allocation7 + $0x3dc] sm:$0xf] }
 0x1ce   :  { %v6655_v55 = vld [vmem:[#allocation7 + $0x6b4] sm:$0xf0]  ;;  %3526 = vmatpush.bf16.msrb.mxu3 %v5533_v17  ;;  %3499 = vmatpush.bf16.msrb.mxu1 %v4989_v30  ;;  %v5150_v24 = vld [vmem:[#allocation7 + $0x3f8] sm:$0xf0]  ;;  %v4897_v30 = vor.u32 %v6499_v4, %v4894_v16 }
 0x1cf   :  { %v4700_v34 = vld [vmem:[#allocation7 + $0x58] sm:$0xf]  ;;  %v5501_v36 = vor.u32 %v6655_v55, %v5500_v28 }
 0x1d0   :  { %v6455_v35 = vld [vmem:[#allocation7 + $0x74] sm:$0xf0]  ;;  %3513 = vmatpush.bf16.msrb.mxu2 %v5245_v32 }
 0x1d1   :  { %v4956_v23 = vld [vmem:[#allocation7 + $0x258] sm:$0xf]  ;;  %v4701_v45 = vor.u32 %v6455_v35, %v4700_v34 }
 0x1d2   :  { %v6519_v39 = vld [vmem:[#allocation7 + $0x274] sm:$0xf0]  ;;  %3527 = vmatpush.bf16.msrb.mxu3 %v5501_v36 }
 0x1d3   :  { %v5212_v38 = vld [vmem:[#allocation7 + $0x458] sm:$0xf]  ;;  %v4957_v48 = vor.u32 %v6519_v39, %v4956_v23  ;;  %3486 = vmatpush.bf16.msrb.mxu0 %v4701_v45  ;;  %v5153_v23 = vor.u32 %v6563_v20, %v5150_v24  ;;  %v6491_v39 = vld [vmem:[#allocation7 + $0x19c] sm:$0xf]  ;;  %v7369_v20 = vpop.f32.mrf.mxu0 }
 0x1d4   :  { %v6583_v42 = vld [vmem:[#allocation7 + $0x474] sm:$0xf0]  ;;  %v6539_v24 = vld [vmem:[#allocation7 + $0x31c] sm:$0xf] }
 0x1d5   :  { %v5468_v43 = vld [vmem:[#allocation7 + $0x658] sm:$0xf]  ;;  %v5213_v49 = vor.u32 %v6583_v42, %v5212_v38  ;;  %3500 = vmatpush.bf16.msrb.mxu1 %v4957_v48  ;;  %v4862_v38 = vld [vmem:[#allocation7 + $0x1b8] sm:$0xf0] }
 0x1d6   :  { %v6647_v44 = vld [vmem:[#allocation7 + $0x674] sm:$0xf0]  ;;  %v6555_v42 = vld [vmem:[#allocation7 + $0x39c] sm:$0xf] }
 0x1d7   :  { %v4668_v47 = vld [vmem:[#allocation7 + $0x18] sm:$0xf]  ;;  %v5469_v3 = vor.u32 %v6647_v44, %v5468_v43  ;;  %3514 = vmatpush.bf16.msrb.mxu2 %v5213_v49  ;;  %v5118_v43 = vld [vmem:[#allocation7 + $0x3b8] sm:$0xf0] }
 0x1d8   :  { %v6447_v1 = vld [vmem:[#allocation7 + $0x34] sm:$0xf0] }
 0x1d9   :  { %v4924_v51 = vld [vmem:[#allocation7 + $0x218] sm:$0xf]  ;;  %v4669_v11 = vor.u32 %v6447_v1, %v4668_v47  ;;  %3528 = vmatpush.bf16.msrb.mxu3 %v5469_v3  ;;  %v4865_v47 = vor.u32 %v6491_v39, %v4862_v38  ;;  %v4830_v3 = vld [vmem:[#allocation7 + $0x178] sm:$0xf0] }
 0x1da   :  { %v6511_v53 = vld [vmem:[#allocation7 + $0x234] sm:$0xf0]  ;;  %v6467_v38 = vld [vmem:[#allocation7 + $0xdc] sm:$0xf] }
 0x1db   :  { %v5180_v54 = vld [vmem:[#allocation7 + $0x418] sm:$0xf]  ;;  %v4925_v17 = vor.u32 %v6511_v53, %v4924_v51  ;;  %3487 = vmatpush.bf16.msrb.mxu0 %v4669_v11  ;;  %v5121_v51 = vor.u32 %v6555_v42, %v5118_v43  ;;  %v4766_v42 = vld [vmem:[#allocation7 + $0xf8] sm:$0xf0] }
 0x1dc   :  { %v6575_v52 = vld [vmem:[#allocation7 + $0x434] sm:$0xf0]  ;;  %v6531_v43 = vld [vmem:[#allocation7 + $0x2dc] sm:$0xf] }
 0x1dd   :  { %v5436_v62 = vld [vmem:[#allocation7 + $0x618] sm:$0xf]  ;;  %v5181_v18 = vor.u32 %v6575_v52, %v5180_v54  ;;  %3501 = vmatpush.bf16.msrb.mxu1 %v4925_v17  ;;  %v6483_v54 = vld [vmem:[#allocation7 + $0x15c] sm:$0xf] }
 0x1de   :  { %v6639_v6 = vld [vmem:[#allocation7 + $0x634] sm:$0xf0]  ;;  %3488 = vmatmul.bf16.vlgmr.msrb.gmra.mxu0 %v7260_v56  ;;  %v6547_v52 = vld [vmem:[#allocation7 + $0x35c] sm:$0xf] }
 0x1df   :  { %v5916_v7 = vld [vmem:[#allocation7 + $0x9d8] sm:$0xf]  ;;  %v5437_v28 = vor.u32 %v6639_v6, %v5436_v62  ;;  %3515 = vmatpush.bf16.msrb.mxu2 %v5181_v18  ;;  %v5086_v62 = vld [vmem:[#allocation7 + $0x378] sm:$0xf0] }
 0x1e0   :  { %v6759_v9 = vld [vmem:[#allocation7 + $0x9f4] sm:$0xf0]  ;;  %3502 = vmatmul.bf16.vlgmr.msrb.gmra.mxu1 %v7264_v61  ;;  %v5089_v4 = vor.u32 %v6547_v52, %v5086_v62  ;;  %v6475_v17 = vld [vmem:[#allocation7 + $0x11c] sm:$0xf] }
 0x1e1   :  { %v6172_v10 = vld [vmem:[#allocation7 + $0xbd8] sm:$0xf]  ;;  %v5917_v55 = vor.u32 %v6759_v9, %v5916_v7  ;;  %3529 = vmatpush.bf16.msrb.mxu3 %v5437_v28  ;;  %v4833_v9 = vor.u32 %v6483_v54, %v4830_v3  ;;  %v4798_v18 = vld [vmem:[#allocation7 + $0x138] sm:$0xf0] }
 0x1e2   :  { %v6823_v14 = vld [vmem:[#allocation7 + $0xbf4] sm:$0xf0]  ;;  %3516 = vmatmul.bf16.vlgmr.msrb.gmra.mxu2 %v7262_v60  ;;  %v5054_v28 = vld [vmem:[#allocation7 + $0x338] sm:$0xf0] }
 0x1e3   :  { %v6173_v57 = vor.u32 %v6823_v14, %v6172_v10  ;;  %v5884_v32 = vld [vmem:[#allocation7 + $0x998] sm:$0xf]  ;;  %3536 = vmatpush.bf16.msra.mxu0 %v5917_v55  ;;  %3564 = vmatpush.bf16.msra.mxu2 %v4897_v30  ;;  %v7371_v55 = vpop.f32.mrf.mxu1  ;;  %v6459_v52 = vld [vmem:[#allocation7 + $0x9c] sm:$0xf] }
 0x1e4   :  { %v6751_v34 = vld [vmem:[#allocation7 + $0x9b4] sm:$0xf0]  ;;  %3530 = vmatmul.bf16.vlgmr.msrb.gmra.mxu3 %v7266_v0  ;;  %v4734_v62 = vld [vmem:[#allocation7 + $0xb8] sm:$0xf0] }
 0x1e5   :  { %v6140_v35 = vld [vmem:[#allocation7 + $0xb98] sm:$0xf]  ;;  %v5885_v44 = vor.u32 %v6751_v34, %v5884_v32  ;;  %3550 = vmatpush.bf16.msra.mxu1 %v6173_v57  ;;  %3578 = vmatpush.bf16.msra.mxu3 %v5153_v23  ;;  %v4801_v32 = vor.u32 %v6475_v17, %v4798_v18 }
 0x1e6   :  { %v6815_v36 = vld [vmem:[#allocation7 + $0xbb4] sm:$0xf0] }
 0x1e7   :  { %v6141_v45 = vor.u32 %v6815_v36, %v6140_v35  ;;  %v5852_v1 = vld [vmem:[#allocation7 + $0x958] sm:$0xf]  ;;  %3537 = vmatpush.bf16.msra.mxu0 %v5885_v44  ;;  %3565 = vmatpush.bf16.msra.mxu2 %v4865_v47  ;;  %v5057_v36 = vor.u32 %v6539_v24, %v5054_v28  ;;  %v5022_v44 = vld [vmem:[#allocation7 + $0x2f8] sm:$0xf0] }
 0x1e8   :  { %v6743_v48 = vld [vmem:[#allocation7 + $0x974] sm:$0xf0]  ;;  %v5025_v54 = vor.u32 %v6531_v43, %v5022_v44 }
 0x1e9   :  { %v6108_v49 = vld [vmem:[#allocation7 + $0xb58] sm:$0xf]  ;;  %v5853_v6 = vor.u32 %v6743_v48, %v5852_v1  ;;  %3551 = vmatpush.bf16.msra.mxu1 %v6141_v45  ;;  %3579 = vmatpush.bf16.msra.mxu3 %v5121_v51  ;;  %v4769_v1 = vor.u32 %v6467_v38, %v4766_v42 }
 0x1ea   :  { %v6807_v53 = vld [vmem:[#allocation7 + $0xb74] sm:$0xf0] }
 0x1eb   :  { %v6109_v7 = vor.u32 %v6807_v53, %v6108_v49  ;;  %v5820_v10 = vld [vmem:[#allocation7 + $0x918] sm:$0xf]  ;;  %3538 = vmatpush.bf16.msra.mxu0 %v5853_v6  ;;  %3566 = vmatpush.bf16.msra.mxu2 %v4833_v9  ;;  %v7373_v53 = vpop.f32.mrf.mxu2  ;;  %v7375_v6 = vpop.f32.mrf.mxu3  ;;  %v4990_v9 = vld [vmem:[#allocation7 + $0x2b8] sm:$0xf0] }
 0x1ec   :  { %v6735_v11 = vld [vmem:[#allocation7 + $0x934] sm:$0xf0]  ;;  %v7379_v24 = vpop.f32.mrf.mxu1 }
 0x1ed   :  { %v6076_v14 = vld [vmem:[#allocation7 + $0xb18] sm:$0xf]  ;;  %v5821_v57 = vor.u32 %v6735_v11, %v5820_v10  ;;  %3552 = vmatpush.bf16.msra.mxu1 %v6109_v7  ;;  %3580 = vmatpush.bf16.msra.mxu3 %v5089_v4  ;;  %v6523_v7 = vld [vmem:[#allocation7 + $0x29c] sm:$0xf]  ;;  %v7377_v11 = vpop.f32.mrf.mxu0  ;;  %v4737_v4 = vor.u32 %v6459_v52, %v4734_v62 }
 0x1ee   :  { %v6799_v16 = vld [vmem:[#allocation7 + $0xb34] sm:$0xf0]  ;;  %v4993_v28 = vor.u32 %v6523_v7, %v4990_v9  ;;  %v5662_v7 = vld [vmem:[#allocation7 + $0x7f8] sm:$0xf0] }
 0x1ef   :  { %v6077_v30 = vor.u32 %v6799_v16, %v6076_v14  ;;  %v5788_v34 = vld [vmem:[#allocation7 + $0x8d8] sm:$0xf]  ;;  %3539 = vmatpush.bf16.msra.mxu0 %v5821_v57  ;;  %3567 = vmatpush.bf16.msra.mxu2 %v4801_v32  ;;  %v4702_v32 = vld [vmem:[#allocation7 + $0x78] sm:$0xf0] }
 0x1f0   :  { %v6727_v35 = vld [vmem:[#allocation7 + $0x8f4] sm:$0xf0]  ;;  %v6755_v9 = vld [vmem:[#allocation7 + $0x9dc] sm:$0xf] }
 0x1f1   :  { %v6044_v23 = vld [vmem:[#allocation7 + $0xad8] sm:$0xf]  ;;  %v5789_v45 = vor.u32 %v6727_v35, %v5788_v34  ;;  %3553 = vmatpush.bf16.msra.mxu1 %v6077_v30  ;;  %3581 = vmatpush.bf16.msra.mxu3 %v5057_v36  ;;  %v6451_v30 = vld [vmem:[#allocation7 + $0x5c] sm:$0xf] }
 0x1f2   :  { %v6791_v39 = vld [vmem:[#allocation7 + $0xaf4] sm:$0xf0]  ;;  %v6515_v34 = vld [vmem:[#allocation7 + $0x25c] sm:$0xf]  ;;  %v4705_v42 = vor.u32 %v6451_v30, %v4702_v32 }
 0x1f3   :  { %v6045_v47 = vor.u32 %v6791_v39, %v6044_v23  ;;  %v5756_v48 = vld [vmem:[#allocation7 + $0x898] sm:$0xf]  ;;  %3540 = vmatpush.bf16.msra.mxu0 %v5789_v45  ;;  %3568 = vmatpush.bf16.msra.mxu2 %v4769_v1  ;;  %v4958_v35 = vld [vmem:[#allocation7 + $0x278] sm:$0xf0]  ;;  %v7381_v52 = vpop.f32.mrf.mxu2 }
 0x1f4   :  { %v6719_v49 = vld [vmem:[#allocation7 + $0x8b4] sm:$0xf0]  ;;  %v6443_v45 = vld [vmem:[#allocation7 + $0x1c] sm:$0xf] }
 0x1f5   :  { %v6012_v51 = vld [vmem:[#allocation7 + $0xa98] sm:$0xf]  ;;  %v5757_v10 = vor.u32 %v6719_v49, %v5756_v48  ;;  %3554 = vmatpush.bf16.msra.mxu1 %v6045_v47  ;;  %3582 = vmatpush.bf16.msra.mxu3 %v5025_v54  ;;  %v4961_v47 = vor.u32 %v6515_v34, %v4958_v35  ;;  %v4670_v1 = vld [vmem:[#allocation7 + $0x38] sm:$0xf0] }
 0x1f6   :  { %v6783_v3 = vld [vmem:[#allocation7 + $0xab4] sm:$0xf0]  ;;  %v6507_v48 = vld [vmem:[#allocation7 + $0x21c] sm:$0xf] }
 0x1f7   :  { %v6013_v14 = vor.u32 %v6783_v3, %v6012_v51  ;;  %v5724_v16 = vld [vmem:[#allocation7 + $0x858] sm:$0xf]  ;;  %3541 = vmatpush.bf16.msra.mxu0 %v5757_v10  ;;  %3569 = vmatpush.bf16.msra.mxu2 %v4737_v4  ;;  %v4926_v49 = vld [vmem:[#allocation7 + $0x238] sm:$0xf0]  ;;  %v7385_v4 = vpop.f32.mrf.mxu0 }
 0x1f8   :  { %v6711_v17 = vld [vmem:[#allocation7 + $0x874] sm:$0xf0]  ;;  %v6627_v51 = vld [vmem:[#allocation7 + $0x5dc] sm:$0xf]  ;;  %v4929_v30 = vor.u32 %v6507_v48, %v4926_v49 }
 0x1f9   :  { %v5980_v18 = vld [vmem:[#allocation7 + $0xa58] sm:$0xf]  ;;  %v5725_v23 = vor.u32 %v6711_v17, %v5724_v16  ;;  %3555 = vmatpush.bf16.msra.mxu1 %v6013_v14  ;;  %3583 = vmatpush.bf16.msra.mxu3 %v4993_v28  ;;  %v5406_v54 = vld [vmem:[#allocation7 + $0x5f8] sm:$0xf0]  ;;  %v7383_v14 = vpop.f32.mrf.mxu3  ;;  %v4673_v17 = vor.u32 %v6443_v45, %v4670_v1 }
 0x1fa   :  { %v6775_v57 = vld [vmem:[#allocation7 + $0xa74] sm:$0xf0]  ;;  %v6691_v3 = vld [vmem:[#allocation7 + $0x7dc] sm:$0xf]  ;;  %v5409_v32 = vor.u32 %v6627_v51, %v5406_v54 }
 0x1fb   :  { %v5692_v36 = vld [vmem:[#allocation7 + $0x818] sm:$0xf]  ;;  %v5981_v38 = vor.u32 %v6775_v57, %v5980_v18  ;;  %3542 = vmatpush.bf16.msra.mxu0 %v5725_v23  ;;  %v5918_v10 = vld [vmem:[#allocation7 + $0x9f8] sm:$0xf0]  ;;  %3570 = vmatpush.bf16.msra.mxu2 %v4705_v42  ;;  %v7387_v57 = vpop.f32.mrf.mxu1  ;;  %v5665_v34 = vor.u32 %v6691_v3, %v5662_v7  ;;  %v7389_v51 = vpop.f32.mrf.mxu2 }
 0x1fc   :  { %v6703_v39 = vld [vmem:[#allocation7 + $0x834] sm:$0xf0]  ;;  %v6819_v18 = vld [vmem:[#allocation7 + $0xbdc] sm:$0xf]  ;;  %v5921_v35 = vor.u32 %v6755_v9, %v5918_v10 }
 0x1fd   :  { %v5948_v43 = vld [vmem:[#allocation7 + $0xa18] sm:$0xf]  ;;  %v5693_v62 = vor.u32 %v6703_v39, %v5692_v36  ;;  %3556 = vmatpush.bf16.msra.mxu1 %v5981_v38  ;;  %v6174_v28 = vld [vmem:[#allocation7 + $0xbf8] sm:$0xf0]  ;;  %3584 = vmatpush.bf16.msra.mxu3 %v4961_v47 }
 0x1fe   :  { %v6767_v44 = vld [vmem:[#allocation7 + $0xa34] sm:$0xf0]  ;;  %v6619_v23 = vld [vmem:[#allocation7 + $0x59c] sm:$0xf]  ;;  %v6177_v25 = vor.u32 %v6819_v18, %v6174_v28 }
 0x1ff   :  { %v5949_v16 = vor.u32 %v6767_v44, %v5948_v43  ;;  %v5374_v36 = vld [vmem:[#allocation7 + $0x5b8] sm:$0xf0]  ;;  %3543 = vmatpush.bf16.msra.mxu0 %v5693_v62  ;;  %3571 = vmatpush.bf16.msra.mxu2 %v4673_v17 }
 0x200   :  { %v6683_v39 = vld [vmem:[#allocation7 + $0x79c] sm:$0xf]  ;;  %v5377_v44 = vor.u32 %v6619_v23, %v5374_v36 }
 0x201   :  { %v5886_v38 = vld [vmem:[#allocation7 + $0x9b8] sm:$0xf0]  ;;  %3557 = vmatpush.bf16.msra.mxu1 %v5949_v16  ;;  %3585 = vmatpush.bf16.msra.mxu3 %v4929_v30  ;;  %v5633_v45 = vor.u32 %v6683_v39, %v5630_v46  ;;  %v7392_v9 = vpop.f32.mrf.mxu3  ;;  %v7397_v16 = vpop.f32.mrf.mxu0 }
 0x202   :  { %v6811_v42 = vld [vmem:[#allocation7 + $0xb9c] sm:$0xf]  ;;  %v5889_v47 = vor.u32 %v6747_v21, %v5886_v38  ;;  %3544 = vmatmul.bf16.vlgmr.msra.gmra.mxu0 %v7272_v37  ;;  %3572 = vmatmul.bf16.vlgmr.msra.gmra.mxu2 %v7260_v56 }
 0x203   :  { %v6142_v43 = vld [vmem:[#allocation7 + $0xbb8] sm:$0xf0]  ;;  %3592 = vmatpush.bf16.msrb.mxu0 %v5409_v32  ;;  %3620 = vmatpush.bf16.msrb.mxu2 %v5921_v35  ;;  %v7399_v32 = vpop.f32.mrf.mxu1 }
 0x204   :  { %v6611_v1 = vld [vmem:[#allocation7 + $0x55c] sm:$0xf]  ;;  %v6145_v54 = vor.u32 %v6811_v42, %v6142_v43  ;;  %3558 = vmatmul.bf16.vlgmr.msra.gmra.mxu1 %v7274_v41  ;;  %3586 = vmatmul.bf16.vlgmr.msra.gmra.mxu3 %v7264_v61 }
 0x205   :  { %3606 = vmatpush.bf16.msrb.mxu1 %v5665_v34  ;;  %v5342_v48 = vld [vmem:[#allocation7 + $0x578] sm:$0xf0]  ;;  %3634 = vmatpush.bf16.msrb.mxu3 %v6177_v25 }
 0x206   :  { %v6675_v49 = vld [vmem:[#allocation7 + $0x75c] sm:$0xf]  ;;  %v5345_v10 = vor.u32 %v6611_v1, %v5342_v48 }
 0x207   :  { %v5598_v3 = vld [vmem:[#allocation7 + $0x778] sm:$0xf0]  ;;  %3593 = vmatpush.bf16.msrb.mxu0 %v5377_v44  ;;  %3621 = vmatpush.bf16.msrb.mxu2 %v5889_v47 }
 0x208   :  { %v6739_v62 = vld [vmem:[#allocation7 + $0x95c] sm:$0xf]  ;;  %v5601_v25 = vor.u32 %v6675_v49, %v5598_v3 }
 0x209   :  { %v5854_v7 = vld [vmem:[#allocation7 + $0x978] sm:$0xf0]  ;;  %3607 = vmatpush.bf16.msrb.mxu1 %v5633_v45  ;;  %3635 = vmatpush.bf16.msrb.mxu3 %v6145_v54 }
 0x20a   :  { %v6803_v46 = vld [vmem:[#allocation7 + $0xb5c] sm:$0xf]  ;;  %v5857_v17 = vor.u32 %v6739_v62, %v5854_v7  ;;  %v7401_v62 = vpop.f32.mrf.mxu2 }
 0x20b   :  { %v6110_v21 = vld [vmem:[#allocation7 + $0xb78] sm:$0xf0]  ;;  %3594 = vmatpush.bf16.msrb.mxu0 %v5345_v10 }
 0x20c   :  { %v6603_v18 = vld [vmem:[#allocation7 + $0x51c] sm:$0xf]  ;;  %v6113_v56 = vor.u32 %v6803_v46, %v6110_v21  ;;  %3622 = vmatpush.bf16.msrb.mxu2 %v5857_v17  ;;  %v7403_v46 = vpop.f32.mrf.mxu3  ;;  %v7405_v21 = vpop.f32.mrf.mxu0 }
 0x20d   :  { %v5310_v28 = vld [vmem:[#allocation7 + $0x538] sm:$0xf0]  ;;  %3608 = vmatpush.bf16.msrb.mxu1 %v5601_v25 }
 0x20e   :  { %v6667_v30 = vld [vmem:[#allocation7 + $0x71c] sm:$0xf]  ;;  %v5313_v39 = vor.u32 %v6603_v18, %v5310_v28  ;;  %3636 = vmatpush.bf16.msrb.mxu3 %v6113_v56 }
 0x20f   :  { %v5566_v34 = vld [vmem:[#allocation7 + $0x738] sm:$0xf0] }
 0x210   :  { %v6731_v35 = vld [vmem:[#allocation7 + $0x91c] sm:$0xf]  ;;  %v5569_v38 = vor.u32 %v6667_v30, %v5566_v34  ;;  %3595 = vmatpush.bf16.msrb.mxu0 %v5313_v39  ;;  %v7407_v30 = vpop.f32.mrf.mxu1 }
 0x211   :  { %v5822_v23 = vld [vmem:[#allocation7 + $0x938] sm:$0xf0] }
 0x212   :  { %v6795_v36 = vld [vmem:[#allocation7 + $0xb1c] sm:$0xf]  ;;  %v5825_v42 = vor.u32 %v6731_v35, %v5822_v23  ;;  %3609 = vmatpush.bf16.msrb.mxu1 %v5569_v38  ;;  %v7409_v40 = vpop.f32.mrf.mxu2 }
 0x213   :  { %v6078_v61 = vld [vmem:[#allocation7 + $0xb38] sm:$0xf0] }
 0x214   :  { %v6595_v43 = vld [vmem:[#allocation7 + $0x4dc] sm:$0xf]  ;;  %v6081_v47 = vor.u32 %v6795_v36, %v6078_v61  ;;  %3623 = vmatpush.bf16.msrb.mxu2 %v5825_v42 }
 0x215   :  { %v5278_v44 = vld [vmem:[#allocation7 + $0x4f8] sm:$0xf0] }
 0x216   :  { %v6659_v45 = vld [vmem:[#allocation7 + $0x6dc] sm:$0xf]  ;;  %v5281_v7 = vor.u32 %v6595_v43, %v5278_v44  ;;  %3637 = vmatpush.bf16.msrb.mxu3 %v6081_v47 }
 0x217   :  { %v5534_v1 = vld [vmem:[#allocation7 + $0x6f8] sm:$0xf0] }
 0x218   :  { %v6723_v48 = vld [vmem:[#allocation7 + $0x8dc] sm:$0xf]  ;;  %v5537_v10 = vor.u32 %v6659_v45, %v5534_v1  ;;  %3596 = vmatpush.bf16.msrb.mxu0 %v5281_v7  ;;  %v7411_v7 = vpop.f32.mrf.mxu3  ;;  %v7413_v5 = vpop.f32.mrf.mxu1 }
 0x219   :  { %v5790_v49 = vld [vmem:[#allocation7 + $0x8f8] sm:$0xf0] }
 0x21a   :  { %v6787_v54 = vld [vmem:[#allocation7 + $0xadc] sm:$0xf]  ;;  %v5793_v25 = vor.u32 %v6723_v48, %v5790_v49  ;;  %3610 = vmatpush.bf16.msrb.mxu1 %v5537_v10 }
 0x21b   :  { %v6046_v3 = vld [vmem:[#allocation7 + $0xaf8] sm:$0xf0] }
 0x21c   :  { %v6587_v17 = vld [vmem:[#allocation7 + $0x49c] sm:$0xf]  ;;  %v6049_v56 = vor.u32 %v6787_v54, %v6046_v3  ;;  %3624 = vmatpush.bf16.msrb.mxu2 %v5793_v25 }
 0x21d   :  { %v5246_v18 = vld [vmem:[#allocation7 + $0x4b8] sm:$0xf0] }
 0x21e   :  { %v6651_v28 = vld [vmem:[#allocation7 + $0x69c] sm:$0xf]  ;;  %v5249_v39 = vor.u32 %v6587_v17, %v5246_v18  ;;  %3638 = vmatpush.bf16.msrb.mxu3 %v6049_v56 }
 0x21f   :  { %v5502_v34 = vld [vmem:[#allocation7 + $0x6b8] sm:$0xf0] }
 0x220   :  { %v6715_v35 = vld [vmem:[#allocation7 + $0x89c] sm:$0xf]  ;;  %v5505_v38 = vor.u32 %v6651_v28, %v5502_v34  ;;  %3597 = vmatpush.bf16.msrb.mxu0 %v5249_v39 }
 0x221   :  { %v5758_v23 = vld [vmem:[#allocation7 + $0x8b8] sm:$0xf0] }
 0x222   :  { %v6779_v36 = vld [vmem:[#allocation7 + $0xa9c] sm:$0xf]  ;;  %v5761_v42 = vor.u32 %v6715_v35, %v5758_v23  ;;  %3611 = vmatpush.bf16.msrb.mxu1 %v5505_v38 }
 0x223   :  { %v6014_v61 = vld [vmem:[#allocation7 + $0xab8] sm:$0xf0] }
 0x224   :  { %v6579_v43 = vld [vmem:[#allocation7 + $0x45c] sm:$0xf]  ;;  %v6017_v1 = vor.u32 %v6779_v36, %v6014_v61  ;;  %3625 = vmatpush.bf16.msrb.mxu2 %v5761_v42  ;;  %v3267_v36 = vpop.f32.mrf.mxu0 }
 0x225   :  { %v5214_v44 = vld [vmem:[#allocation7 + $0x478] sm:$0xf0] }
 0x226   :  { %v6643_v45 = vld [vmem:[#allocation7 + $0x65c] sm:$0xf]  ;;  %v5217_v2 = vor.u32 %v6579_v43, %v5214_v44  ;;  %3639 = vmatpush.bf16.msrb.mxu3 %v6017_v1  ;;  %v6896_v44 = vld [vmem:[#allocation11 + $0x38] sm:$0xff] }
 0x227   :  { %v5470_v48 = vld [vmem:[#allocation7 + $0x678] sm:$0xf0]  ;;  %v6912_v1 = vld [vmem:[#allocation11 + $0xb8] sm:$0xff] }
 0x228   :  { %v6707_v49 = vld [vmem:[#allocation7 + $0x85c] sm:$0xf]  ;;  %v5473_v10 = vor.u32 %v6643_v45, %v5470_v48  ;;  %3598 = vmatpush.bf16.msrb.mxu0 %v5217_v2  ;;  %v6904_v45 = vld [vmem:[#allocation11 + $0x78] sm:$0xff]  ;;  %v2988_v2 = vadd.f32 %v7327_v29, %v7296_v31  ;;  %v3240_v31 = vadd.f32 %v7401_v62, %v7302_v63  ;;  %v3154_v29 = vadd.f32 %v7369_v20, %v7292_v22  ;;  %v6910_v63 = vld [vmem:[#allocation11 + $0xa8] sm:$0xff] }
 0x229   :  { %v5726_v47 = vld [vmem:[#allocation7 + $0x878] sm:$0xf0]  ;;  %v6920_v48 = vld [vmem:[#allocation11 + $0xf8] sm:$0xff] }
 0x22a   :  { %v6771_v54 = vld [vmem:[#allocation7 + $0xa5c] sm:$0xf]  ;;  %v5729_v25 = vor.u32 %v6707_v49, %v5726_v47  ;;  %3612 = vmatpush.bf16.msrb.mxu1 %v5473_v10  ;;  %v7415_v49 = vpop.f32.mrf.mxu2  ;;  %v3254_v22 = vadd.f32 %v7403_v46, %v3240_v31  ;;  %v6917_v46 = vld [vmem:[#allocation11 + $0xe0] sm:$0xff] }
 0x22b   :  { %v5982_v3 = vld [vmem:[#allocation7 + $0xa78] sm:$0xf0] }
 0x22c   :  { %v6571_v17 = vld [vmem:[#allocation7 + $0x41c] sm:$0xf]  ;;  %v5985_v56 = vor.u32 %v6771_v54, %v5982_v3  ;;  %3626 = vmatpush.bf16.msrb.mxu2 %v5729_v25  ;;  %v7419_v54 = vpop.f32.mrf.mxu3  ;;  %v7421_v3 = vpop.f32.mrf.mxu0  ;;  %v3156_v25 = vadd.f32 %v7377_v11, %v7300_v58  ;;  %v6894_v58 = vld [vmem:[#allocation11 + $0x28] sm:$0xff]  ;;  %v3002_v11 = vadd.f32 %v7329_v33, %v2988_v2  ;;  %v7468_v2 = vld [vmem:[#allocation10] sm:$0xff] }
 0x22d   :  { %v5182_v18 = vld [vmem:[#allocation7 + $0x438] sm:$0xf0] }
 0x22e   :  { %v6635_v28 = vld [vmem:[#allocation7 + $0x61c] sm:$0xf]  ;;  %v5185_v39 = vor.u32 %v6571_v17, %v5182_v18  ;;  %3640 = vmatpush.bf16.msrb.mxu3 %v5985_v56  ;;  %v7425_v17 = vpop.f32.mrf.mxu1  ;;  %v3016_v62 = vadd.f32 %v7335_v59, %v3002_v11  ;;  %v3268_v56 = vadd.f32 %v3267_v36, %v3254_v22  ;;  %v6892_v36 = vld [vmem:[#allocation11 + $0x18] sm:$0xff]  ;;  %v6905_v22 = vld [vmem:[#allocation11 + $0x80] sm:$0xff] }
 0x22f   :  { %v5438_v34 = vld [vmem:[#allocation7 + $0x638] sm:$0xf0] }
 0x230   :  { %v6699_v35 = vld [vmem:[#allocation7 + $0x81c] sm:$0xf]  ;;  %v5441_v38 = vor.u32 %v6635_v28, %v5438_v34  ;;  %3599 = vmatpush.bf16.msrb.mxu0 %v5185_v39  ;;  %v6902_v28 = vld [vmem:[#allocation11 + $0x68] sm:$0xff] }
 0x231   :  { %v5694_v23 = vld [vmem:[#allocation7 + $0x838] sm:$0xf0] }
 0x232   :  { %v6763_v61 = vld [vmem:[#allocation7 + $0xa1c] sm:$0xf]  ;;  %v5697_v42 = vor.u32 %v6699_v35, %v5694_v23  ;;  %3613 = vmatpush.bf16.msrb.mxu1 %v5441_v38  ;;  %v7443_v33 = vpop.f32.mrf.mxu2  ;;  %v6909_v35 = vld [vmem:[#allocation11 + $0xa0] sm:$0xff]  ;;  %v3282_v38 = vadd.f32 %v7413_v5, %v3268_v56 }
 0x233   :  { %v5953_v43 = vor.u32 %v6763_v61, %v5950_v13  ;;  %v6895_v47 = vld [vmem:[#allocation11 + $0x30] sm:$0xff]  ;;  %3600 = vmatmul.bf16.vlgmr.msrb.gmra.mxu0 %v7262_v60  ;;  %v3238_v60 = vadd.f32 %v7389_v51, %v7294_v27  ;;  %v6893_v27 = vld [vmem:[#allocation11 + $0x20] sm:$0xff] }
 0x234   :  { %3627 = vmatpush.bf16.msrb.mxu2 %v5697_v42  ;;  %4222 = vmatpush.bf16.msra.mxu0 %v6896_v44  ;;  %v6903_v13 = vld [vmem:[#allocation11 + $0x70] sm:$0xff]  ;;  %v7446_v34 = vpop.f32.mrf.mxu3  ;;  %v7451_v23 = vpop.f32.mrf.mxu0  ;;  %v6908_v42 = vld [vmem:[#allocation11 + $0x98] sm:$0xff]  ;;  %v3296_v44 = vadd.f32 %v7415_v49, %v3282_v38 }
 0x235   :  { %3641 = vmatpush.bf16.msrb.mxu3 %v5953_v43  ;;  %v6911_v10 = vld [vmem:[#allocation11 + $0xb0] sm:$0xff]  ;;  %3614 = vmatmul.bf16.vlgmr.msrb.gmra.mxu1 %v7266_v0  ;;  %v3170_v0 = vadd.f32 %v7379_v24, %v3156_v25  ;;  %v3252_v51 = vadd.f32 %v7392_v9, %v3238_v60  ;;  %v6901_v24 = vld [vmem:[#allocation11 + $0x60] sm:$0xff]  ;;  %v6916_v43 = vld [vmem:[#allocation11 + $0xd8] sm:$0xff] }
 0x236   :  { %4236 = vmatpush.bf16.msra.mxu1 %v6904_v45  ;;  %v6919_v18 = vld [vmem:[#allocation11 + $0xf0] sm:$0xff]  ;;  %v7454_v9 = vpop.f32.mrf.mxu1  ;;  %v3310_v49 = vadd.f32 %v7419_v54, %v3296_v44  ;;  %v6898_v54 = vld [vmem:[#allocation11 + $0x48] sm:$0xff]  ;;  %v7525_v44 = vld [vmem:[#allocation21_spill] sm:$0xff] }
 0x237   :  { %3628 = vmatmul.bf16.vlgmr.msrb.gmra.mxu2 %v7272_v37  ;;  %v6918_v37 = vld [vmem:[#allocation11 + $0xe8] sm:$0xff]  ;;  %v3184_v20 = vadd.f32 %v7381_v52, %v3170_v0  ;;  %v3266_v52 = vadd.f32 %v7405_v21, %v3252_v51  ;;  %v6889_v0 = vld [vmem:[#allocation11] sm:$0xff]  ;;  %v6928_v51 = vld [vmem:[#allocation11 + $0x138] sm:$0xff] }
 0x238   :  { %4250 = vmatpush.bf16.msra.mxu2 %v6912_v1  ;;  %3642 = vmatmul.bf16.vlgmr.msrb.gmra.mxu3 %v7274_v41  ;;  %v3168_v41 = vadd.f32 %v7371_v55, %v3154_v29  ;;  %v3030_v55 = vadd.f32 %v7337_v8, %v3016_v62  ;;  %v3653_v29 = vperm.slane %v7468_v2, 3  ;;  %v6914_v60 = vld [vmem:[#allocation11 + $0xc8] sm:$0xff] }
 0x239   :  { %4264 = vmatpush.bf16.msra.mxu3 %v6920_v48  ;;  %4223 = vmatpush.bf16.msra.mxu0 %v6895_v47  ;;  %v3198_v61 = vadd.f32 %v7383_v14, %v3184_v20  ;;  %v3280_v14 = vadd.f32 %v7407_v30, %v3266_v52  ;;  %v6899_v48 = vld [vmem:[#allocation11 + $0x50] sm:$0xff] }
 0x23a   :  { %4237 = vmatpush.bf16.msra.mxu1 %v6903_v13  ;;  %v3182_v59 = vadd.f32 %v7373_v53, %v3168_v41  ;;  %v3044_v39 = vadd.f32 %v7345_v12, %v3030_v55  ;;  %v6900_v53 = vld [vmem:[#allocation11 + $0x58] sm:$0xff]  ;;  %v6891_v12 = vld [vmem:[#allocation11 + $0x10] sm:$0xff]  ;;  %v7466_v47 = vpop.f32.mrf.mxu2 }
 0x23b   :  { %v3212_v21 = vadd.f32 %v7397_v16, %v3198_v61  ;;  %v3294_v1 = vadd.f32 %v7409_v40, %v3280_v14  ;;  %v6915_v30 = vld [vmem:[#allocation11 + $0xd0] sm:$0xff] }
 0x23c   :  { %4251 = vmatpush.bf16.msra.mxu2 %v6911_v10  ;;  %v3196_v8 = vadd.f32 %v7375_v6, %v3182_v59  ;;  %v3058_v5 = vadd.f32 %v7347_v15, %v3044_v39  ;;  %v6907_v6 = vld [vmem:[#allocation11 + $0x90] sm:$0xff]  ;;  %v7472_v13 = vpop.f32.mrf.mxu3  ;;  %v7474_v15 = vpop.f32.mrf.mxu0  ;;  %v3652_v10 = vperm.slane %v7468_v2, 2  ;;  %v6936_v59 = vld [vmem:[#allocation11 + $0x178] sm:$0xff] }
 0x23d   :  { %4265 = vmatpush.bf16.msra.mxu3 %v6919_v18  ;;  %4224 = vmatpush.bf16.msra.mxu0 %v6894_v58  ;;  %v3226_v16 = vadd.f32 %v7399_v32, %v3212_v21  ;;  %v6890_v32 = vld [vmem:[#allocation11 + $0x8] sm:$0xff]  ;;  %v3308_v31 = vadd.f32 %v7411_v7, %v3294_v1  ;;  %v6897_v7 = vld [vmem:[#allocation11 + $0x40] sm:$0xff]  ;;  %v6927_v39 = vld [vmem:[#allocation11 + $0x130] sm:$0xff] }
 0x23e   :  { %4238 = vmatpush.bf16.msra.mxu1 %v6902_v28  ;;  %v3210_v45 = vadd.f32 %v7385_v4, %v3196_v8  ;;  %v3650_v4 = vperm.slane %v7468_v2, 0  ;;  %v7478_v25 = vpop.f32.mrf.mxu1  ;;  %v6906_v58 = vld [vmem:[#allocation11 + $0x88] sm:$0xff]  ;;  %v3677_v28 = vadd.f32 %v3653_v29, %v3310_v49  ;;  %v7524_v8 = vld [vmem:[#allocation20_spill] sm:$0xff] }
 0x23f   :  { %v3676_v11 = vadd.f32 %v3652_v10, %v3226_v16  ;;  %v3669_v62 = vadd.f32 %v3653_v29, %v3308_v31  ;;  %v3322_v21 = vadd.f32 %v7421_v3, %v7524_v8  ;;  %v6941_v8 = vld [vmem:[#allocation11 + $0x1a0] sm:$0xff] }
 0x240   :  { %4252 = vmatpush.bf16.msra.mxu2 %v6910_v63  ;;  %v3224_v40 = vadd.f32 %v7387_v57, %v3210_v45  ;;  %v3674_v18 = vadd.f32 %v3650_v4, %v3058_v5  ;;  %v3666_v57 = vadd.f32 %v3650_v4, %v7340_v26  ;;  %v7526_v4 = vld [vmem:[#allocation24_spill] sm:$0xff] }
 0x241   :  { %4266 = vmatpush.bf16.msra.mxu3 %v6918_v37  ;;  %4225 = vmatpush.bf16.msra.mxu0 %v6893_v27  ;;  %v3692_v41 = vmax.f32 %v3676_v11, 0.0  ;;  %v6913_v27 = vld [vmem:[#allocation11 + $0xc0] sm:$0xff]  ;;  %v3685_v55 = vmax.f32 %v3669_v62, 0.0  ;;  %v6923_v11 = vld [vmem:[#allocation11 + $0x110] sm:$0xff] }
 0x242   :  { %4239 = vmatpush.bf16.msra.mxu1 %v6901_v24  ;;  %v3668_v63 = vadd.f32 %v3652_v10, %v3224_v40  ;;  %v3690_v37 = vmax.f32 %v3674_v18, 0.0  ;;  %v3405_v20 = vpop.f32.mrf.mxu2  ;;  %v3682_v56 = vmax.f32 %v3666_v57, 0.0  ;;  %v3693_v24 = vmax.f32 %v3677_v28, 0.0  ;;  %v6924_v10 = vld [vmem:[#allocation11 + $0x118] sm:$0xff]  ;;  %v6931_v28 = vld [vmem:[#allocation11 + $0x150] sm:$0xff] }
 0x243   :  { %v3406_v45 = vadd.f32 %v3405_v20, %v7525_v44 }
 0x244   :  { %4253 = vmatpush.bf16.msra.mxu2 %v6909_v35  ;;  %v3419_v35 = vpop.f32.mrf.mxu3  ;;  %v3684_v26 = vmax.f32 %v3668_v63, 0.0  ;;  %v3379_v52 = vpop.f32.mrf.mxu0  ;;  %v3701_v38 = vpack.c.bf16 %v3693_v24, %v3685_v55  ;;  %v6944_v24 = vld [vmem:[#allocation11 + $0x1b8] sm:$0xff]  ;;  %v6943_v55 = vld [vmem:[#allocation11 + $0x1b0] sm:$0xff] }
 0x245   :  { %4267 = vmatpush.bf16.msra.mxu3 %v6917_v46  ;;  %4226 = vmatpush.bf16.msra.mxu0 %v6892_v36  ;;  %v3698_v46 = vpack.c.bf16 %v3690_v37, %v3682_v56  ;;  %v3420_v16 = vadd.f32 %v3419_v35, %v3406_v45  ;;  %v6922_v37 = vld [vmem:[#allocation11 + $0x108] sm:$0xff]  ;;  %v6921_v35 = vld [vmem:[#allocation11 + $0x100] sm:$0xff] }
 0x246   :  { %4240 = vmatpush.bf16.msra.mxu1 %v6900_v53  ;;  %v3700_v61 = vpack.c.bf16 %v3692_v41, %v3684_v26  ;;  %v3393_v36 = vpop.f32.mrf.mxu1  ;;  %v3324_v53 = vadd.f32 %v7451_v23, %v7312_v50  ;;  %v3336_v50 = vadd.f32 %v7425_v17, %v3322_v21  ;;  %v6930_v41 = vld [vmem:[#allocation11 + $0x148] sm:$0xff]  ;;  %v6940_v21 = vld [vmem:[#allocation11 + $0x198] sm:$0xff] }
 0x248   :  { %4254 = vmatpush.bf16.msra.mxu2 %v6908_v42  ;;  %v6935_v42 = vld [vmem:[#allocation11 + $0x170] sm:$0xff]  ;;  %v3338_v14 = vadd.f32 %v7454_v9, %v3324_v53  ;;  %v3350_v3 = vadd.f32 %v7443_v33, %v3336_v50  ;;  %v6942_v53 = vld [vmem:[#allocation11 + $0x1a8] sm:$0xff] }
 0x249   :  { %4268 = vmatpush.bf16.msra.mxu3 %v6916_v43  ;;  %4227 = vmatpush.bf16.msra.mxu0 %v6891_v12  ;;  %v6926_v43 = vld [vmem:[#allocation11 + $0x128] sm:$0xff]  ;;  %v6951_v50 = vld [vmem:[#allocation11 + $0x1f0] sm:$0xff] }
 0x24a   :  { %4241 = vmatpush.bf16.msra.mxu1 %v6899_v48  ;;  %v6934_v12 = vld [vmem:[#allocation11 + $0x168] sm:$0xff]  ;;  %v3407_v5 = vpop.f32.mrf.mxu2  ;;  %v3352_v23 = vadd.f32 %v7466_v47, %v3338_v14  ;;  %v6925_v48 = vld [vmem:[#allocation11 + $0x120] sm:$0xff]  ;;  %v3364_v17 = vadd.f32 %v7446_v34, %v3350_v3 }
 0x24b   :  { %v3408_v49 = vadd.f32 %v3407_v5, %v7526_v4  ;;  %v6938_v14 = vld [vmem:[#allocation11 + $0x188] sm:$0xff]  ;;  %v6952_v5 = vld [vmem:[#allocation11 + $0x1f8] sm:$0xff] }
 0x24c   :  { %4255 = vmatpush.bf16.msra.mxu2 %v6907_v6  ;;  %v3421_v1 = vpop.f32.mrf.mxu3  ;;  %v3366_v9 = vadd.f32 %v7472_v13, %v3352_v23  ;;  %v3378_v31 = vadd.f32 %v7474_v15, %v3364_v17 }
 0x24d   :  { %4269 = vmatpush.bf16.msra.mxu3 %v6915_v30  ;;  %4228 = vmatpush.bf16.msra.mxu0 %v6890_v32  ;;  %v6933_v30 = vld [vmem:[#allocation11 + $0x160] sm:$0xff]  ;;  %v6932_v32 = vld [vmem:[#allocation11 + $0x158] sm:$0xff]  ;;  %v3422_v29 = vadd.f32 %v3421_v1, %v3408_v49 }
 0x24e   :  { %4242 = vmatpush.bf16.msra.mxu1 %v6898_v54  ;;  %v3447_v6 = vpop.f32.mrf.mxu1  ;;  %v3380_v47 = vadd.f32 %v3379_v52, %v3366_v9  ;;  %v3392_v34 = vadd.f32 %v7478_v25, %v3378_v31  ;;  %v7527_v1 = vld [vmem:[#allocation22_spill] sm:$0xff]  ;;  %v7528_v9 = vld [vmem:[#allocation25_spill] sm:$0xff] }
 0x250   :  { %4256 = vmatpush.bf16.msra.mxu2 %v6906_v58  ;;  %v3394_v13 = vadd.f32 %v3393_v36, %v3380_v47 }
 0x251   :  { %4270 = vmatpush.bf16.msra.mxu3 %v6914_v60  ;;  %4229 = vmatpush.bf16.msra.mxu0 %v6889_v0  ;;  %v3654_v0 = vperm.slane %v7468_v2, 4 }
 0x252   :  { %4243 = vmatpush.bf16.msra.mxu1 %v6897_v7  ;;  %v3461_v18 = vpop.f32.mrf.mxu2  ;;  %v3655_v7 = vperm.slane %v7468_v2, 5 }
 0x253   :  { %v3678_v62 = vadd.f32 %v3654_v0, %v3394_v13 }
 0x254   :  { %4257 = vmatpush.bf16.msra.mxu2 %v6905_v22  ;;  %4230 = vmatmul.bf16.vlgmr.msra.gmra.mxu0 %v3698_v46  ;;  %v3475_v58 = vpop.f32.mrf.mxu3  ;;  %v6929_v46 = vld [vmem:[#allocation11 + $0x140] sm:$0xff] }
 0x255   :  { %4271 = vmatpush.bf16.msra.mxu3 %v6913_v27  ;;  %4278 = vmatpush.bf16.msrb.mxu0 %v6928_v51  ;;  %v3670_v27 = vadd.f32 %v3654_v0, %v3392_v34  ;;  %v6947_v0 = vld [vmem:[#allocation11 + $0x1d0] sm:$0xff] }
 0x256   :  { %4292 = vmatpush.bf16.msrb.mxu1 %v6936_v59  ;;  %v3449_v63 = vpop.f32.mrf.mxu1  ;;  %v3694_v59 = vmax.f32 %v3678_v62, 0.0 }
 0x257   :  { %4244 = vmatmul.bf16.vlgmr.msra.gmra.mxu1 %v7355_v19  ;;  %4258 = vmatmul.bf16.vlgmr.msra.gmra.mxu2 %v3700_v61  ;;  %v3433_v19 = vpop.f32.mrf.mxu0  ;;  %v3686_v52 = vmax.f32 %v3670_v27, 0.0  ;;  %v6945_v27 = vld [vmem:[#allocation11 + $0x1c0] sm:$0xff] }
 0x258   :  { %4272 = vmatmul.bf16.vlgmr.msra.gmra.mxu3 %v3701_v38  ;;  %v3434_v40 = vadd.f32 %v3433_v19, %v3420_v16  ;;  %4306 = vmatpush.bf16.msrb.mxu2 %v6944_v24 }
 0x259   :  { %4279 = vmatpush.bf16.msrb.mxu0 %v6927_v39  ;;  %v3702_v36 = vpack.c.bf16 %v3694_v59, %v3686_v52  ;;  %4320 = vmatpush.bf16.msrb.mxu3 %v6952_v5 }
 0x25a   :  { %4293 = vmatpush.bf16.msrb.mxu1 %v6935_v42  ;;  %v3448_v33 = vadd.f32 %v3447_v6, %v3434_v40  ;;  %v3463_v20 = vpop.f32.mrf.mxu2 }
 0x25c   :  { %v3462_v60 = vadd.f32 %v3461_v18, %v3448_v33  ;;  %v3477_v56 = vpop.f32.mrf.mxu3  ;;  %4307 = vmatpush.bf16.msrb.mxu2 %v6943_v55  ;;  %v6949_v33 = vld [vmem:[#allocation11 + $0x1e0] sm:$0xff] }
 0x25d   :  { %4280 = vmatpush.bf16.msrb.mxu0 %v6926_v43  ;;  %v6939_v43 = vld [vmem:[#allocation11 + $0x190] sm:$0xff]  ;;  %4321 = vmatpush.bf16.msrb.mxu3 %v6951_v50 }
 0x25e   :  { %4294 = vmatpush.bf16.msrb.mxu1 %v6934_v12  ;;  %v3476_v15 = vadd.f32 %v3475_v58, %v3462_v60  ;;  %v3503_v45 = vpop.f32.mrf.mxu1  ;;  %v6937_v12 = vld [vmem:[#allocation11 + $0x180] sm:$0xff]  ;;  %v6948_v60 = vld [vmem:[#allocation11 + $0x1d8] sm:$0xff] }
 0x25f   :  { %v3435_v54 = vpop.f32.mrf.mxu0 }
 0x260   :  { %v3436_v57 = vadd.f32 %v3435_v54, %v3422_v29  ;;  %v3671_v25 = vadd.f32 %v3655_v7, %v3476_v15  ;;  %4308 = vmatpush.bf16.msrb.mxu2 %v6942_v53 }
 0x261   :  { %4281 = vmatpush.bf16.msrb.mxu0 %v6925_v48 }
 0x262   :  { %4295 = vmatpush.bf16.msrb.mxu1 %v6933_v30  ;;  %v3450_v22 = vadd.f32 %v3449_v63, %v3436_v57  ;;  %v3687_v39 = vmax.f32 %v3671_v25, 0.0 }
 0x264   :  { %v3464_v51 = vadd.f32 %v3463_v20, %v3450_v22  ;;  %4309 = vmatpush.bf16.msrb.mxu2 %v6941_v8 }
 0x265   :  { %4282 = vmatpush.bf16.msrb.mxu0 %v6924_v10  ;;  %v3517_v23 = vpop.f32.mrf.mxu2  ;;  %v6950_v10 = vld [vmem:[#allocation11 + $0x1e8] sm:$0xff] }
 0x266   :  { %4296 = vmatpush.bf16.msrb.mxu1 %v6932_v32  ;;  %v3478_v26 = vadd.f32 %v3477_v56, %v3464_v51  ;;  %v3505_v6 = vpop.f32.mrf.mxu1  ;;  %4322 = vmatpush.bf16.msrb.mxu3 %v6950_v10  ;;  %v7529_v51 = vld [vmem:[#allocation23_spill] sm:$0xff] }
 0x267   :  { %v3489_v44 = vpop.f32.mrf.mxu0  ;;  %v3531_v3 = vpop.f32.mrf.mxu3 }
 0x268   :  { %v3679_v61 = vadd.f32 %v3655_v7, %v3478_v26  ;;  %4310 = vmatpush.bf16.msrb.mxu2 %v6940_v21  ;;  %v3490_v19 = vadd.f32 %v3489_v44, %v7527_v1  ;;  %v6946_v7 = vld [vmem:[#allocation11 + $0x1c8] sm:$0xff] }
 0x269   :  { %4283 = vmatpush.bf16.msrb.mxu0 %v6923_v11  ;;  %v3656_v11 = vperm.slane %v7468_v2, 6 }
 0x26a   :  { %4297 = vmatpush.bf16.msrb.mxu1 %v6931_v28  ;;  %v3695_v38 = vmax.f32 %v3679_v61, 0.0  ;;  %v3504_v16 = vadd.f32 %v3503_v45, %v3490_v19  ;;  %4323 = vmatpush.bf16.msrb.mxu3 %v6949_v33 }
 0x26c   :  { %v3703_v42 = vpack.c.bf16 %v3695_v38, %v3687_v39  ;;  %4311 = vmatpush.bf16.msrb.mxu2 %v6939_v43  ;;  %v3518_v30 = vadd.f32 %v3517_v23, %v3504_v16 }
 0x26d   :  { %4284 = vmatpush.bf16.msrb.mxu0 %v6922_v37  ;;  %v3519_v49 = vpop.f32.mrf.mxu2 }
 0x26e   :  { %4298 = vmatpush.bf16.msrb.mxu1 %v6930_v41  ;;  %v3532_v17 = vadd.f32 %v3531_v3, %v3518_v30  ;;  %4324 = vmatpush.bf16.msrb.mxu3 %v6948_v60 }
 0x26f   :  { %v3491_v48 = vpop.f32.mrf.mxu0  ;;  %v3533_v29 = vpop.f32.mrf.mxu3 }
 0x270   :  { %4312 = vmatpush.bf16.msrb.mxu2 %v6938_v14  ;;  %v3492_v4 = vadd.f32 %v3491_v48, %v7528_v9  ;;  %v3657_v14 = vperm.slane %v7468_v2, 7  ;;  %v6969_v9 = vld [vmem:[#allocation13] ss:$0 sm:$0xff] }
 0x271   :  { %4285 = vmatpush.bf16.msrb.mxu0 %v6921_v35 }
 0x272   :  { %4299 = vmatpush.bf16.msrb.mxu1 %v6929_v46  ;;  %v3506_v47 = vadd.f32 %v3505_v6, %v3492_v4  ;;  %4325 = vmatpush.bf16.msrb.mxu3 %v6947_v0  ;;  %v7530_v46 = vld [vmem:[#allocation26_spill] sm:$0xff] }
 0x274   :  { %4286 = vmatmul.bf16.vlgmr.msrb.gmra.mxu0 %v3702_v36  ;;  %4313 = vmatpush.bf16.msrb.mxu2 %v6937_v12  ;;  %v3520_v18 = vadd.f32 %v3519_v49, %v3506_v47 }
 0x275   :  { %4300 = vmatmul.bf16.vlgmr.msrb.gmra.mxu1 %v3703_v42 }
 0x276   :  { %v3534_v54 = vadd.f32 %v3533_v29, %v3520_v18  ;;  %4326 = vmatpush.bf16.msrb.mxu3 %v6946_v7 }
 0x27a   :  { %4327 = vmatpush.bf16.msrb.mxu3 %v6945_v27 }
 0x27f   :  { %v3545_v40 = vpop.f32.mrf.mxu0 }
 0x280   :  { %v3546_v31 = vadd.f32 %v3545_v40, %v3532_v17 }
 0x281   :  { %v3559_v32 = vpop.f32.mrf.mxu1 }
 0x282   :  { %v3560_v58 = vadd.f32 %v3559_v32, %v3546_v31 }
 0x284   :  { %v3672_v63 = vadd.f32 %v3656_v11, %v3560_v58 }
 0x285   :  { %v3573_v41 = vpop.f32.mrf.mxu2 }
 0x286   :  { %v3688_v62 = vmax.f32 %v3672_v63, 0.0  ;;  %v3574_v56 = vadd.f32 %v3573_v41, %v7529_v51 }
 0x287   :  { %v3547_v13 = vpop.f32.mrf.mxu0  ;;  %v3587_v20 = vpop.f32.mrf.mxu3 }
 0x288   :  { %v3548_v57 = vadd.f32 %v3547_v13, %v3534_v54  ;;  %v3588_v25 = vadd.f32 %v3587_v20, %v3574_v56 }
 0x289   :  { %v3561_v28 = vpop.f32.mrf.mxu1 }
 0x28a   :  { %v3562_v34 = vadd.f32 %v3561_v28, %v3548_v57 }
 0x28c   :  { %v3680_v37 = vadd.f32 %v3656_v11, %v3562_v34 }
 0x28d   :  { %v3575_v24 = vpop.f32.mrf.mxu2 }
 0x28e   :  { %v3696_v15 = vmax.f32 %v3680_v37, 0.0  ;;  %v3576_v55 = vadd.f32 %v3575_v24, %v7530_v46 }
 0x28f   :  { %v3589_v35 = vpop.f32.mrf.mxu3 }
 0x290   :  { %v3704_v22 = vpack.c.bf16 %v3696_v15, %v3688_v62  ;;  %v3590_v36 = vadd.f32 %v3589_v35, %v3576_v55 }
 0x292   :  { %4314 = vmatmul.bf16.vlgmr.msrb.gmra.mxu2 %v3704_v22 }
 0x2b0   :  { %v3601_v59 = vpop.f32.mrf.mxu0 }
 0x2b1   :  { %v3602_v52 = vadd.f32 %v3601_v59, %v3588_v25 }
 0x2b2   :  { %v3615_v26 = vpop.f32.mrf.mxu1 }
 0x2b3   :  { %v3616_v39 = vadd.f32 %v3615_v26, %v3602_v52 }
 0x2b8   :  { %v3603_v53 = vpop.f32.mrf.mxu0 }
 0x2b9   :  { %v3604_v8 = vadd.f32 %v3603_v53, %v3590_v36 }
 0x2ba   :  { %v3629_v61 = vpop.f32.mrf.mxu2  ;;  %v3617_v21 = vpop.f32.mrf.mxu1 }
 0x2bb   :  { %v3643_v38 = vpop.f32.mrf.mxu3  ;;  %v3630_v42 = vadd.f32 %v3629_v61, %v3616_v39  ;;  %v3618_v44 = vadd.f32 %v3617_v21, %v3604_v8 }
 0x2bd   :  { %v3644_v43 = vadd.f32 %v3643_v38, %v3630_v42 }
 0x2bf   :  { %v3673_v50 = vadd.f32 %v3657_v14, %v3644_v43 }
 0x2c1   :  { %v3689_v19 = vmax.f32 %v3673_v50, 0.0 }
 0x2c2   :  { %v3631_v45 = vpop.f32.mrf.mxu2 }
 0x2c3   :  { %v3632_v12 = vadd.f32 %v3631_v45, %v3618_v44  ;;  %v3645_v5 = vpop.f32.mrf.mxu3 }
 0x2c5   :  { %v3646_v23 = vadd.f32 %v3645_v5, %v3632_v12 }
 0x2c7   :  { %v3681_v1 = vadd.f32 %v3657_v14, %v3646_v23 }
 0x2c9   :  { %v3697_v48 = vmax.f32 %v3681_v1, 0.0 }
 0x2cb   :  { %v3705_v6 = vpack.c.bf16 %v3697_v48, %v3689_v19 }
 0x2cd   :  { %4328 = vmatmul.bf16.vlgmr.msrb.gmra.mxu3 %v3705_v6 }
 0x2d1   :  { %v4231_v3 = vpop.f32.mrf.mxu0 }
 0x2d2   :  { %v4232_v40 = vadd.f32 %v6969_v9, %v4231_v3 }
 0x2d4   :  { %v4245_v16 = vpop.f32.mrf.mxu1 }
 0x2d5   :  { %v4246_v17 = vadd.f32 %v4245_v16, %v4232_v40 }
 0x2d9   :  { %v4233_v49 = vpop.f32.mrf.mxu0 }
 0x2da   :  { %v4259_v30 = vpop.f32.mrf.mxu2  ;;  %v4234_v18 = vadd.f32 %v6969_v9, %v4233_v49 }
 0x2db   :  { %v4273_v4 = vpop.f32.mrf.mxu3  ;;  %v4260_v47 = vadd.f32 %v4259_v30, %v4246_v17 }
 0x2dc   :  { %v4247_v10 = vpop.f32.mrf.mxu1 }
 0x2dd   :  { %v4274_v33 = vadd.f32 %v4273_v4, %v4260_v47  ;;  %v4248_v58 = vadd.f32 %v4247_v10, %v4234_v18 }
 0x2e2   :  { %v4261_v2 = vpop.f32.mrf.mxu2 }
 0x2e3   :  { %v4275_v31 = vpop.f32.mrf.mxu3  ;;  %v4262_v13 = vadd.f32 %v4261_v2, %v4248_v58 }
 0x2e5   :  { %v4276_v34 = vadd.f32 %v4275_v31, %v4262_v13 }
 0x2f1   :  { %v4287_v32 = vpop.f32.mrf.mxu0 }
 0x2f2   :  { %v4301_v29 = vpop.f32.mrf.mxu1  ;;  %v4288_v11 = vadd.f32 %v4287_v32, %v4274_v33 }
 0x2f4   :  { %v4302_v60 = vadd.f32 %v4301_v29, %v4288_v11 }
 0x2f9   :  { %v4289_v28 = vpop.f32.mrf.mxu0 }
 0x2fa   :  { %v4303_v37 = vpop.f32.mrf.mxu1  ;;  %v4290_v62 = vadd.f32 %v4289_v28, %v4276_v34 }
 0x2fc   :  { %v4304_v7 = vadd.f32 %v4303_v37, %v4290_v62 }
 0x315   :  { %v4315_v54 = vpop.f32.mrf.mxu2 }
 0x316   :  { %v4316_v57 = vadd.f32 %v4315_v54, %v4302_v60 }
 0x31d   :  { %v4317_v15 = vpop.f32.mrf.mxu2 }
 0x31e   :  { %v4318_v22 = vadd.f32 %v4317_v15, %v4304_v7 }
 0x350   :  { %v4329_v63 = vpop.f32.mrf.mxu3 }
 0x351   :  { %v4330_v0 = vadd.f32 %v4329_v63, %v4316_v57 }
 0x353   :  { %4334 = vst [vmem:[#allocation14] sm:$0xff] %v4330_v0 }
 0x358   :  { %v4331_v41 = vpop.f32.mrf.mxu3 }
 0x359   :  { %v4332_v20 = vadd.f32 %v4331_v41, %v4318_v22 }
 0x35b   :  { %4335 = vst [vmem:[#allocation14 + $0x8] sm:$0xff] %v4332_v20 }
 0x35c   :  { %4348 = dma.vmem_to_hbm [thread:$0]  %s4341_s6, 256, %s4343_s1, [#allocation4], %s7187_s16, %s7187_s16, %s7188_s17  }
 0x35d   :  { %7171 = dma.done.wait [#allocation4], 256  }
 0x35e   :  { %7172 = vsyncadd [#allocation4], 4294967040 }
 0x35f   :  { %4353 = vsyncpa [#allocation3], 1 }
 0x360   :  { %4354 = vsyncpa [#allocation6], 1 }
 0x361   :  { %4355 = vsyncpa [#allocation9], 1 }
 0x362   :  { %4356 = vsyncpa [#allocation12], 1 }
 0x363   :  { %4357 = vsyncpa [#allocation4], 1 }

</bundles_post_ra>
